<compile_context>
chip_gen: v7x
topology: tpu7x:2x2x1
jax: 0.10.0
libtpu: 0.0.40
codegen_flags: <defaults>
</compile_context>

<pallas_src>
from functools import lru_cache, partial

import jax
import jax.numpy as jnp
import numpy as np
from jax.experimental import pallas as pl
from jax.experimental.pallas import tpu as pltpu

BN_EPS = 1e-5  # PyTorch BatchNorm2d default


# --------------------------------------------------------------------------
# in-kernel building blocks
# --------------------------------------------------------------------------
def _dot(a, b):
    """1x1 conv as a channel matmul.  bf16 MXU operands only when the
    contraction is big enough to matter (tiny channel counts stay f32)."""
    if a.shape[-1] >= 64 and b.shape[-1] >= 64:
        a = a.astype(jnp.bfloat16)
        b = b.astype(jnp.bfloat16)
    return jnp.dot(a, b, preferred_element_type=jnp.float32)


def _edge_masks(n, w):
    """Column-edge masks for the horizontal (1,3) conv, hoisted once per tile
    and shared between the depthwise paths."""
    idx = jax.lax.broadcasted_iota(jnp.int32, (n, 1), 0)
    col = (idx & (w - 1)) if (w & (w - 1)) == 0 else (idx % w)
    lmask = (col > 0).astype(jnp.float32)
    rmask = (col < w - 1).astype(jnp.float32)
    return lmask, rmask


def _dw_pair(top, main, bot, wv, bv, wh, bh, lmask, rmask):
    """Depthwise (3,1) conv then depthwise (1,3) conv on one row tile.

    top/bot: (1, W, C) halo rows (already edge-masked)
    main:    (R, W, C) tile rows
    wv, wh:  (3, C) depthwise weights; bv, bh: (1, C) biases
    lmask/rmask: (R*W, 1) column-edge masks
    Returns (R*W, C).
    """
    r, w, c = main.shape
    n = r * w
    flat = main.reshape(n, c)          # layout-preserving: W is a multiple of 8
    topf = top.reshape(w, c)
    botf = bot.reshape(w, c)
    wv0, wv1, wv2 = wv[0:1], wv[1:2], wv[2:3]

    # vertical (3,1), padding (1,0): interior rows come straight from three
    # row-aligned slices of the tile (no halo-extended concat copy); only the
    # first / last W-row strips use the halo rows.
    y_top = topf * wv0 + flat[:w] * wv1 + flat[w:2 * w] * wv2
    y_bot = flat[n - 2 * w:n - w] * wv0 + flat[n - w:] * wv1 + botf * wv2
    if n > 2 * w:
        y_mid = flat[:n - 2 * w] * wv0 + flat[w:n - w] * wv1 + flat[2 * w:] * wv2
        y = jnp.concatenate([y_top, y_mid, y_bot], axis=0) + bv
    else:
        y = jnp.concatenate([y_top, y_bot], axis=0) + bv

    # horizontal (1,3), padding (0,1): +/-1-element shifts of the row-flattened
    # layout; row edges are zeroed via the hoisted masks.
    zrow = jnp.zeros((1, c), y.dtype)
    left = jnp.concatenate([zrow, y[:n - 1]], axis=0) * lmask
    right = jnp.concatenate([y[1:], zrow], axis=0) * rmask
    return left * wh[0:1] + y * wh[1:2] + right * wh[2:3] + bh


# --------------------------------------------------------------------------
# kernel A: in-VMEM upsample + fused concat + DWSWConv1 (pre-BN) + BN1 stats
# --------------------------------------------------------------------------
def _conv1_kernel(x_ref, xt_ref, xb_ref, s_ref, st_ref, sb_ref,
                  wvx_ref, bvx_ref, whx_ref, bhx_ref,
                  wvs_ref, bvs_ref, whs_ref, bhs_ref,
                  p1_ref, pb1_ref,
                  u_ref, ssum_ref, ssq_ref):
    i = pl.program_id(1)
    last = pl.num_programs(1) - 1
    tmask = jnp.where(i > 0, 1.0, 0.0)      # zero-pad at the global top edge
    bmask = jnp.where(i < last, 1.0, 0.0)   # zero-pad at the global bottom edge

    # row-half of the 2x nearest upsample: free leading-dim broadcast + reshape
    hr, w, cin = x_ref.shape[1], x_ref.shape[2], x_ref.shape[3]
    tr = 2 * hr
    xl = x_ref[0]                                                   # (hr, W2, Cin)
    xm = jnp.broadcast_to(xl[:, None], (hr, 2, w, cin)).reshape(tr, w, cin)

    lmask, rmask = _edge_masks(tr * w, w)   # shared by both depthwise paths

    zx = _dw_pair(xt_ref[0] * tmask, xm, xb_ref[0] * bmask,
                  wvx_ref[...], bvx_ref[...], whx_ref[...], bhx_ref[...],
                  lmask, rmask)
    zs = _dw_pair(st_ref[0] * tmask, s_ref[0], sb_ref[0] * bmask,
                  wvs_ref[...], bvs_ref[...], whs_ref[...], bhs_ref[...],
                  lmask, rmask)

    # fused channel concat + single 1x1 matmul with K = Cin + Cskip
    z = jnp.concatenate([zx, zs], axis=-1)
    u = _dot(z, p1_ref[...]) + pb1_ref[...]                         # (tr*W2, Cout) f32

    cout = u_ref.shape[-1]
    u_ref[0] = u.reshape(tr, w, cout).astype(u_ref.dtype)

    # per-(batch, row-tile) BatchNorm partial stats from the exact f32 values
    ssum_ref[...] = jnp.sum(u, axis=0).reshape(1, 1, 1, cout)
    ssq_ref[...] = jnp.sum(u * u, axis=0).reshape(1, 1, 1, cout)


# --------------------------------------------------------------------------
# kernel B: BN1+ReLU fused in -> DWSWConv2 (pre-BN) + BN2 partial stats
# --------------------------------------------------------------------------
def _conv2_kernel(u1_ref, ut_ref, ub_ref, a1_ref, o1_ref,
                  wv_ref, bv_ref, wh_ref, bh_ref, p2_ref, pb2_ref,
                  u_ref, ssum_ref, ssq_ref):
    i = pl.program_id(1)
    last = pl.num_programs(1) - 1
    tmask = jnp.where(i > 0, 1.0, 0.0)
    bmask = jnp.where(i < last, 1.0, 0.0)
    a1 = a1_ref[...]
    o1 = o1_ref[...]

    def bn_relu(v):  # BN1 folded into a per-channel affine; f32 VPU math (v5e-safe)
        return jnp.maximum(v.astype(jnp.float32) * a1 + o1, 0.0)

    tr, w = u1_ref.shape[1], u1_ref.shape[2]
    lmask, rmask = _edge_masks(tr * w, w)

    z = _dw_pair(bn_relu(ut_ref[0]) * tmask,
                 bn_relu(u1_ref[0]),
                 bn_relu(ub_ref[0]) * bmask,
                 wv_ref[...], bv_ref[...], wh_ref[...], bh_ref[...],
                 lmask, rmask)
    u = _dot(z, p2_ref[...]) + pb2_ref[...]

    cout = u_ref.shape[-1]
    u_ref[0] = u.reshape(tr, w, cout).astype(u_ref.dtype)
    ssum_ref[...] = jnp.sum(u, axis=0).reshape(1, 1, 1, cout)
    ssq_ref[...] = jnp.sum(u * u, axis=0).reshape(1, 1, 1, cout)


# --------------------------------------------------------------------------
# planning helpers (per-generation tile / VMEM budget)
# --------------------------------------------------------------------------
@lru_cache(maxsize=None)
def _tpu_vmem_bytes():
    try:
        info = pltpu.get_tpu_info()
        v = getattr(info, "vmem_capacity_bytes", None)
        if v:
            return int(v)
    except Exception:
        pass
    return 64 << 20  # conservative default (v7x per-TensorCore VMEM)


def _plan(h2, w2, cin, cskip, cout, max_tile_rows):
    vmem = _tpu_vmem_bytes()
    # rough VMEM bytes per upsampled row: tiles (double-buffered) + temporaries
    row_bytes = 4 * w2 * (2 * cin + 3 * cskip + 6 * cout) + 512
    cap = max(4, min(256, (vmem // 6) // row_bytes))
    if max_tile_rows is not None:
        cap = min(cap, max(2, int(max_tile_rows)))
    # largest EVEN divisor of h2 not exceeding cap (h2 = 2*h, so tr=2 always
    # exists -> no whole-image fallback blowing past the VMEM budget).
    tr, t = 2, 2
    while t <= cap:
        if h2 % t == 0:
            tr = t
        t += 2
    vmem_limit = int(min(max(10 * row_bytes * tr, 32 << 20), (vmem * 3) // 4))
    return tr, vmem_limit


def _bn_affine(ssum, ssq, gamma, beta, count):
    # TODO(synk): E[x^2] - E[x]^2 in f32 can cancel when |mean| >> std; a shifted /
    # Welford-style accumulation would be more robust for extreme activations.
    s = jnp.sum(ssum, axis=(0, 1))[0]     # (Cout,)
    q = jnp.sum(ssq, axis=(0, 1))[0]
    mean = s / count
    var = jnp.maximum(q / count - mean * mean, 0.0)
    inv = jax.lax.rsqrt(var + BN_EPS)
    a = gamma[0] * inv
    c = beta[0] - mean * a
    return a[None, :], c[None, :]         # (1, Cout) each


# --------------------------------------------------------------------------
# wrapper
# --------------------------------------------------------------------------
@partial(jax.jit, static_argnames=("max_tile_rows", "interm_dtype"))
def light_decoder_block(x_nchw, skip_nchw, params, *, max_tile_rows=None,
                        interm_dtype="bfloat16"):
    """NCHW in / NCHW out; the Pallas kernels run in NHWC row tiles."""
    f32 = jnp.float32
    idt = jnp.bfloat16 if interm_dtype == "bfloat16" else f32
    n, cin, h, w = x_nchw.shape
    _, cskip, h2, w2 = skip_nchw.shape
    cout = params["p1"].shape[1]
    assert h2 == 2 * h and w2 == 2 * w, "skip must be 2x the spatial size of x"
    assert w2 % 8 == 0, "kernel assumes the upsampled width is a multiple of 8"

    # Layout glue (XLA): NCHW -> NHWC.  Only the WIDTH half of the 2x nearest
    # upsample is materialized here (on the small low-res tensor, fused with the
    # transpose copy); the ROW half happens in-VMEM inside kernel A.
    # TODO(synk): fusing the width duplication in-kernel too needs a sublane
    # interleave (strided store / minor-dim reshape); left in XLA for safety.
    x_w = jnp.repeat(jnp.transpose(x_nchw.astype(f32), (0, 2, 3, 1)), 2, axis=2)
    s_nhwc = jnp.transpose(skip_nchw.astype(f32), (0, 2, 3, 1))

    p = {k: jnp.asarray(v, f32) for k, v in params.items()}
    # split the depthwise conv1 params into the upsampled-x part / skip part
    wvx, wvs = p["w1v"][:, :cin], p["w1v"][:, cin:]
    bvx, bvs = p["b1v"][:, :cin], p["b1v"][:, cin:]
    whx, whs = p["w1h"][:, :cin], p["w1h"][:, cin:]
    bhx, bhs = p["b1h"][:, :cin], p["b1h"][:, cin:]

    tr, vmem_limit = _plan(h2, w2, cin, cskip, cout, max_tile_rows)
    hr, nt = tr // 2, h2 // tr
    grid = (n, nt)

    def param_spec(arr):  # full-array block, constant index (resident)
        zero = (0,) * arr.ndim
        return pl.BlockSpec(arr.shape, lambda b, i, _z=zero: _z)

    def stat_spec():      # per-(batch, row-tile) partial-stat block
        return pl.BlockSpec((1, 1, 1, cout), lambda b, i: (b, i, 0, 0))

    cparams = pltpu.CompilerParams(
        dimension_semantics=("parallel", "parallel"),
        vmem_limit_bytes=vmem_limit)

    # ---- kernel A: upsample + concat + DWSWConv1 (pre-BN) + BN1 partial stats --
    a_params = (wvx, bvx, whx, bhx, wvs, bvs, whs, bhs, p["p1"], p["pb1"])
    u1, ssum1, ssq1 = pl.pallas_call(
        _conv1_kernel,
        grid=grid,
        in_specs=([
            pl.BlockSpec((1, hr, w2, cin), lambda b, i: (b, i, 0, 0)),
            pl.BlockSpec((1, 1, w2, cin),
                         lambda b, i: (b, jnp.maximum(i * hr - 1, 0), 0, 0)),
            pl.BlockSpec((1, 1, w2, cin),
                         lambda b, i: (b, jnp.minimum((i + 1) * hr, h - 1), 0, 0)),
            pl.BlockSpec((1, tr, w2, cskip), lambda b, i: (b, i, 0, 0)),
            pl.BlockSpec((1, 1, w2, cskip),
                         lambda b, i: (b, jnp.maximum(i * tr - 1, 0), 0, 0)),
            pl.BlockSpec((1, 1, w2, cskip),
                         lambda b, i: (b, jnp.minimum((i + 1) * tr, h2 - 1), 0, 0)),
        ] + [param_spec(a) for a in a_params]),
        out_specs=(pl.BlockSpec((1, tr, w2, cout), lambda b, i: (b, i, 0, 0)),
                   stat_spec(), stat_spec()),
        out_shape=(jax.ShapeDtypeStruct((n, h2, w2, cout), idt),
                   jax.ShapeDtypeStruct((n, nt, 1, cout), f32),
                   jax.ShapeDtypeStruct((n, nt, 1, cout), f32)),
        compiler_params=cparams,
    )(x_w, x_w, x_w, s_nhwc, s_nhwc, s_nhwc, *a_params)

    count = float(n * h2 * w2)
    a1, o1 = _bn_affine(ssum1, ssq1, p["g1"], p["be1"], count)

    # ---- kernel B: BN1+ReLU fused + DWSWConv2 (pre-BN) + BN2 partial stats -----
    b_params = (a1, o1, p["w2v"], p["b2v"], p["w2h"], p["b2h"], p["p2"], p["pb2"])
    u2, ssum2, ssq2 = pl.pallas_call(
        _conv2_kernel,
        grid=grid,
        in_specs=([
            pl.BlockSpec((1, tr, w2, cout), lambda b, i: (b, i, 0, 0)),
            pl.BlockSpec((1, 1, w2, cout),
                         lambda b, i: (b, jnp.maximum(i * tr - 1, 0), 0, 0)),
            pl.BlockSpec((1, 1, w2, cout),
                         lambda b, i: (b, jnp.minimum((i + 1) * tr, h2 - 1), 0, 0)),
        ] + [param_spec(a) for a in b_params]),
        out_specs=(pl.BlockSpec((1, tr, w2, cout), lambda b, i: (b, i, 0, 0)),
                   stat_spec(), stat_spec()),
        out_shape=(jax.ShapeDtypeStruct((n, h2, w2, cout), idt),
                   jax.ShapeDtypeStruct((n, nt, 1, cout), f32),
                   jax.ShapeDtypeStruct((n, nt, 1, cout), f32)),
        compiler_params=cparams,
    )(u1, u1, u1, *b_params)

    a2, o2 = _bn_affine(ssum2, ssq2, p["g2"], p["be2"], count)

    # ---- epilogue: BN2 + ReLU as plain jnp so XLA fuses it with the NHWC->NCHW
    # transpose (single read of u2 + single write of the NCHW output).
    out_nhwc = jnp.maximum(u2.astype(f32) * a2[:, None, None, :]
                           + o2[:, None, None, :], 0.0)
    return jnp.transpose(out_nhwc, (0, 3, 1, 2))


# --------------------------------------------------------------------------
# pure-JAX reference (independent check)
# --------------------------------------------------------------------------
def _ref_dwsw(x_nchw, wv, bv, wh, bh, pw, pb, gamma, beta):
    c = x_nchw.shape[1]
    c_out = pw.shape[1]
    wv_k = jnp.transpose(wv)[:, None, :, None]          # (C, 1, 3, 1)
    wh_k = jnp.transpose(wh)[:, None, None, :]          # (C, 1, 1, 3)
    dn = ("NCHW", "OIHW", "NCHW")
    y = jax.lax.conv_general_dilated(x_nchw, wv_k, (1, 1), ((1, 1), (0, 0)),
                                     dimension_numbers=dn, feature_group_count=c)
    y = y + bv.reshape(1, c, 1, 1)
    z = jax.lax.conv_general_dilated(y, wh_k, (1, 1), ((0, 0), (1, 1)),
                                     dimension_numbers=dn, feature_group_count=c)
    z = z + bh.reshape(1, c, 1, 1)
    pw_k = jnp.transpose(pw)[:, :, None, None]           # (Cout, C, 1, 1)
    u = jax.lax.conv_general_dilated(z, pw_k, (1, 1), ((0, 0), (0, 0)),
                                     dimension_numbers=dn)
    u = u + pb.reshape(1, c_out, 1, 1)
    mu = jnp.mean(u, axis=(0, 2, 3), keepdims=True)
    var = jnp.mean((u - mu) ** 2, axis=(0, 2, 3), keepdims=True)
    un = (u - mu) * jax.lax.rsqrt(var + BN_EPS)
    return jnp.maximum(un * gamma.reshape(1, c_out, 1, 1)
                       + beta.reshape(1, c_out, 1, 1), 0.0)


if __name__ == "__main__":
    # small shapes consistent with the module
    N, Cin, Cskip, Cout, H, W = 2, 4, 4, 8, 8, 8
    C1 = Cin + Cskip

    key = jax.random.PRNGKey(0)
    keys = jax.random.split(key, 20)

    x = jax.random.normal(keys[0], (N, Cin, H, W), jnp.float32)
    skip = jax.random.normal(keys[1], (N, Cskip, 2 * H, 2 * W), jnp.float32)

    def nrm(k, shape, scale):
        return scale * jax.random.normal(k, shape, jnp.float32)

    # deterministic synthetic parameters (module-defined shapes, channel-last)
    params = {
        # conv1: DWSWConv(C1 -> Cout)
        "w1v": nrm(keys[2], (3, C1), 0.5),  "b1v": nrm(keys[3], (1, C1), 0.1),
        "w1h": nrm(keys[4], (3, C1), 0.5),  "b1h": nrm(keys[5], (1, C1), 0.1),
        "p1":  nrm(keys[6], (C1, Cout), 0.5), "pb1": nrm(keys[7], (1, Cout), 0.1),
        "g1":  1.0 + nrm(keys[8], (1, Cout), 0.1), "be1": nrm(keys[9], (1, Cout), 0.1),
        # conv2: DWSWConv(Cout -> Cout)
        "w2v": nrm(keys[10], (3, Cout), 0.5), "b2v": nrm(keys[11], (1, Cout), 0.1),
        "w2h": nrm(keys[12], (3, Cout), 0.5), "b2h": nrm(keys[13], (1, Cout), 0.1),
        "p2":  nrm(keys[14], (Cout, Cout), 0.5), "pb2": nrm(keys[15], (1, Cout), 0.1),
        "g2":  1.0 + nrm(keys[16], (1, Cout), 0.1), "be2": nrm(keys[17], (1, Cout), 0.1),
    }

    # independent pure-JAX reference (training-mode BatchNorm, like the kernel)
    x_up = jnp.repeat(jnp.repeat(x, 2, axis=2), 2, axis=3)
    x_cat = jnp.concatenate([x_up, skip], axis=1)
    ref = _ref_dwsw(x_cat, params["w1v"], params["b1v"], params["w1h"], params["b1h"],
                    params["p1"], params["pb1"], params["g1"], params["be1"])
    ref = _ref_dwsw(ref, params["w2v"], params["b2v"], params["w2h"], params["b2h"],
                    params["p2"], params["pb2"], params["g2"], params["be2"])
    ref = np.asarray(ref)

    # 1) exactness path: f32 intermediates, forced multi-row-tile grid so the
    #    halo / edge-mask logic is exercised -- tight tolerance.
    out_f32 = jax.block_until_ready(
        light_decoder_block(x, skip, params, max_tile_rows=8,
                            interm_dtype="float32"))
    assert out_f32.shape == (N, Cout, 2 * H, 2 * W)
    np.testing.assert_allclose(np.asarray(out_f32), ref, rtol=5e-4, atol=5e-4)

    # 2) default fast path: bf16 intermediates (halved HBM traffic for u1/u2);
    #    tolerance reflects bf16 storage amplified through the two BatchNorms.
    out = jax.block_until_ready(light_decoder_block(x, skip, params))
    assert out.shape == (N, Cout, 2 * H, 2 * W)
    np.testing.assert_allclose(np.asarray(out), ref, rtol=5e-2, atol=5e-2)

    print("KERNEL_OK")
</pallas_src>

<mosaic_0001>
module attributes {stable_mosaic.version = 11 : i64} {
  func.func @_conv1_kernel(%arg0: i32, %arg1: i32, %arg2: memref<1x4x16x4xf32, #tpu.memory_space<vmem>>, %arg3: memref<1x1x16x4xf32, #tpu.memory_space<vmem>>, %arg4: memref<1x1x16x4xf32, #tpu.memory_space<vmem>>, %arg5: memref<1x8x16x4xf32, #tpu.memory_space<vmem>>, %arg6: memref<1x1x16x4xf32, #tpu.memory_space<vmem>>, %arg7: memref<1x1x16x4xf32, #tpu.memory_space<vmem>>, %arg8: memref<3x4xf32, #tpu.memory_space<vmem>>, %arg9: memref<1x4xf32, #tpu.memory_space<vmem>>, %arg10: memref<3x4xf32, #tpu.memory_space<vmem>>, %arg11: memref<1x4xf32, #tpu.memory_space<vmem>>, %arg12: memref<3x4xf32, #tpu.memory_space<vmem>>, %arg13: memref<1x4xf32, #tpu.memory_space<vmem>>, %arg14: memref<3x4xf32, #tpu.memory_space<vmem>>, %arg15: memref<1x4xf32, #tpu.memory_space<vmem>>, %arg16: memref<8x8xf32, #tpu.memory_space<vmem>>, %arg17: memref<1x8xf32, #tpu.memory_space<vmem>>, %arg18: memref<1x8x16x8xf32, #tpu.memory_space<vmem>>, %arg19: memref<1x1x1x8xf32, #tpu.memory_space<vmem>>, %arg20: memref<1x1x1x8xf32, #tpu.memory_space<vmem>>) attributes {dimension_semantics = [#tpu.dimension_semantics<parallel>, #tpu.dimension_semantics<parallel>], iteration_bounds = array<i64: 2, 2>, scalar_prefetch = 0 : i64, scratch_operands = 0 : i64, tpu.core_type = #tpu.core_type<tc>, window_params = [{transform_indices = @transform_0, window_bounds = array<i64: 1, 4, 16, 4>}, {transform_indices = @transform_1, window_bounds = array<i64: 1, 1, 16, 4>}, {transform_indices = @transform_2, window_bounds = array<i64: 1, 1, 16, 4>}, {transform_indices = @transform_3, window_bounds = array<i64: 1, 8, 16, 4>}, {transform_indices = @transform_4, window_bounds = array<i64: 1, 1, 16, 4>}, {transform_indices = @transform_5, window_bounds = array<i64: 1, 1, 16, 4>}, {pipeline_mode = #tpu.pipeline_mode<synchronous>, transform_indices = @transform_6, window_bounds = array<i64: 3, 4>}, {pipeline_mode = #tpu.pipeline_mode<synchronous>, transform_indices = @transform_7, window_bounds = array<i64: 1, 4>}, {pipeline_mode = #tpu.pipeline_mode<synchronous>, transform_indices = @transform_8, window_bounds = array<i64: 3, 4>}, {pipeline_mode = #tpu.pipeline_mode<synchronous>, transform_indices = @transform_9, window_bounds = array<i64: 1, 4>}, {pipeline_mode = #tpu.pipeline_mode<synchronous>, transform_indices = @transform_10, window_bounds = array<i64: 3, 4>}, {pipeline_mode = #tpu.pipeline_mode<synchronous>, transform_indices = @transform_11, window_bounds = array<i64: 1, 4>}, {pipeline_mode = #tpu.pipeline_mode<synchronous>, transform_indices = @transform_12, window_bounds = array<i64: 3, 4>}, {pipeline_mode = #tpu.pipeline_mode<synchronous>, transform_indices = @transform_13, window_bounds = array<i64: 1, 4>}, {pipeline_mode = #tpu.pipeline_mode<synchronous>, transform_indices = @transform_14, window_bounds = array<i64: 8, 8>}, {pipeline_mode = #tpu.pipeline_mode<synchronous>, transform_indices = @transform_15, window_bounds = array<i64: 1, 8>}, {transform_indices = @transform_16, window_bounds = array<i64: 1, 8, 16, 8>}, {transform_indices = @transform_17, window_bounds = array<i64: 1, 1, 1, 8>}, {transform_indices = @transform_18, window_bounds = array<i64: 1, 1, 1, 8>}]} {
    %c0_i32 = arith.constant 0 : i32
    %0 = arith.cmpi sgt, %arg1, %c0_i32 : i32
    %cst = arith.constant 1.000000e+00 : f32
    %cst_0 = arith.constant 0.000000e+00 : f32
    %1 = arith.select %0, %cst, %cst_0 : f32
    %c1_i32 = arith.constant 1 : i32
    %2 = arith.cmpi slt, %arg1, %c1_i32 : i32
    %cst_1 = arith.constant 1.000000e+00 : f32
    %cst_2 = arith.constant 0.000000e+00 : f32
    %3 = arith.select %2, %cst_1, %cst_2 : f32
    %c0 = arith.constant 0 : index
    %c0_3 = arith.constant 0 : index
    %c0_4 = arith.constant 0 : index
    %c0_5 = arith.constant 0 : index
    %4 = vector.load %arg2[%c0, %c0_3, %c0_4, %c0_5] : memref<1x4x16x4xf32, #tpu.memory_space<vmem>>, vector<1x4x16x4xf32>
    %5 = vector.shape_cast %4 : vector<1x4x16x4xf32> to vector<4x16x4xf32>
    %6 = vector.shape_cast %5 : vector<4x16x4xf32> to vector<4x1x16x4xf32>
    %7 = vector.shape_cast %6 : vector<4x1x16x4xf32> to vector<4x1x16x4xf32>
    %8 = vector.broadcast %7 : vector<4x1x16x4xf32> to vector<4x2x16x4xf32>
    %9 = vector.shape_cast %8 : vector<4x2x16x4xf32> to vector<8x16x4xf32>
    %10 = tpu.iota {dimensions = array<i32: 0>} : vector<128x1xi32>
    %c15_i32 = arith.constant 15 : i32
    %11 = vector.broadcast %c15_i32 : i32 to vector<128x1xi32>
    %12 = arith.andi %10, %11 : vector<128x1xi32>
    %c0_i32_6 = arith.constant 0 : i32
    %13 = vector.broadcast %c0_i32_6 : i32 to vector<128x1xi32>
    %14 = arith.cmpi sgt, %12, %13 : vector<128x1xi32>
    %15 = arith.extui %14 : vector<128x1xi1> to vector<128x1xi32>
    %16 = arith.sitofp %15 : vector<128x1xi32> to vector<128x1xf32>
    %c15_i32_7 = arith.constant 15 : i32
    %17 = vector.broadcast %c15_i32_7 : i32 to vector<128x1xi32>
    %18 = arith.cmpi slt, %12, %17 : vector<128x1xi32>
    %19 = arith.extui %18 : vector<128x1xi1> to vector<128x1xi32>
    %20 = arith.sitofp %19 : vector<128x1xi32> to vector<128x1xf32>
    %c0_8 = arith.constant 0 : index
    %c0_9 = arith.constant 0 : index
    %c0_10 = arith.constant 0 : index
    %c0_11 = arith.constant 0 : index
    %21 = vector.load %arg3[%c0_8, %c0_9, %c0_10, %c0_11] : memref<1x1x16x4xf32, #tpu.memory_space<vmem>>, vector<1x1x16x4xf32>
    %22 = vector.shape_cast %21 : vector<1x1x16x4xf32> to vector<1x16x4xf32>
    %23 = vector.broadcast %1 : f32 to vector<1x16x4xf32>
    %24 = arith.mulf %22, %23 : vector<1x16x4xf32>
    %c0_12 = arith.constant 0 : index
    %c0_13 = arith.constant 0 : index
    %c0_14 = arith.constant 0 : index
    %c0_15 = arith.constant 0 : index
    %25 = vector.load %arg4[%c0_12, %c0_13, %c0_14, %c0_15] : memref<1x1x16x4xf32, #tpu.memory_space<vmem>>, vector<1x1x16x4xf32>
    %26 = vector.shape_cast %25 : vector<1x1x16x4xf32> to vector<1x16x4xf32>
    %27 = vector.broadcast %3 : f32 to vector<1x16x4xf32>
    %28 = arith.mulf %26, %27 : vector<1x16x4xf32>
    %c0_16 = arith.constant 0 : index
    %c0_17 = arith.constant 0 : index
    %29 = vector.load %arg8[%c0_16, %c0_17] : memref<3x4xf32, #tpu.memory_space<vmem>>, vector<3x4xf32>
    %c0_18 = arith.constant 0 : index
    %c0_19 = arith.constant 0 : index
    %30 = vector.load %arg9[%c0_18, %c0_19] : memref<1x4xf32, #tpu.memory_space<vmem>>, vector<1x4xf32>
    %c0_20 = arith.constant 0 : index
    %c0_21 = arith.constant 0 : index
    %31 = vector.load %arg10[%c0_20, %c0_21] : memref<3x4xf32, #tpu.memory_space<vmem>>, vector<3x4xf32>
    %c0_22 = arith.constant 0 : index
    %c0_23 = arith.constant 0 : index
    %32 = vector.load %arg11[%c0_22, %c0_23] : memref<1x4xf32, #tpu.memory_space<vmem>>, vector<1x4xf32>
    %33 = vector.shape_cast %9 : vector<8x16x4xf32> to vector<128x4xf32>
    %34 = vector.shape_cast %24 : vector<1x16x4xf32> to vector<16x4xf32>
    %35 = vector.shape_cast %28 : vector<1x16x4xf32> to vector<16x4xf32>
    %36 = vector.extract_strided_slice %29 {offsets = [0, 0], sizes = [1, 4], strides = [1, 1]} : vector<3x4xf32> to vector<1x4xf32>
    %37 = vector.extract_strided_slice %29 {offsets = [1, 0], sizes = [1, 4], strides = [1, 1]} : vector<3x4xf32> to vector<1x4xf32>
    %38 = vector.extract_strided_slice %29 {offsets = [2, 0], sizes = [1, 4], strides = [1, 1]} : vector<3x4xf32> to vector<1x4xf32>
    %39 = vector.broadcast %36 : vector<1x4xf32> to vector<16x4xf32>
    %40 = arith.mulf %34, %39 : vector<16x4xf32>
    %41 = vector.extract_strided_slice %33 {offsets = [0, 0], sizes = [16, 4], strides = [1, 1]} : vector<128x4xf32> to vector<16x4xf32>
    %42 = vector.broadcast %37 : vector<1x4xf32> to vector<16x4xf32>
    %43 = arith.mulf %41, %42 : vector<16x4xf32>
    %44 = arith.addf %40, %43 : vector<16x4xf32>
    %45 = vector.extract_strided_slice %33 {offsets = [16, 0], sizes = [16, 4], strides = [1, 1]} : vector<128x4xf32> to vector<16x4xf32>
    %46 = vector.broadcast %38 : vector<1x4xf32> to vector<16x4xf32>
    %47 = arith.mulf %45, %46 : vector<16x4xf32>
    %48 = arith.addf %44, %47 : vector<16x4xf32>
    %49 = vector.extract_strided_slice %33 {offsets = [96, 0], sizes = [16, 4], strides = [1, 1]} : vector<128x4xf32> to vector<16x4xf32>
    %50 = vector.broadcast %36 : vector<1x4xf32> to vector<16x4xf32>
    %51 = arith.mulf %49, %50 : vector<16x4xf32>
    %52 = vector.extract_strided_slice %33 {offsets = [112, 0], sizes = [16, 4], strides = [1, 1]} : vector<128x4xf32> to vector<16x4xf32>
    %53 = vector.broadcast %37 : vector<1x4xf32> to vector<16x4xf32>
    %54 = arith.mulf %52, %53 : vector<16x4xf32>
    %55 = arith.addf %51, %54 : vector<16x4xf32>
    %56 = vector.broadcast %38 : vector<1x4xf32> to vector<16x4xf32>
    %57 = arith.mulf %35, %56 : vector<16x4xf32>
    %58 = arith.addf %55, %57 : vector<16x4xf32>
    %59 = vector.extract_strided_slice %33 {offsets = [0, 0], sizes = [96, 4], strides = [1, 1]} : vector<128x4xf32> to vector<96x4xf32>
    %60 = vector.broadcast %36 : vector<1x4xf32> to vector<96x4xf32>
    %61 = arith.mulf %59, %60 : vector<96x4xf32>
    %62 = vector.extract_strided_slice %33 {offsets = [16, 0], sizes = [96, 4], strides = [1, 1]} : vector<128x4xf32> to vector<96x4xf32>
    %63 = vector.broadcast %37 : vector<1x4xf32> to vector<96x4xf32>
    %64 = arith.mulf %62, %63 : vector<96x4xf32>
    %65 = arith.addf %61, %64 : vector<96x4xf32>
    %66 = vector.extract_strided_slice %33 {offsets = [32, 0], sizes = [96, 4], strides = [1, 1]} : vector<128x4xf32> to vector<96x4xf32>
    %67 = vector.broadcast %38 : vector<1x4xf32> to vector<96x4xf32>
    %68 = arith.mulf %66, %67 : vector<96x4xf32>
    %69 = arith.addf %65, %68 : vector<96x4xf32>
    %70 = tpu.concatenate %48, %69, %58 in 0 : vector<16x4xf32>, vector<96x4xf32>, vector<16x4xf32> -> vector<128x4xf32>
    %71 = vector.broadcast %30 : vector<1x4xf32> to vector<128x4xf32>
    %72 = arith.addf %70, %71 : vector<128x4xf32>
    %cst_24 = arith.constant 0.000000e+00 : f32
    %73 = vector.broadcast %cst_24 : f32 to vector<1x4xf32>
    %74 = vector.extract_strided_slice %72 {offsets = [0, 0], sizes = [127, 4], strides = [1, 1]} : vector<128x4xf32> to vector<127x4xf32>
    %75 = tpu.concatenate %73, %74 in 0 : vector<1x4xf32>, vector<127x4xf32> -> vector<128x4xf32>
    %76 = vector.broadcast %16 : vector<128x1xf32> to vector<128x4xf32>
    %77 = arith.mulf %75, %76 : vector<128x4xf32>
    %78 = vector.extract_strided_slice %72 {offsets = [1, 0], sizes = [127, 4], strides = [1, 1]} : vector<128x4xf32> to vector<127x4xf32>
    %79 = tpu.concatenate %78, %73 in 0 : vector<127x4xf32>, vector<1x4xf32> -> vector<128x4xf32>
    %80 = vector.broadcast %20 : vector<128x1xf32> to vector<128x4xf32>
    %81 = arith.mulf %79, %80 : vector<128x4xf32>
    %82 = vector.extract_strided_slice %31 {offsets = [0, 0], sizes = [1, 4], strides = [1, 1]} : vector<3x4xf32> to vector<1x4xf32>
    %83 = vector.broadcast %82 : vector<1x4xf32> to vector<128x4xf32>
    %84 = arith.mulf %77, %83 : vector<128x4xf32>
    %85 = vector.extract_strided_slice %31 {offsets = [1, 0], sizes = [1, 4], strides = [1, 1]} : vector<3x4xf32> to vector<1x4xf32>
    %86 = vector.broadcast %85 : vector<1x4xf32> to vector<128x4xf32>
    %87 = arith.mulf %72, %86 : vector<128x4xf32>
    %88 = arith.addf %84, %87 : vector<128x4xf32>
    %89 = vector.extract_strided_slice %31 {offsets = [2, 0], sizes = [1, 4], strides = [1, 1]} : vector<3x4xf32> to vector<1x4xf32>
    %90 = vector.broadcast %89 : vector<1x4xf32> to vector<128x4xf32>
    %91 = arith.mulf %81, %90 : vector<128x4xf32>
    %92 = arith.addf %88, %91 : vector<128x4xf32>
    %93 = vector.broadcast %32 : vector<1x4xf32> to vector<128x4xf32>
    %94 = arith.addf %92, %93 : vector<128x4xf32>
    %c0_25 = arith.constant 0 : index
    %c0_26 = arith.constant 0 : index
    %c0_27 = arith.constant 0 : index
    %c0_28 = arith.constant 0 : index
    %95 = vector.load %arg6[%c0_25, %c0_26, %c0_27, %c0_28] : memref<1x1x16x4xf32, #tpu.memory_space<vmem>>, vector<1x1x16x4xf32>
    %96 = vector.shape_cast %95 : vector<1x1x16x4xf32> to vector<1x16x4xf32>
    %97 = vector.broadcast %1 : f32 to vector<1x16x4xf32>
    %98 = arith.mulf %96, %97 : vector<1x16x4xf32>
    %c0_29 = arith.constant 0 : index
    %c0_30 = arith.constant 0 : index
    %c0_31 = arith.constant 0 : index
    %c0_32 = arith.constant 0 : index
    %99 = vector.load %arg5[%c0_29, %c0_30, %c0_31, %c0_32] : memref<1x8x16x4xf32, #tpu.memory_space<vmem>>, vector<1x8x16x4xf32>
    %100 = vector.shape_cast %99 : vector<1x8x16x4xf32> to vector<8x16x4xf32>
    %c0_33 = arith.constant 0 : index
    %c0_34 = arith.constant 0 : index
    %c0_35 = arith.constant 0 : index
    %c0_36 = arith.constant 0 : index
    %101 = vector.load %arg7[%c0_33, %c0_34, %c0_35, %c0_36] : memref<1x1x16x4xf32, #tpu.memory_space<vmem>>, vector<1x1x16x4xf32>
    %102 = vector.shape_cast %101 : vector<1x1x16x4xf32> to vector<1x16x4xf32>
    %103 = vector.broadcast %3 : f32 to vector<1x16x4xf32>
    %104 = arith.mulf %102, %103 : vector<1x16x4xf32>
    %c0_37 = arith.constant 0 : index
    %c0_38 = arith.constant 0 : index
    %105 = vector.load %arg12[%c0_37, %c0_38] : memref<3x4xf32, #tpu.memory_space<vmem>>, vector<3x4xf32>
    %c0_39 = arith.constant 0 : index
    %c0_40 = arith.constant 0 : index
    %106 = vector.load %arg13[%c0_39, %c0_40] : memref<1x4xf32, #tpu.memory_space<vmem>>, vector<1x4xf32>
    %c0_41 = arith.constant 0 : index
    %c0_42 = arith.constant 0 : index
    %107 = vector.load %arg14[%c0_41, %c0_42] : memref<3x4xf32, #tpu.memory_space<vmem>>, vector<3x4xf32>
    %c0_43 = arith.constant 0 : index
    %c0_44 = arith.constant 0 : index
    %108 = vector.load %arg15[%c0_43, %c0_44] : memref<1x4xf32, #tpu.memory_space<vmem>>, vector<1x4xf32>
    %109 = vector.shape_cast %100 : vector<8x16x4xf32> to vector<128x4xf32>
    %110 = vector.shape_cast %98 : vector<1x16x4xf32> to vector<16x4xf32>
    %111 = vector.shape_cast %104 : vector<1x16x4xf32> to vector<16x4xf32>
    %112 = vector.extract_strided_slice %105 {offsets = [0, 0], sizes = [1, 4], strides = [1, 1]} : vector<3x4xf32> to vector<1x4xf32>
    %113 = vector.extract_strided_slice %105 {offsets = [1, 0], sizes = [1, 4], strides = [1, 1]} : vector<3x4xf32> to vector<1x4xf32>
    %114 = vector.extract_strided_slice %105 {offsets = [2, 0], sizes = [1, 4], strides = [1, 1]} : vector<3x4xf32> to vector<1x4xf32>
    %115 = vector.broadcast %112 : vector<1x4xf32> to vector<16x4xf32>
    %116 = arith.mulf %110, %115 : vector<16x4xf32>
    %117 = vector.extract_strided_slice %109 {offsets = [0, 0], sizes = [16, 4], strides = [1, 1]} : vector<128x4xf32> to vector<16x4xf32>
    %118 = vector.broadcast %113 : vector<1x4xf32> to vector<16x4xf32>
    %119 = arith.mulf %117, %118 : vector<16x4xf32>
    %120 = arith.addf %116, %119 : vector<16x4xf32>
    %121 = vector.extract_strided_slice %109 {offsets = [16, 0], sizes = [16, 4], strides = [1, 1]} : vector<128x4xf32> to vector<16x4xf32>
    %122 = vector.broadcast %114 : vector<1x4xf32> to vector<16x4xf32>
    %123 = arith.mulf %121, %122 : vector<16x4xf32>
    %124 = arith.addf %120, %123 : vector<16x4xf32>
    %125 = vector.extract_strided_slice %109 {offsets = [96, 0], sizes = [16, 4], strides = [1, 1]} : vector<128x4xf32> to vector<16x4xf32>
    %126 = vector.broadcast %112 : vector<1x4xf32> to vector<16x4xf32>
    %127 = arith.mulf %125, %126 : vector<16x4xf32>
    %128 = vector.extract_strided_slice %109 {offsets = [112, 0], sizes = [16, 4], strides = [1, 1]} : vector<128x4xf32> to vector<16x4xf32>
    %129 = vector.broadcast %113 : vector<1x4xf32> to vector<16x4xf32>
    %130 = arith.mulf %128, %129 : vector<16x4xf32>
    %131 = arith.addf %127, %130 : vector<16x4xf32>
    %132 = vector.broadcast %114 : vector<1x4xf32> to vector<16x4xf32>
    %133 = arith.mulf %111, %132 : vector<16x4xf32>
    %134 = arith.addf %131, %133 : vector<16x4xf32>
    %135 = vector.extract_strided_slice %109 {offsets = [0, 0], sizes = [96, 4], strides = [1, 1]} : vector<128x4xf32> to vector<96x4xf32>
    %136 = vector.broadcast %112 : vector<1x4xf32> to vector<96x4xf32>
    %137 = arith.mulf %135, %136 : vector<96x4xf32>
    %138 = vector.extract_strided_slice %109 {offsets = [16, 0], sizes = [96, 4], strides = [1, 1]} : vector<128x4xf32> to vector<96x4xf32>
    %139 = vector.broadcast %113 : vector<1x4xf32> to vector<96x4xf32>
    %140 = arith.mulf %138, %139 : vector<96x4xf32>
    %141 = arith.addf %137, %140 : vector<96x4xf32>
    %142 = vector.extract_strided_slice %109 {offsets = [32, 0], sizes = [96, 4], strides = [1, 1]} : vector<128x4xf32> to vector<96x4xf32>
    %143 = vector.broadcast %114 : vector<1x4xf32> to vector<96x4xf32>
    %144 = arith.mulf %142, %143 : vector<96x4xf32>
    %145 = arith.addf %141, %144 : vector<96x4xf32>
    %146 = tpu.concatenate %124, %145, %134 in 0 : vector<16x4xf32>, vector<96x4xf32>, vector<16x4xf32> -> vector<128x4xf32>
    %147 = vector.broadcast %106 : vector<1x4xf32> to vector<128x4xf32>
    %148 = arith.addf %146, %147 : vector<128x4xf32>
    %cst_45 = arith.constant 0.000000e+00 : f32
    %149 = vector.broadcast %cst_45 : f32 to vector<1x4xf32>
    %150 = vector.extract_strided_slice %148 {offsets = [0, 0], sizes = [127, 4], strides = [1, 1]} : vector<128x4xf32> to vector<127x4xf32>
    %151 = tpu.concatenate %149, %150 in 0 : vector<1x4xf32>, vector<127x4xf32> -> vector<128x4xf32>
    %152 = vector.broadcast %16 : vector<128x1xf32> to vector<128x4xf32>
    %153 = arith.mulf %151, %152 : vector<128x4xf32>
    %154 = vector.extract_strided_slice %148 {offsets = [1, 0], sizes = [127, 4], strides = [1, 1]} : vector<128x4xf32> to vector<127x4xf32>
    %155 = tpu.concatenate %154, %149 in 0 : vector<127x4xf32>, vector<1x4xf32> -> vector<128x4xf32>
    %156 = vector.broadcast %20 : vector<128x1xf32> to vector<128x4xf32>
    %157 = arith.mulf %155, %156 : vector<128x4xf32>
    %158 = vector.extract_strided_slice %107 {offsets = [0, 0], sizes = [1, 4], strides = [1, 1]} : vector<3x4xf32> to vector<1x4xf32>
    %159 = vector.broadcast %158 : vector<1x4xf32> to vector<128x4xf32>
    %160 = arith.mulf %153, %159 : vector<128x4xf32>
    %161 = vector.extract_strided_slice %107 {offsets = [1, 0], sizes = [1, 4], strides = [1, 1]} : vector<3x4xf32> to vector<1x4xf32>
    %162 = vector.broadcast %161 : vector<1x4xf32> to vector<128x4xf32>
    %163 = arith.mulf %148, %162 : vector<128x4xf32>
    %164 = arith.addf %160, %163 : vector<128x4xf32>
    %165 = vector.extract_strided_slice %107 {offsets = [2, 0], sizes = [1, 4], strides = [1, 1]} : vector<3x4xf32> to vector<1x4xf32>
    %166 = vector.broadcast %165 : vector<1x4xf32> to vector<128x4xf32>
    %167 = arith.mulf %157, %166 : vector<128x4xf32>
    %168 = arith.addf %164, %167 : vector<128x4xf32>
    %169 = vector.broadcast %108 : vector<1x4xf32> to vector<128x4xf32>
    %170 = arith.addf %168, %169 : vector<128x4xf32>
    %171 = tpu.concatenate %94, %170 in 1 : vector<128x4xf32>, vector<128x4xf32> -> vector<128x8xf32>
    %c0_46 = arith.constant 0 : index
    %c0_47 = arith.constant 0 : index
    %172 = vector.load %arg16[%c0_46, %c0_47] : memref<8x8xf32, #tpu.memory_space<vmem>>, vector<8x8xf32>
    %cst_48 = arith.constant dense<0.000000e+00> : vector<128x8xf32>
    %173 = tpu.matmul %171, %172, %cst_48 {dimension_numbers = #tpu.dot_dimension_numbers<[1], [0], [0], [1], [0, 0, 1, 1], [], []>} : vector<128x8xf32>, vector<8x8xf32>, vector<128x8xf32> -> vector<128x8xf32>
    %c0_49 = arith.constant 0 : index
    %c0_50 = arith.constant 0 : index
    %174 = vector.load %arg17[%c0_49, %c0_50] : memref<1x8xf32, #tpu.memory_space<vmem>>, vector<1x8xf32>
    %175 = vector.broadcast %174 : vector<1x8xf32> to vector<128x8xf32>
    %176 = arith.addf %173, %175 : vector<128x8xf32>
    %177 = vector.shape_cast %176 : vector<128x8xf32> to vector<8x16x8xf32>
    %c0_51 = arith.constant 0 : index
    %c0_52 = arith.constant 0 : index
    %c0_53 = arith.constant 0 : index
    %c0_54 = arith.constant 0 : index
    %178 = vector.load %arg18[%c0_51, %c0_52, %c0_53, %c0_54] : memref<1x8x16x8xf32, #tpu.memory_space<vmem>>, vector<1x8x16x8xf32>
    %179 = vector.shape_cast %178 : vector<1x8x16x8xf32> to vector<8x16x8xf32>
    %180 = vector.shape_cast %177 : vector<8x16x8xf32> to vector<1x8x16x8xf32>
    tpu.vector_store %arg18[%c0_51, %c0_52, %c0_53, %c0_54], %180 {strides = array<i32>} : memref<1x8x16x8xf32, #tpu.memory_space<vmem>>, vector<1x8x16x8xf32>,
    %cst_55 = arith.constant dense<0.000000e+00> : vector<8xf32>
    %181 = vector.multi_reduction <add>, %176, %cst_55 [0] : vector<128x8xf32> to vector<8xf32>
    %182 = vector.shape_cast %181 : vector<8xf32> to vector<1x1x1x8xf32>
    %c0_56 = arith.constant 0 : index
    %c0_57 = arith.constant 0 : index
    %c0_58 = arith.constant 0 : index
    %c0_59 = arith.constant 0 : index
    %183 = vector.load %arg19[%c0_56, %c0_57, %c0_58, %c0_59] : memref<1x1x1x8xf32, #tpu.memory_space<vmem>>, vector<1x1x1x8xf32>
    tpu.vector_store %arg19[%c0_56, %c0_57, %c0_58, %c0_59], %182 {strides = array<i32>} : memref<1x1x1x8xf32, #tpu.memory_space<vmem>>, vector<1x1x1x8xf32>,
    %184 = arith.mulf %176, %176 : vector<128x8xf32>
    %cst_60 = arith.constant dense<0.000000e+00> : vector<8xf32>
    %185 = vector.multi_reduction <add>, %184, %cst_60 [0] : vector<128x8xf32> to vector<8xf32>
    %186 = vector.shape_cast %185 : vector<8xf32> to vector<1x1x1x8xf32>
    %c0_61 = arith.constant 0 : index
    %c0_62 = arith.constant 0 : index
    %c0_63 = arith.constant 0 : index
    %c0_64 = arith.constant 0 : index
    %187 = vector.load %arg20[%c0_61, %c0_62, %c0_63, %c0_64] : memref<1x1x1x8xf32, #tpu.memory_space<vmem>>, vector<1x1x1x8xf32>
    tpu.vector_store %arg20[%c0_61, %c0_62, %c0_63, %c0_64], %186 {strides = array<i32>} : memref<1x1x1x8xf32, #tpu.memory_space<vmem>>, vector<1x1x1x8xf32>,
    return
  }
  func.func @transform_0(%arg0: i32, %arg1: i32) -> (i32, i32, i32, i32) {
    %c0_i32 = arith.constant 0 : i32
    %c0_i32_0 = arith.constant 0 : i32
    %c0_i32_1 = arith.constant 0 : i32
    return %arg0, %arg1, %c0_i32, %c0_i32_0 : i32, i32, i32, i32
  }
  func.func @transform_1(%arg0: i32, %arg1: i32) -> (i32, i32, i32, i32) {
    %c4_i32 = arith.constant 4 : i32
    %0 = arith.muli %arg1, %c4_i32 : i32
    %c1_i32 = arith.constant 1 : i32
    %1 = arith.subi %0, %c1_i32 : i32
    %c0_i32 = arith.constant 0 : i32
    %2 = arith.maxsi %1, %c0_i32 : i32
    %c0_i32_0 = arith.constant 0 : i32
    %c0_i32_1 = arith.constant 0 : i32
    %c0_i32_2 = arith.constant 0 : i32
    return %arg0, %2, %c0_i32_0, %c0_i32_1 : i32, i32, i32, i32
  }
  func.func @transform_2(%arg0: i32, %arg1: i32) -> (i32, i32, i32, i32) {
    %c1_i32 = arith.constant 1 : i32
    %0 = arith.addi %arg1, %c1_i32 : i32
    %c4_i32 = arith.constant 4 : i32
    %1 = arith.muli %0, %c4_i32 : i32
    %c7_i32 = arith.constant 7 : i32
    %2 = arith.minsi %1, %c7_i32 : i32
    %c0_i32 = arith.constant 0 : i32
    %c0_i32_0 = arith.constant 0 : i32
    %c0_i32_1 = arith.constant 0 : i32
    return %arg0, %2, %c0_i32, %c0_i32_0 : i32, i32, i32, i32
  }
  func.func @transform_3(%arg0: i32, %arg1: i32) -> (i32, i32, i32, i32) {
    %c0_i32 = arith.constant 0 : i32
    %c0_i32_0 = arith.constant 0 : i32
    %c0_i32_1 = arith.constant 0 : i32
    return %arg0, %arg1, %c0_i32, %c0_i32_0 : i32, i32, i32, i32
  }
  func.func @transform_4(%arg0: i32, %arg1: i32) -> (i32, i32, i32, i32) {
    %c8_i32 = arith.constant 8 : i32
    %0 = arith.muli %arg1, %c8_i32 : i32
    %c1_i32 = arith.constant 1 : i32
    %1 = arith.subi %0, %c1_i32 : i32
    %c0_i32 = arith.constant 0 : i32
    %2 = arith.maxsi %1, %c0_i32 : i32
    %c0_i32_0 = arith.constant 0 : i32
    %c0_i32_1 = arith.constant 0 : i32
    %c0_i32_2 = arith.constant 0 : i32
    return %arg0, %2, %c0_i32_0, %c0_i32_1 : i32, i32, i32, i32
  }
  func.func @transform_5(%arg0: i32, %arg1: i32) -> (i32, i32, i32, i32) {
    %c1_i32 = arith.constant 1 : i32
    %0 = arith.addi %arg1, %c1_i32 : i32
    %c8_i32 = arith.constant 8 : i32
    %1 = arith.muli %0, %c8_i32 : i32
    %c15_i32 = arith.constant 15 : i32
    %2 = arith.minsi %1, %c15_i32 : i32
    %c0_i32 = arith.constant 0 : i32
    %c0_i32_0 = arith.constant 0 : i32
    %c0_i32_1 = arith.constant 0 : i32
    return %arg0, %2, %c0_i32, %c0_i32_0 : i32, i32, i32, i32
  }
  func.func @transform_6(%arg0: i32, %arg1: i32) -> (i32, i32) {
    %c0_i32 = arith.constant 0 : i32
    %c0_i32_0 = arith.constant 0 : i32
    %c0_i32_1 = arith.constant 0 : i32
    return %c0_i32, %c0_i32_0 : i32, i32
  }
  func.func @transform_7(%arg0: i32, %arg1: i32) -> (i32, i32) {
    %c0_i32 = arith.constant 0 : i32
    %c0_i32_0 = arith.constant 0 : i32
    %c0_i32_1 = arith.constant 0 : i32
    return %c0_i32, %c0_i32_0 : i32, i32
  }
  func.func @transform_8(%arg0: i32, %arg1: i32) -> (i32, i32) {
    %c0_i32 = arith.constant 0 : i32
    %c0_i32_0 = arith.constant 0 : i32
    %c0_i32_1 = arith.constant 0 : i32
    return %c0_i32, %c0_i32_0 : i32, i32
  }
  func.func @transform_9(%arg0: i32, %arg1: i32) -> (i32, i32) {
    %c0_i32 = arith.constant 0 : i32
    %c0_i32_0 = arith.constant 0 : i32
    %c0_i32_1 = arith.constant 0 : i32
    return %c0_i32, %c0_i32_0 : i32, i32
  }
  func.func @transform_10(%arg0: i32, %arg1: i32) -> (i32, i32) {
    %c0_i32 = arith.constant 0 : i32
    %c0_i32_0 = arith.constant 0 : i32
    %c0_i32_1 = arith.constant 0 : i32
    return %c0_i32, %c0_i32_0 : i32, i32
  }
  func.func @transform_11(%arg0: i32, %arg1: i32) -> (i32, i32) {
    %c0_i32 = arith.constant 0 : i32
    %c0_i32_0 = arith.constant 0 : i32
    %c0_i32_1 = arith.constant 0 : i32
    return %c0_i32, %c0_i32_0 : i32, i32
  }
  func.func @transform_12(%arg0: i32, %arg1: i32) -> (i32, i32) {
    %c0_i32 = arith.constant 0 : i32
    %c0_i32_0 = arith.constant 0 : i32
    %c0_i32_1 = arith.constant 0 : i32
    return %c0_i32, %c0_i32_0 : i32, i32
  }
  func.func @transform_13(%arg0: i32, %arg1: i32) -> (i32, i32) {
    %c0_i32 = arith.constant 0 : i32
    %c0_i32_0 = arith.constant 0 : i32
    %c0_i32_1 = arith.constant 0 : i32
    return %c0_i32, %c0_i32_0 : i32, i32
  }
  func.func @transform_14(%arg0: i32, %arg1: i32) -> (i32, i32) {
    %c0_i32 = arith.constant 0 : i32
    %c0_i32_0 = arith.constant 0 : i32
    %c0_i32_1 = arith.constant 0 : i32
    return %c0_i32, %c0_i32_0 : i32, i32
  }
  func.func @transform_15(%arg0: i32, %arg1: i32) -> (i32, i32) {
    %c0_i32 = arith.constant 0 : i32
    %c0_i32_0 = arith.constant 0 : i32
    %c0_i32_1 = arith.constant 0 : i32
    return %c0_i32, %c0_i32_0 : i32, i32
  }
  func.func @transform_16(%arg0: i32, %arg1: i32) -> (i32, i32, i32, i32) {
    %c0_i32 = arith.constant 0 : i32
    %c0_i32_0 = arith.constant 0 : i32
    %c0_i32_1 = arith.constant 0 : i32
    return %arg0, %arg1, %c0_i32, %c0_i32_0 : i32, i32, i32, i32
  }
  func.func @transform_17(%arg0: i32, %arg1: i32) -> (i32, i32, i32, i32) {
    %c0_i32 = arith.constant 0 : i32
    %c0_i32_0 = arith.constant 0 : i32
    %c0_i32_1 = arith.constant 0 : i32
    return %arg0, %arg1, %c0_i32, %c0_i32_0 : i32, i32, i32, i32
  }
  func.func @transform_18(%arg0: i32, %arg1: i32) -> (i32, i32, i32, i32) {
    %c0_i32 = arith.constant 0 : i32
    %c0_i32_0 = arith.constant 0 : i32
    %c0_i32_1 = arith.constant 0 : i32
    return %arg0, %arg1, %c0_i32, %c0_i32_0 : i32, i32, i32, i32
  }
}

module attributes {stable_mosaic.version = 11 : i64} {
  func.func @_conv2_kernel(%arg0: i32, %arg1: i32, %arg2: memref<1x8x16x8xf32, #tpu.memory_space<vmem>>, %arg3: memref<1x1x16x8xf32, #tpu.memory_space<vmem>>, %arg4: memref<1x1x16x8xf32, #tpu.memory_space<vmem>>, %arg5: memref<1x8xf32, #tpu.memory_space<vmem>>, %arg6: memref<1x8xf32, #tpu.memory_space<vmem>>, %arg7: memref<3x8xf32, #tpu.memory_space<vmem>>, %arg8: memref<1x8xf32, #tpu.memory_space<vmem>>, %arg9: memref<3x8xf32, #tpu.memory_space<vmem>>, %arg10: memref<1x8xf32, #tpu.memory_space<vmem>>, %arg11: memref<8x8xf32, #tpu.memory_space<vmem>>, %arg12: memref<1x8xf32, #tpu.memory_space<vmem>>, %arg13: memref<1x8x16x8xf32, #tpu.memory_space<vmem>>, %arg14: memref<1x1x1x8xf32, #tpu.memory_space<vmem>>, %arg15: memref<1x1x1x8xf32, #tpu.memory_space<vmem>>) attributes {dimension_semantics = [#tpu.dimension_semantics<parallel>, #tpu.dimension_semantics<parallel>], iteration_bounds = array<i64: 2, 2>, scalar_prefetch = 0 : i64, scratch_operands = 0 : i64, tpu.core_type = #tpu.core_type<tc>, window_params = [{transform_indices = @transform_0, window_bounds = array<i64: 1, 8, 16, 8>}, {transform_indices = @transform_1, window_bounds = array<i64: 1, 1, 16, 8>}, {transform_indices = @transform_2, window_bounds = array<i64: 1, 1, 16, 8>}, {pipeline_mode = #tpu.pipeline_mode<synchronous>, transform_indices = @transform_3, window_bounds = array<i64: 1, 8>}, {pipeline_mode = #tpu.pipeline_mode<synchronous>, transform_indices = @transform_4, window_bounds = array<i64: 1, 8>}, {pipeline_mode = #tpu.pipeline_mode<synchronous>, transform_indices = @transform_5, window_bounds = array<i64: 3, 8>}, {pipeline_mode = #tpu.pipeline_mode<synchronous>, transform_indices = @transform_6, window_bounds = array<i64: 1, 8>}, {pipeline_mode = #tpu.pipeline_mode<synchronous>, transform_indices = @transform_7, window_bounds = array<i64: 3, 8>}, {pipeline_mode = #tpu.pipeline_mode<synchronous>, transform_indices = @transform_8, window_bounds = array<i64: 1, 8>}, {pipeline_mode = #tpu.pipeline_mode<synchronous>, transform_indices = @transform_9, window_bounds = array<i64: 8, 8>}, {pipeline_mode = #tpu.pipeline_mode<synchronous>, transform_indices = @transform_10, window_bounds = array<i64: 1, 8>}, {transform_indices = @transform_11, window_bounds = array<i64: 1, 8, 16, 8>}, {transform_indices = @transform_12, window_bounds = array<i64: 1, 1, 1, 8>}, {transform_indices = @transform_13, window_bounds = array<i64: 1, 1, 1, 8>}]} {
    %c0_i32 = arith.constant 0 : i32
    %0 = arith.cmpi sgt, %arg1, %c0_i32 : i32
    %cst = arith.constant 1.000000e+00 : f32
    %cst_0 = arith.constant 0.000000e+00 : f32
    %1 = arith.select %0, %cst, %cst_0 : f32
    %c1_i32 = arith.constant 1 : i32
    %2 = arith.cmpi slt, %arg1, %c1_i32 : i32
    %cst_1 = arith.constant 1.000000e+00 : f32
    %cst_2 = arith.constant 0.000000e+00 : f32
    %3 = arith.select %2, %cst_1, %cst_2 : f32
    %c0 = arith.constant 0 : index
    %c0_3 = arith.constant 0 : index
    %4 = vector.load %arg5[%c0, %c0_3] : memref<1x8xf32, #tpu.memory_space<vmem>>, vector<1x8xf32>
    %c0_4 = arith.constant 0 : index
    %c0_5 = arith.constant 0 : index
    %5 = vector.load %arg6[%c0_4, %c0_5] : memref<1x8xf32, #tpu.memory_space<vmem>>, vector<1x8xf32>
    %6 = tpu.iota {dimensions = array<i32: 0>} : vector<128x1xi32>
    %c15_i32 = arith.constant 15 : i32
    %7 = vector.broadcast %c15_i32 : i32 to vector<128x1xi32>
    %8 = arith.andi %6, %7 : vector<128x1xi32>
    %c0_i32_6 = arith.constant 0 : i32
    %9 = vector.broadcast %c0_i32_6 : i32 to vector<128x1xi32>
    %10 = arith.cmpi sgt, %8, %9 : vector<128x1xi32>
    %11 = arith.extui %10 : vector<128x1xi1> to vector<128x1xi32>
    %12 = arith.sitofp %11 : vector<128x1xi32> to vector<128x1xf32>
    %c15_i32_7 = arith.constant 15 : i32
    %13 = vector.broadcast %c15_i32_7 : i32 to vector<128x1xi32>
    %14 = arith.cmpi slt, %8, %13 : vector<128x1xi32>
    %15 = arith.extui %14 : vector<128x1xi1> to vector<128x1xi32>
    %16 = arith.sitofp %15 : vector<128x1xi32> to vector<128x1xf32>
    %c0_8 = arith.constant 0 : index
    %c0_9 = arith.constant 0 : index
    %c0_10 = arith.constant 0 : index
    %c0_11 = arith.constant 0 : index
    %17 = vector.load %arg3[%c0_8, %c0_9, %c0_10, %c0_11] : memref<1x1x16x8xf32, #tpu.memory_space<vmem>>, vector<1x1x16x8xf32>
    %18 = vector.shape_cast %17 : vector<1x1x16x8xf32> to vector<1x16x8xf32>
    %19 = vector.shape_cast %4 : vector<1x8xf32> to vector<1x1x8xf32>
    %20 = vector.broadcast %19 : vector<1x1x8xf32> to vector<1x16x8xf32>
    %21 = arith.mulf %18, %20 : vector<1x16x8xf32>
    %22 = vector.shape_cast %5 : vector<1x8xf32> to vector<1x1x8xf32>
    %23 = vector.broadcast %22 : vector<1x1x8xf32> to vector<1x16x8xf32>
    %24 = arith.addf %21, %23 : vector<1x16x8xf32>
    %cst_12 = arith.constant 0.000000e+00 : f32
    %25 = vector.broadcast %cst_12 : f32 to vector<1x16x8xf32>
    %26 = arith.maximumf %24, %25 : vector<1x16x8xf32>
    %27 = vector.broadcast %1 : f32 to vector<1x16x8xf32>
    %28 = arith.mulf %26, %27 : vector<1x16x8xf32>
    %c0_13 = arith.constant 0 : index
    %c0_14 = arith.constant 0 : index
    %c0_15 = arith.constant 0 : index
    %c0_16 = arith.constant 0 : index
    %29 = vector.load %arg2[%c0_13, %c0_14, %c0_15, %c0_16] : memref<1x8x16x8xf32, #tpu.memory_space<vmem>>, vector<1x8x16x8xf32>
    %30 = vector.shape_cast %29 : vector<1x8x16x8xf32> to vector<8x16x8xf32>
    %31 = vector.shape_cast %4 : vector<1x8xf32> to vector<1x1x8xf32>
    %32 = vector.broadcast %31 : vector<1x1x8xf32> to vector<8x16x8xf32>
    %33 = arith.mulf %30, %32 : vector<8x16x8xf32>
    %34 = vector.shape_cast %5 : vector<1x8xf32> to vector<1x1x8xf32>
    %35 = vector.broadcast %34 : vector<1x1x8xf32> to vector<8x16x8xf32>
    %36 = arith.addf %33, %35 : vector<8x16x8xf32>
    %cst_17 = arith.constant 0.000000e+00 : f32
    %37 = vector.broadcast %cst_17 : f32 to vector<8x16x8xf32>
    %38 = arith.maximumf %36, %37 : vector<8x16x8xf32>
    %c0_18 = arith.constant 0 : index
    %c0_19 = arith.constant 0 : index
    %c0_20 = arith.constant 0 : index
    %c0_21 = arith.constant 0 : index
    %39 = vector.load %arg4[%c0_18, %c0_19, %c0_20, %c0_21] : memref<1x1x16x8xf32, #tpu.memory_space<vmem>>, vector<1x1x16x8xf32>
    %40 = vector.shape_cast %39 : vector<1x1x16x8xf32> to vector<1x16x8xf32>
    %41 = vector.shape_cast %4 : vector<1x8xf32> to vector<1x1x8xf32>
    %42 = vector.broadcast %41 : vector<1x1x8xf32> to vector<1x16x8xf32>
    %43 = arith.mulf %40, %42 : vector<1x16x8xf32>
    %44 = vector.shape_cast %5 : vector<1x8xf32> to vector<1x1x8xf32>
    %45 = vector.broadcast %44 : vector<1x1x8xf32> to vector<1x16x8xf32>
    %46 = arith.addf %43, %45 : vector<1x16x8xf32>
    %cst_22 = arith.constant 0.000000e+00 : f32
    %47 = vector.broadcast %cst_22 : f32 to vector<1x16x8xf32>
    %48 = arith.maximumf %46, %47 : vector<1x16x8xf32>
    %49 = vector.broadcast %3 : f32 to vector<1x16x8xf32>
    %50 = arith.mulf %48, %49 : vector<1x16x8xf32>
    %c0_23 = arith.constant 0 : index
    %c0_24 = arith.constant 0 : index
    %51 = vector.load %arg7[%c0_23, %c0_24] : memref<3x8xf32, #tpu.memory_space<vmem>>, vector<3x8xf32>
    %c0_25 = arith.constant 0 : index
    %c0_26 = arith.constant 0 : index
    %52 = vector.load %arg8[%c0_25, %c0_26] : memref<1x8xf32, #tpu.memory_space<vmem>>, vector<1x8xf32>
    %c0_27 = arith.constant 0 : index
    %c0_28 = arith.constant 0 : index
    %53 = vector.load %arg9[%c0_27, %c0_28] : memref<3x8xf32, #tpu.memory_space<vmem>>, vector<3x8xf32>
    %c0_29 = arith.constant 0 : index
    %c0_30 = arith.constant 0 : index
    %54 = vector.load %arg10[%c0_29, %c0_30] : memref<1x8xf32, #tpu.memory_space<vmem>>, vector<1x8xf32>
    %55 = vector.shape_cast %38 : vector<8x16x8xf32> to vector<128x8xf32>
    %56 = vector.shape_cast %28 : vector<1x16x8xf32> to vector<16x8xf32>
    %57 = vector.shape_cast %50 : vector<1x16x8xf32> to vector<16x8xf32>
    %58 = vector.extract_strided_slice %51 {offsets = [0, 0], sizes = [1, 8], strides = [1, 1]} : vector<3x8xf32> to vector<1x8xf32>
    %59 = vector.extract_strided_slice %51 {offsets = [1, 0], sizes = [1, 8], strides = [1, 1]} : vector<3x8xf32> to vector<1x8xf32>
    %60 = vector.extract_strided_slice %51 {offsets = [2, 0], sizes = [1, 8], strides = [1, 1]} : vector<3x8xf32> to vector<1x8xf32>
    %61 = vector.broadcast %58 : vector<1x8xf32> to vector<16x8xf32>
    %62 = arith.mulf %56, %61 : vector<16x8xf32>
    %63 = vector.extract_strided_slice %55 {offsets = [0, 0], sizes = [16, 8], strides = [1, 1]} : vector<128x8xf32> to vector<16x8xf32>
    %64 = vector.broadcast %59 : vector<1x8xf32> to vector<16x8xf32>
    %65 = arith.mulf %63, %64 : vector<16x8xf32>
    %66 = arith.addf %62, %65 : vector<16x8xf32>
    %67 = vector.extract_strided_slice %55 {offsets = [16, 0], sizes = [16, 8], strides = [1, 1]} : vector<128x8xf32> to vector<16x8xf32>
    %68 = vector.broadcast %60 : vector<1x8xf32> to vector<16x8xf32>
    %69 = arith.mulf %67, %68 : vector<16x8xf32>
    %70 = arith.addf %66, %69 : vector<16x8xf32>
    %71 = vector.extract_strided_slice %55 {offsets = [96, 0], sizes = [16, 8], strides = [1, 1]} : vector<128x8xf32> to vector<16x8xf32>
    %72 = vector.broadcast %58 : vector<1x8xf32> to vector<16x8xf32>
    %73 = arith.mulf %71, %72 : vector<16x8xf32>
    %74 = vector.extract_strided_slice %55 {offsets = [112, 0], sizes = [16, 8], strides = [1, 1]} : vector<128x8xf32> to vector<16x8xf32>
    %75 = vector.broadcast %59 : vector<1x8xf32> to vector<16x8xf32>
    %76 = arith.mulf %74, %75 : vector<16x8xf32>
    %77 = arith.addf %73, %76 : vector<16x8xf32>
    %78 = vector.broadcast %60 : vector<1x8xf32> to vector<16x8xf32>
    %79 = arith.mulf %57, %78 : vector<16x8xf32>
    %80 = arith.addf %77, %79 : vector<16x8xf32>
    %81 = vector.extract_strided_slice %55 {offsets = [0, 0], sizes = [96, 8], strides = [1, 1]} : vector<128x8xf32> to vector<96x8xf32>
    %82 = vector.broadcast %58 : vector<1x8xf32> to vector<96x8xf32>
    %83 = arith.mulf %81, %82 : vector<96x8xf32>
    %84 = vector.extract_strided_slice %55 {offsets = [16, 0], sizes = [96, 8], strides = [1, 1]} : vector<128x8xf32> to vector<96x8xf32>
    %85 = vector.broadcast %59 : vector<1x8xf32> to vector<96x8xf32>
    %86 = arith.mulf %84, %85 : vector<96x8xf32>
    %87 = arith.addf %83, %86 : vector<96x8xf32>
    %88 = vector.extract_strided_slice %55 {offsets = [32, 0], sizes = [96, 8], strides = [1, 1]} : vector<128x8xf32> to vector<96x8xf32>
    %89 = vector.broadcast %60 : vector<1x8xf32> to vector<96x8xf32>
    %90 = arith.mulf %88, %89 : vector<96x8xf32>
    %91 = arith.addf %87, %90 : vector<96x8xf32>
    %92 = tpu.concatenate %70, %91, %80 in 0 : vector<16x8xf32>, vector<96x8xf32>, vector<16x8xf32> -> vector<128x8xf32>
    %93 = vector.broadcast %52 : vector<1x8xf32> to vector<128x8xf32>
    %94 = arith.addf %92, %93 : vector<128x8xf32>
    %cst_31 = arith.constant 0.000000e+00 : f32
    %95 = vector.broadcast %cst_31 : f32 to vector<1x8xf32>
    %96 = vector.extract_strided_slice %94 {offsets = [0, 0], sizes = [127, 8], strides = [1, 1]} : vector<128x8xf32> to vector<127x8xf32>
    %97 = tpu.concatenate %95, %96 in 0 : vector<1x8xf32>, vector<127x8xf32> -> vector<128x8xf32>
    %98 = vector.broadcast %12 : vector<128x1xf32> to vector<128x8xf32>
    %99 = arith.mulf %97, %98 : vector<128x8xf32>
    %100 = vector.extract_strided_slice %94 {offsets = [1, 0], sizes = [127, 8], strides = [1, 1]} : vector<128x8xf32> to vector<127x8xf32>
    %101 = tpu.concatenate %100, %95 in 0 : vector<127x8xf32>, vector<1x8xf32> -> vector<128x8xf32>
    %102 = vector.broadcast %16 : vector<128x1xf32> to vector<128x8xf32>
    %103 = arith.mulf %101, %102 : vector<128x8xf32>
    %104 = vector.extract_strided_slice %53 {offsets = [0, 0], sizes = [1, 8], strides = [1, 1]} : vector<3x8xf32> to vector<1x8xf32>
    %105 = vector.broadcast %104 : vector<1x8xf32> to vector<128x8xf32>
    %106 = arith.mulf %99, %105 : vector<128x8xf32>
    %107 = vector.extract_strided_slice %53 {offsets = [1, 0], sizes = [1, 8], strides = [1, 1]} : vector<3x8xf32> to vector<1x8xf32>
    %108 = vector.broadcast %107 : vector<1x8xf32> to vector<128x8xf32>
    %109 = arith.mulf %94, %108 : vector<128x8xf32>
    %110 = arith.addf %106, %109 : vector<128x8xf32>
    %111 = vector.extract_strided_slice %53 {offsets = [2, 0], sizes = [1, 8], strides = [1, 1]} : vector<3x8xf32> to vector<1x8xf32>
    %112 = vector.broadcast %111 : vector<1x8xf32> to vector<128x8xf32>
    %113 = arith.mulf %103, %112 : vector<128x8xf32>
    %114 = arith.addf %110, %113 : vector<128x8xf32>
    %115 = vector.broadcast %54 : vector<1x8xf32> to vector<128x8xf32>
    %116 = arith.addf %114, %115 : vector<128x8xf32>
    %c0_32 = arith.constant 0 : index
    %c0_33 = arith.constant 0 : index
    %117 = vector.load %arg11[%c0_32, %c0_33] : memref<8x8xf32, #tpu.memory_space<vmem>>, vector<8x8xf32>
    %cst_34 = arith.constant dense<0.000000e+00> : vector<128x8xf32>
    %118 = tpu.matmul %116, %117, %cst_34 {dimension_numbers = #tpu.dot_dimension_numbers<[1], [0], [0], [1], [0, 0, 1, 1], [], []>} : vector<128x8xf32>, vector<8x8xf32>, vector<128x8xf32> -> vector<128x8xf32>
    %c0_35 = arith.constant 0 : index
    %c0_36 = arith.constant 0 : index
    %119 = vector.load %arg12[%c0_35, %c0_36] : memref<1x8xf32, #tpu.memory_space<vmem>>, vector<1x8xf32>
    %120 = vector.broadcast %119 : vector<1x8xf32> to vector<128x8xf32>
    %121 = arith.addf %118, %120 : vector<128x8xf32>
    %122 = vector.shape_cast %121 : vector<128x8xf32> to vector<8x16x8xf32>
    %c0_37 = arith.constant 0 : index
    %c0_38 = arith.constant 0 : index
    %c0_39 = arith.constant 0 : index
    %c0_40 = arith.constant 0 : index
    %123 = vector.load %arg13[%c0_37, %c0_38, %c0_39, %c0_40] : memref<1x8x16x8xf32, #tpu.memory_space<vmem>>, vector<1x8x16x8xf32>
    %124 = vector.shape_cast %123 : vector<1x8x16x8xf32> to vector<8x16x8xf32>
    %125 = vector.shape_cast %122 : vector<8x16x8xf32> to vector<1x8x16x8xf32>
    tpu.vector_store %arg13[%c0_37, %c0_38, %c0_39, %c0_40], %125 {strides = array<i32>} : memref<1x8x16x8xf32, #tpu.memory_space<vmem>>, vector<1x8x16x8xf32>,
    %cst_41 = arith.constant dense<0.000000e+00> : vector<8xf32>
    %126 = vector.multi_reduction <add>, %121, %cst_41 [0] : vector<128x8xf32> to vector<8xf32>
    %127 = vector.shape_cast %126 : vector<8xf32> to vector<1x1x1x8xf32>
    %c0_42 = arith.constant 0 : index
    %c0_43 = arith.constant 0 : index
    %c0_44 = arith.constant 0 : index
    %c0_45 = arith.constant 0 : index
    %128 = vector.load %arg14[%c0_42, %c0_43, %c0_44, %c0_45] : memref<1x1x1x8xf32, #tpu.memory_space<vmem>>, vector<1x1x1x8xf32>
    tpu.vector_store %arg14[%c0_42, %c0_43, %c0_44, %c0_45], %127 {strides = array<i32>} : memref<1x1x1x8xf32, #tpu.memory_space<vmem>>, vector<1x1x1x8xf32>,
    %129 = arith.mulf %121, %121 : vector<128x8xf32>
    %cst_46 = arith.constant dense<0.000000e+00> : vector<8xf32>
    %130 = vector.multi_reduction <add>, %129, %cst_46 [0] : vector<128x8xf32> to vector<8xf32>
    %131 = vector.shape_cast %130 : vector<8xf32> to vector<1x1x1x8xf32>
    %c0_47 = arith.constant 0 : index
    %c0_48 = arith.constant 0 : index
    %c0_49 = arith.constant 0 : index
    %c0_50 = arith.constant 0 : index
    %132 = vector.load %arg15[%c0_47, %c0_48, %c0_49, %c0_50] : memref<1x1x1x8xf32, #tpu.memory_space<vmem>>, vector<1x1x1x8xf32>
    tpu.vector_store %arg15[%c0_47, %c0_48, %c0_49, %c0_50], %131 {strides = array<i32>} : memref<1x1x1x8xf32, #tpu.memory_space<vmem>>, vector<1x1x1x8xf32>,
    return
  }
  func.func @transform_0(%arg0: i32, %arg1: i32) -> (i32, i32, i32, i32) {
    %c0_i32 = arith.constant 0 : i32
    %c0_i32_0 = arith.constant 0 : i32
    %c0_i32_1 = arith.constant 0 : i32
    return %arg0, %arg1, %c0_i32, %c0_i32_0 : i32, i32, i32, i32
  }
  func.func @transform_1(%arg0: i32, %arg1: i32) -> (i32, i32, i32, i32) {
    %c8_i32 = arith.constant 8 : i32
    %0 = arith.muli %arg1, %c8_i32 : i32
    %c1_i32 = arith.constant 1 : i32
    %1 = arith.subi %0, %c1_i32 : i32
    %c0_i32 = arith.constant 0 : i32
    %2 = arith.maxsi %1, %c0_i32 : i32
    %c0_i32_0 = arith.constant 0 : i32
    %c0_i32_1 = arith.constant 0 : i32
    %c0_i32_2 = arith.constant 0 : i32
    return %arg0, %2, %c0_i32_0, %c0_i32_1 : i32, i32, i32, i32
  }
  func.func @transform_2(%arg0: i32, %arg1: i32) -> (i32, i32, i32, i32) {
    %c1_i32 = arith.constant 1 : i32
    %0 = arith.addi %arg1, %c1_i32 : i32
    %c8_i32 = arith.constant 8 : i32
    %1 = arith.muli %0, %c8_i32 : i32
    %c15_i32 = arith.constant 15 : i32
    %2 = arith.minsi %1, %c15_i32 : i32
    %c0_i32 = arith.constant 0 : i32
    %c0_i32_0 = arith.constant 0 : i32
    %c0_i32_1 = arith.constant 0 : i32
    return %arg0, %2, %c0_i32, %c0_i32_0 : i32, i32, i32, i32
  }
  func.func @transform_3(%arg0: i32, %arg1: i32) -> (i32, i32) {
    %c0_i32 = arith.constant 0 : i32
    %c0_i32_0 = arith.constant 0 : i32
    %c0_i32_1 = arith.constant 0 : i32
    return %c0_i32, %c0_i32_0 : i32, i32
  }
  func.func @transform_4(%arg0: i32, %arg1: i32) -> (i32, i32) {
    %c0_i32 = arith.constant 0 : i32
    %c0_i32_0 = arith.constant 0 : i32
    %c0_i32_1 = arith.constant 0 : i32
    return %c0_i32, %c0_i32_0 : i32, i32
  }
  func.func @transform_5(%arg0: i32, %arg1: i32) -> (i32, i32) {
    %c0_i32 = arith.constant 0 : i32
    %c0_i32_0 = arith.constant 0 : i32
    %c0_i32_1 = arith.constant 0 : i32
    return %c0_i32, %c0_i32_0 : i32, i32
  }
  func.func @transform_6(%arg0: i32, %arg1: i32) -> (i32, i32) {
    %c0_i32 = arith.constant 0 : i32
    %c0_i32_0 = arith.constant 0 : i32
    %c0_i32_1 = arith.constant 0 : i32
    return %c0_i32, %c0_i32_0 : i32, i32
  }
  func.func @transform_7(%arg0: i32, %arg1: i32) -> (i32, i32) {
    %c0_i32 = arith.constant 0 : i32
    %c0_i32_0 = arith.constant 0 : i32
    %c0_i32_1 = arith.constant 0 : i32
    return %c0_i32, %c0_i32_0 : i32, i32
  }
  func.func @transform_8(%arg0: i32, %arg1: i32) -> (i32, i32) {
    %c0_i32 = arith.constant 0 : i32
    %c0_i32_0 = arith.constant 0 : i32
    %c0_i32_1 = arith.constant 0 : i32
    return %c0_i32, %c0_i32_0 : i32, i32
  }
  func.func @transform_9(%arg0: i32, %arg1: i32) -> (i32, i32) {
    %c0_i32 = arith.constant 0 : i32
    %c0_i32_0 = arith.constant 0 : i32
    %c0_i32_1 = arith.constant 0 : i32
    return %c0_i32, %c0_i32_0 : i32, i32
  }
  func.func @transform_10(%arg0: i32, %arg1: i32) -> (i32, i32) {
    %c0_i32 = arith.constant 0 : i32
    %c0_i32_0 = arith.constant 0 : i32
    %c0_i32_1 = arith.constant 0 : i32
    return %c0_i32, %c0_i32_0 : i32, i32
  }
  func.func @transform_11(%arg0: i32, %arg1: i32) -> (i32, i32, i32, i32) {
    %c0_i32 = arith.constant 0 : i32
    %c0_i32_0 = arith.constant 0 : i32
    %c0_i32_1 = arith.constant 0 : i32
    return %arg0, %arg1, %c0_i32, %c0_i32_0 : i32, i32, i32, i32
  }
  func.func @transform_12(%arg0: i32, %arg1: i32) -> (i32, i32, i32, i32) {
    %c0_i32 = arith.constant 0 : i32
    %c0_i32_0 = arith.constant 0 : i32
    %c0_i32_1 = arith.constant 0 : i32
    return %arg0, %arg1, %c0_i32, %c0_i32_0 : i32, i32, i32, i32
  }
  func.func @transform_13(%arg0: i32, %arg1: i32) -> (i32, i32, i32, i32) {
    %c0_i32 = arith.constant 0 : i32
    %c0_i32_0 = arith.constant 0 : i32
    %c0_i32_1 = arith.constant 0 : i32
    return %arg0, %arg1, %c0_i32, %c0_i32_0 : i32, i32, i32, i32
  }
}

</mosaic_0001>

<bundles_post_ra>
// kernel: light_decoder_block.3
= control target key start
LH: loop header
LB: loop body
LE: loop exit
PB: predicated region body
PF: predicated region fallthrough
CT: control target
= control target key end

     0   :  { %s2073_s25 = smov 0   ;;  %s2075_s26 = smov 0   ;;  %s2723_s0 = inlined_call_operand.vmem [shape: f32[2,16,16,8], index: 0, kind: input, shape index: {}, may-alias: {0,1,2}]   ;;  %s2724_s1 = inlined_call_operand.vmem [shape: f32[2,16,16,8], index: 1, kind: input, shape index: {}, may-alias: {0,1,2}]   ;;  %s2725_s2 = inlined_call_operand.vmem [shape: f32[2,16,16,8], index: 2, kind: input, shape index: {}, may-alias: {0,1,2}]   ;;  %s2726_s3 = inlined_call_operand.vmem [shape: f32[1,8], index: 3, kind: input, shape index: {}]   ;;  %s2727_s4 = inlined_call_operand.vmem [shape: f32[1,8], index: 4, kind: input, shape index: {}]   ;;  %s2728_s5 = inlined_call_operand.vmem [shape: f32[3,8], index: 5, kind: input, shape index: {}]   ;;  %s2729_s6 = inlined_call_operand.vmem [shape: f32[1,8], index: 6, kind: input, shape index: {}]   ;;  %s2730_s7 = inlined_call_operand.vmem [shape: f32[3,8], index: 7, kind: input, shape index: {}]   ;;  %s2731_s8 = inlined_call_operand.vmem [shape: f32[1,8], index: 8, kind: input, shape index: {}]   ;;  %s2732_s9 = inlined_call_operand.vmem [shape: f32[8,8], index: 9, kind: input, shape index: {}]   ;;  %s2733_s10 = inlined_call_operand.vmem [shape: f32[1,8], index: 10, kind: input, shape index: {}]   ;;  %s2734_s11 = inlined_call_operand.vmem [shape: f32[2,16,16,8], index: 11, kind: output, shape index: {0}]   ;;  %s2735_s12 = inlined_call_operand.vmem [shape: f32[2,2,1,8], index: 12, kind: output, shape index: {1}]   ;;  %s2736_s13 = inlined_call_operand.vmem [shape: f32[2,2,1,8], index: 13, kind: output, shape index: {2}]  }
   0x1   :  { %2737 = sst [smem:[#allocation2_spill]] %s2728_s5  ;;  %s2077_s27 = smov 0  }
   0x2   :  { %s2079_s28 = smov 0   ;;  %s2081_s29 = smov 0  }
   0x3 LB: > { %s33_s30 = sadd.s32 1, %s1992_s27  ;;  %s36_s14 = sadd.s32 1, %s1996_s28  ;;  %s2000_s29 = sphi %s2081_s29, %s24_s29   ;;  %s1996_s28 = sphi %s2079_s28, %s2747_s28   ;;  %s1992_s27 = sphi %s2077_s27, %s2746_s27   ;;  %s1988_s26 = sphi %s2075_s26, %s2745_s26   ;;  %s1984_s25 = sphi %s2073_s25, %s2744_s25  }
   0x4   : > { %p34_p0 = scmp.ge.s32.totalorder %s33_s30, 2  ;;  %p1801_p1 = scmp.ge.s32.totalorder %s2000_s29, 1 }
   0x5   : > { %p482_p2 = scmp.lt.s32.totalorder %s2000_s29, 5 }
   0x6   : > { %s2749_s30 = smov (%p34_p0, %s33_s30), 0  ;;  %s2751_s14 = smov (!%p34_p0, %s36_s14), %s1996_s28 }
   0x7   : > { %p483_p3 = pnand %p1801_p1, %p482_p2  ;;  %p38_p4 = scmp.ge.s32.totalorder %s2751_s14, 2 }
   0x8   : > { %v1257_v0 = vld [vmem:[%s2732_s9] sm:$0xff] (!%p483_p3)  ;;  %s2109_s17 = sshll.u32 (!%p483_p3), %s1984_s25, 3  ;;  %p577_p5 = scmp.lt.s32.totalorder (!%p483_p3), %s1988_s26, 1  ;;  %v652_v1 = vlaneseq (!%p483_p3)  ;;  %v2002_v14 = vmov (!%p483_p3), 0.0   ;;  %vm1013_vm4 = vcmask (!%p483_p3), 1040384   ;;  %vm1078_vm5 = vcmask (!%p483_p3), 1046528  }
   0x9   : > { %s2753_s14 = smov (%p38_p4, %s2751_s14), 0  ;;  %486 = sbr.rel (%p483_p3) target bundleno = 365 (0x16d), region = 64 }
   0xa   : > { %1893 = vmatprep.subr.mxu0 (!%p483_p3), %v1257_v0  ;;  %p579_p6 = scmp.lt.s32.totalorder (!%p483_p3), %s2109_s17, 15  ;;  %s2113_s18 = sadd.s32 (!%p483_p3), 4294967295, %s2109_s17  ;;  %1919 = vmatprep.subr.mxu1 (!%p483_p3), %v1257_v0  ;;  %v2117_v2 = vshrl.u32 (!%p483_p3), %v652_v1, 7  ;;  %v881_v4 = vld [vmem:[%s2730_s7] sm:$0x7] (!%p483_p3)  ;;  %vm1265_vm8 = vcmask (!%p483_p3), 64512  }
   0xb   : > { %1894 = vmatpush3.msra.mxu0 (!%p483_p3), %v1257_v0  ;;  %1920 = vmatpush3.msra.mxu1 (!%p483_p3), %v1257_v0  ;;  %s2738_s5 = sld [smem:[#allocation2_spill]] (!%p483_p3)  ;;  %p589_p7 = scmp.gt.s32.totalorder (!%p483_p3), %s2113_s18, 0  ;;  %v2171_v19 = vld [vmem:[%s2726_s3] ss:$0 sm:$0xff] (!%p483_p3) }
   0xc   : > { %v669_v5 = vand.u32 (!%p483_p3), 15, %v2117_v2  ;;  %v885_v6 = vsub.s32 (!%p483_p3), 0, %v2117_v2  ;;  %v891_v7 = vsub.s32 (!%p483_p3), 1, %v2117_v2  ;;  %v899_v8 = vsub.s32 (!%p483_p3), 2, %v2117_v2  ;;  %p1808_p8 = scmp.lt.s32.totalorder (!%p483_p3), %s2113_s18, 15  ;;  %s1875_s20 = sadd.s32 (!%p483_p3), 8, %s2109_s17 }
   0xd   : > { %v654_v9 = vadd.s32 (!%p483_p3), 8, %v2117_v2  ;;  %v655_v10 = vadd.s32 (!%p483_p3), 16, %v2117_v2  ;;  %v656_v11 = vadd.s32 (!%p483_p3), 24, %v2117_v2  ;;  %v2139_v12 = vadd.s32 (!%p483_p3), 32, %v2117_v2  ;;  %p2148_p9 = scmp.lt.s32.totalorder (!%p483_p3), %s1875_s20, 15  ;;  %p646_p10 = scmp.gt.s32.totalorder (!%p483_p3), %s1984_s25, 0 }
   0xe   : > { %vm685_vm0 = vcmp.gt.s32.totalorder (!%p483_p3), %v669_v5, 0  ;;  %v2159_v18 = vrot.slane (!%p483_p3), %v881_v4, %v885_v6  ;;  %v2180_v27 = vrot.slane (!%p483_p3), %v881_v4, %v891_v7  ;;  %v2182_v28 = vrot.slane (!%p483_p3), %v881_v4, %v899_v8  ;;  %v2203_v37 = vld [vmem:[%s2727_s4] ss:$0 sm:$0xff] (!%p483_p3)  ;;  %p634_p11 = scmp.lt.s32.totalorder (!%p483_p3), %s1984_s25, 1 }
   0xf   : > { %v2153_v15 = vsel (!%p483_p3), %vm685_vm0, 1.0, %v2002_v14  ;;  %v670_v20 = vand.u32 (!%p483_p3), 15, %v654_v9  ;;  %v671_v21 = vand.u32 (!%p483_p3), 15, %v655_v10  ;;  %v672_v22 = vand.u32 (!%p483_p3), 15, %v656_v11 }
  0x10   : > { %s2755_s26 = smov (!%p577_p5, %s1988_s26), 1  ;;  %v673_v23 = vand.u32 15, %v2139_v12  ;;  %v2185_v29 = vadd.s32 40, %v2117_v2  ;;  %v2188_v30 = vadd.s32 48, %v2117_v2  ;;  %s2757_s20 = smov (!%p2148_p9, %s1875_s20), 15 }
  0x11   : > { %s580_s19 = scalar_select %p579_p6, %s2109_s17, 15  ;;  %v879_v3 = vld [vmem:[%s2738_s5] sm:$0x7]  ;;  %vm734_vm1 = vcmp.lt.s32.totalorder %v670_v20, 15  ;;  %vm687_vm2 = vcmp.gt.s32.totalorder %v671_v21, 0  ;;  %vm736_vm3 = vcmp.lt.s32.totalorder %v672_v22, 15 }
  0x12   : > { %s2127_s24 = sshll.u32 %s2755_s26, 5  ;;  %v2145_v13 = vrot.slane %v879_v3, %v885_v6  ;;  %v2155_v16 = vrot.slane %v879_v3, %v891_v7  ;;  %v2157_v17 = vrot.slane %v879_v3, %v899_v8  ;;  %v2208_v40 = vsel %vm734_vm1, 1.0, %v2002_v14  ;;  %s2761_s20 = smov (!%p2148_p9, %s2757_s20), 15 }
  0x13   : > { %s1803_s15 = sshll.u32 %s580_s19, 1  ;;  %v2216_v44 = vsel %vm687_vm2, 1.0, %v2002_v14  ;;  %v2227_v52 = vsel %vm736_vm3, 1.0, %v2002_v14  ;;  %vm689_vm6 = vcmp.gt.s32.totalorder %v673_v23, 0  ;;  %s2763_s25 = smov (!%p634_p11, %s1984_s25), 1  ;;  %vm1512_vm3 = vcmask 57344  }
  0x14   : > { %s2142_s16 = sadd.s32 %s2127_s24, %s1803_s15  ;;  %s2224_s15 = sshll.u32 %s2761_s20, 1 }
  0x15   : > { %s1805_s19 = sshll.u32 %s2142_s16, 3  ;;  %s1827_s16 = sshll.u32 %s2755_s26, 1 }
  0x16   : > { %s2166_s23 = scalar_lea.vmem %s2723_s0, %s1805_s19 }
  0x17   : > { %s590_s17 = scalar_select %p589_p7, %s2113_s18, 0  ;;  %v804_v24 = vld [vmem:[%s2166_s23] sm:$0xff]  ;;  %v805_v25 = vld [vmem:[%s2166_s23 + $0x8] sm:$0xff]  ;;  %v806_v26 = vld [vmem:[%s2166_s23 + $0x10] sm:$0xff] }
  0x18   : > { %v807_v31 = vld [vmem:[%s2166_s23 + $0x18] sm:$0xff]  ;;  %v808_v32 = vld [vmem:[%s2166_s23 + $0x20] sm:$0xff]  ;;  %v820_v33 = vmul.f32 %v2171_v19, %v804_v24  ;;  %v821_v34 = vmul.f32 %v2171_v19, %v805_v25  ;;  %v822_v35 = vmul.f32 %v2171_v19, %v806_v26  ;;  %v809_v36 = vld [vmem:[%s2166_s23 + $0x28] sm:$0xff] }
  0x19   : > { %s2759_s17 = smov (!%p1808_p8, %s590_s17), 15  ;;  %v823_v38 = vmul.f32 %v2171_v19, %v807_v31  ;;  %v824_v39 = vmul.f32 %v2171_v19, %v808_v32  ;;  %v810_v45 = vld [vmem:[%s2166_s23 + $0x30] sm:$0xff]  ;;  %v825_v48 = vmul.f32 %v2171_v19, %v809_v36  ;;  %v811_v20 = vld [vmem:[%s2166_s23 + $0x38] sm:$0xff]  ;;  %v2268_v36 = vld [vmem:[%s2729_s6] ss:$0 sm:$0xff] }
  0x1a   : > { %v836_v41 = vadd.f32 %v2203_v37, %v820_v33  ;;  %v837_v42 = vadd.f32 %v2203_v37, %v821_v34  ;;  %v838_v43 = vadd.f32 %v2203_v37, %v822_v35  ;;  %s1813_s18 = sshll.u32 %s2759_s17, 1  ;;  %s614_s17 = sadd.s32 %s2224_s15, %s2127_s24  ;;  %v826_v56 = vmul.f32 %v2171_v19, %v810_v45 }
  0x1b   : > { %v839_v46 = vadd.f32 %v2203_v37, %v823_v38  ;;  %v840_v47 = vadd.f32 %v2203_v37, %v824_v39  ;;  %s597_s21 = sadd.s32 %s1813_s18, %s2127_s24  ;;  %v841_v55 = vadd.f32 %v2203_v37, %v825_v48  ;;  %v827_v38 = vmul.f32 %v2171_v19, %v811_v20 }
  0x1c   : > { %v852_v49 = vmax.f32 %v836_v41, 0.0  ;;  %v853_v50 = vmax.f32 %v837_v42, 0.0  ;;  %v854_v51 = vmax.f32 %v838_v43, 0.0  ;;  %s1815_s5 = sshll.u32 %s597_s21, 3  ;;  %v842_v11 = vadd.f32 %v2203_v37, %v826_v56 }
  0x1d   : > { %v855_v53 = vmax.f32 %v839_v46, 0.0  ;;  %v2231_v54 = vmax.f32 %v840_v47, 0.0  ;;  %s599_s18 = scalar_lea.vmem %s2724_s1, %s1815_s5  ;;  %v2254_v9 = vmax.f32 %v841_v55, 0.0  ;;  %v1831_v43 = vsel %vm689_vm6, 1.0, %v2002_v14 }
  0x1e   : > { %v893_v57 = vmul.f32 %v2155_v16, %v852_v49  ;;  %v894_v58 = vmul.f32 %v2155_v16, %v853_v50  ;;  %v901_v59 = vmul.f32 %v2157_v17, %v854_v51  ;;  %v915_v60 = vmul.f32 %v2145_v13, %v852_v49  ;;  %v781_v61 = vld [vmem:[%s599_s18] sm:$0xff]  ;;  %v782_v62 = vld [vmem:[%s599_s18 + $0x8] sm:$0xff]  ;;  %s647_s21 = scalar_select %p646_p10, 1.0, 0.0 }
  0x1f   : > { %v902_v63 = vmul.f32 %v2157_v17, %v855_v53  ;;  %v916_v0 = vmul.f32 %v2145_v13, %v853_v50  ;;  %v917_v1 = vmul.f32 %v2145_v13, %v854_v51  ;;  %v927_v3 = vmul.f32 %v2155_v16, %v854_v51 }
  0x20   : > { %v789_v4 = vmul.f32 %v2171_v19, %v781_v61  ;;  %v790_v5 = vmul.f32 %v2171_v19, %v782_v62  ;;  %v929_v6 = vmul.f32 %v2155_v16, %v2231_v54  ;;  %v951_v7 = vmul.f32 %v2157_v17, %v2231_v54 }
  0x21   : > { %v939_v8 = vadd.f32 %v927_v3, %v915_v60  ;;  %v928_v10 = vmul.f32 %v2155_v16, %v855_v53  ;;  %v801_v24 = vstv %s647_s21  ;;  %v952_v32 = vmul.f32 %v2157_v17, %v2254_v9  ;;  %s1822_s21 = sshll.u32 %s614_s17, 3 }
  0x22   : > { %v797_v21 = vadd.f32 %v2203_v37, %v789_v4  ;;  %v798_v22 = vadd.f32 %v2203_v37, %v790_v5  ;;  %v941_v25 = vadd.f32 %v929_v6, %v917_v1  ;;  %v2263_v33 = vmax.f32 %v842_v11, 0.0  ;;  %s2528_s15 = scalar_lea.vmem %s2725_s2, %s1822_s21  ;;  %s2616_s21 = scalar_lea.vmem %s2734_s11, %s1805_s19 }
  0x23   : > { %v963_v26 = vadd.f32 %v951_v7, %v939_v8  ;;  %v940_v31 = vadd.f32 %v928_v10, %v916_v0  ;;  %v843_v47 = vadd.f32 %v2203_v37, %v827_v38  ;;  %v918_v48 = vmul.f32 %v2145_v13, %v855_v53  ;;  %s2547_s17 = scalar_select %p634_p11, 1.0, 0.0 }
  0x24   : > { %v799_v34 = vmax.f32 %v797_v21, 0.0  ;;  %v800_v35 = vmax.f32 %v798_v22, 0.0  ;;  %v953_v42 = vmul.f32 %v2157_v17, %v2263_v33  ;;  %v930_v0 = vmul.f32 %v2155_v16, %v2254_v9  ;;  %s637_s19 = sadd.s32 %s1827_s16, %s2763_s25 }
  0x25   : > { %v2274_v39 = vadd.f32 %v2268_v36, %v963_v26  ;;  %v964_v41 = vadd.f32 %v952_v32, %v940_v31  ;;  %v2290_v60 = vmax.f32 %v843_v47, 0.0  ;;  %v674_v10 = vand.u32 15, %v2185_v29  ;;  %s645_s22 = scalar_lea.vmem %s2736_s13, %s637_s19 }
  0x26   : > { %v802_v45 = vmul.f32 %v801_v24, %v799_v34  ;;  %v803_v46 = vmul.f32 %v801_v24, %v800_v35  ;;  %v965_v56 = vadd.f32 %v953_v42, %v941_v25  ;;  %v942_v8 = vadd.f32 %v930_v0, %v918_v48 }
  0x27   : > { %v1082_v12 = vrot.slane %v2274_v39, 1  ;;  %v984_v23 = vadd.f32 %v2268_v36, %v964_v41  ;;  %v1017_v49 = vrot.slane %v2274_v39, 7  ;;  %v2286_v50 = vmul.f32 %v2180_v27, %v2274_v39 }
  0x28   : > { %v887_v51 = vmul.f32 %v2145_v13, %v802_v45  ;;  %v888_v55 = vmul.f32 %v2145_v13, %v803_v46  ;;  %v2296_v4 = vadd.f32 %v2268_v36, %v965_v56  ;;  %v954_v5 = vmul.f32 %v2157_v17, %v2290_v60 }
  0x29   : > { %v1084_v61 = vrot.slane %v984_v23, 1  ;;  %v1019_v62 = vrot.slane %v984_v23, 7  ;;  %v1170_v53 = vmul.f32 %v2180_v27, %v984_v23  ;;  %vm2314_vm7 = vcmp.lt.s32.totalorder %v674_v10, 15 }
  0x2a   : > { %v895_v1 = vadd.f32 %v893_v57, %v887_v51  ;;  %v896_v3 = vadd.f32 %v894_v58, %v888_v55  ;;  %v1086_v57 = vrot.slane %v2296_v4, 1  ;;  %v966_v22 = vadd.f32 %v954_v5, %v942_v8 }
  0x2b   : > { %v1085_v6 = vsel %vm1078_vm5, %v1082_v12, %v1084_v61  ;;  %v1020_v7 = vsel %vm1013_vm4, %v1017_v49, %v1019_v62  ;;  %v1021_v24 = vrot.slane %v2296_v4, 7  ;;  %v1171_v25 = vmul.f32 %v2180_v27, %v2296_v4 }
  0x2c   : > { %v903_v11 = vadd.f32 %v901_v59, %v895_v1  ;;  %v904_v20 = vadd.f32 %v902_v63, %v896_v3  ;;  %v2304_v21 = vmul.f32 %v2182_v28, %v1085_v6  ;;  %v1150_v58 = vmul.f32 %v2159_v18, %v1020_v7 }
  0x2d   : > { %v1087_v29 = vsel %vm1078_vm5, %v1084_v61, %v1086_v57  ;;  %v2320_v34 = vadd.f32 %v2268_v36, %v966_v22  ;;  %v1022_v35 = vsel %vm1013_vm4, %v1019_v62, %v1021_v24  ;;  %v2354_v10 = vsel %vm2314_vm7, 1.0, %v2002_v14 }
  0x2e   : > { %v981_v26 = vadd.f32 %v2268_v36, %v903_v11  ;;  %v982_v31 = vadd.f32 %v2268_v36, %v904_v20  ;;  %v1130_v63 = vmul.f32 %v2227_v52, %v1087_v29  ;;  %v1186_v32 = vadd.f32 %v1170_v53, %v1150_v58 }
  0x2f   : > { %v1066_v48 = vmul.f32 %v1831_v43, %v1022_v35  ;;  %v1088_v55 = vrot.slane %v2320_v34, 1  ;;  %v919_v22 = vmul.f32 %v2145_v13, %v2231_v54  ;;  %v813_v35 = vld [vmem:[%s2166_s23 + $0x48] sm:$0xff]  ;;  %v1172_v54 = vmul.f32 %v2180_v27, %v2320_v34 }
  0x30   : > { %v1014_v38 = vrot.slane %v981_v26, 7  ;;  %v1079_v39 = vrot.slane %v981_v26, 1  ;;  %v1080_v41 = vrot.slane %v982_v31, 1  ;;  %v1167_v42 = vmul.f32 %v2180_v27, %v981_v26 }
  0x31   : > { %v1015_v45 = vrot.slane %v982_v31, 7  ;;  %v1168_v46 = vmul.f32 %v2180_v27, %v982_v31  ;;  %v1206_v47 = vmul.f32 %v2182_v28, %v1130_v63  ;;  %v1089_v3 = vsel %vm1078_vm5, %v1086_v57, %v1088_v55 }
  0x32   : > { %v1061_v52 = vsel %vm1013_vm4, 0.0, %v1014_v38  ;;  %v1081_v23 = vsel %vm1078_vm5, %v1079_v39, %v1080_v41  ;;  %v1083_v51 = vsel %vm1078_vm5, %v1080_v41, %v1082_v12  ;;  %v812_v12 = vld [vmem:[%s2166_s23 + $0x40] sm:$0xff]  ;;  %v1151_v6 = vmul.f32 %v2159_v18, %v1066_v48 }
  0x33   : > { %v1062_v56 = vmul.f32 %v2153_v15, %v1061_v52  ;;  %v1203_v61 = vmul.f32 %v2182_v28, %v1081_v23  ;;  %v1016_v62 = vsel %vm1013_vm4, %v1014_v38, %v1015_v45  ;;  %v1128_v53 = vmul.f32 %v2208_v40, %v1083_v51  ;;  %v2343_v15 = vld [vmem:[%s2731_s8] ss:$0 sm:$0xff] }
  0x34   : > { %v1148_v0 = vmul.f32 %v2159_v18, %v1016_v62  ;;  %v1018_v43 = vsel %vm1013_vm4, %v1015_v45, %v1017_v49  ;;  %v1222_v1 = vadd.f32 %v1206_v47, %v1186_v32  ;;  %v1207_v8 = vmul.f32 %v2182_v28, %v1089_v3  ;;  %v815_v62 = vld [vmem:[%s2166_s23 + $0x58] sm:$0xff] }
  0x35   : > { %v1147_v4 = vmul.f32 %v2159_v18, %v1062_v56  ;;  %v1204_v5 = vmul.f32 %v2182_v28, %v1128_v53  ;;  %v1064_v40 = vmul.f32 %v2216_v44, %v1018_v43  ;;  %v1187_v57 = vadd.f32 %v1171_v25, %v1151_v6 }
  0x36   : > { %v1184_v49 = vadd.f32 %v1168_v46, %v1148_v0  ;;  %v1244_v7 = vadd.f32 %v2343_v15, %v1222_v1  ;;  %v828_v58 = vmul.f32 %v2171_v19, %v812_v12  ;;  %v931_v26 = vmul.f32 %v2155_v16, %v2263_v33 }
  0x37   : > { %v1183_v11 = vadd.f32 %v1167_v42, %v1147_v4  ;;  %v1149_v20 = vmul.f32 %v2159_v18, %v1064_v40  ;;  %v1023_v31 = vrot.slane %v2320_v34, 7  ;;  %v1223_v63 = vadd.f32 %v1207_v8, %v1187_v57 }
  0x38   : > { %v1220_v44 = vadd.f32 %v1204_v5, %v1184_v49  ;;  %v844_v32 = vadd.f32 %v2203_v37, %v828_v58  ;;  %v943_v38 = vadd.f32 %v931_v26, %v919_v22  ;;  %v675_v48 = vand.u32 15, %v2188_v30 }
  0x39   : > { %v1219_v29 = vadd.f32 %v1203_v61, %v1183_v11  ;;  %v1185_v59 = vadd.f32 %v2286_v50, %v1149_v20  ;;  %v1024_v39 = vsel %vm1013_vm4, %v1021_v24, %v1023_v31  ;;  %v1245_v45 = vadd.f32 %v2343_v15, %v1223_v63  ;;  %v814_v50 = vld [vmem:[%s2166_s23 + $0x50] sm:$0xff] }
  0x3a   : > { %v1242_v25 = vadd.f32 %v2343_v15, %v1220_v44  ;;  %v2373_v46 = vmax.f32 %v844_v32, 0.0  ;;  %v1152_v47 = vmul.f32 %v2159_v18, %v1024_v39  ;;  %v829_v52 = vmul.f32 %v2171_v19, %v813_v35 }
  0x3b   : > { %v1241_v41 = vadd.f32 %v2343_v15, %v1219_v29  ;;  %v1221_v42 = vadd.f32 %v2304_v21, %v1185_v59  ;;  %v920_v24 = vmul.f32 %v2145_v13, %v2254_v9  ;;  %v932_v51 = vmul.f32 %v2155_v16, %v2290_v60 }
  0x3c   : > { %v955_v21 = vmul.f32 %v2157_v17, %v2373_v46  ;;  %v660_v56 = vadd.s32 56, %v2117_v2  ;;  %v1188_v30 = vadd.f32 %v1172_v54, %v1152_v47  ;;  %vm691_vm9 = vcmp.gt.s32.totalorder %v675_v48, 0 }
  0x3d   : > { %1895 = vmatprep.mubr.msk.f32.mxu0 %vm1265_vm8, %v1241_v41  ;;  %v1243_v23 = vadd.f32 %v2343_v15, %v1221_v42  ;;  %v845_v61 = vadd.f32 %v2203_v37, %v829_v52  ;;  %v830_v9 = vmul.f32 %v2171_v19, %v814_v50  ;;  %v1832_v0 = vsel %vm691_vm9, 1.0, %v2002_v14 }
  0x3e   : > { %1896 = vmatmul.mubr.msk.f32.vlgmr.msra.gmra.mrb[0].mxu0 %vm1265_vm8, %v1242_v25  ;;  %v967_v53 = vadd.f32 %v955_v21, %v943_v38  ;;  %v944_v43 = vadd.f32 %v932_v51, %v920_v24  ;;  %v676_v1 = vand.u32 15, %v660_v56  ;;  %v921_v4 = vmul.f32 %v2145_v13, %v2263_v33 }
  0x3f   : > { %1898 = vmatprep.mubr.msk.f32.mxu0 %vm1265_vm8, %v1243_v23  ;;  %v2394_v3 = vmax.f32 %v845_v61, 0.0  ;;  %v846_v12 = vadd.f32 %v2203_v37, %v830_v9  ;;  %v933_v5 = vmul.f32 %v2155_v16, %v2373_v46  ;;  %v661_v6 = vadd.s32 64, %v2117_v2 }
  0x40   : > { %v987_v40 = vadd.f32 %v2268_v36, %v967_v53  ;;  %vm740_vm10 = vcmp.lt.s32.totalorder %v676_v1, 15  ;;  %v831_v49 = vmul.f32 %v2171_v19, %v815_v62  ;;  %v922_v59 = vmul.f32 %v2145_v13, %v2290_v60  ;;  %v816_v53 = vld [vmem:[%s2166_s23 + $0x60] sm:$0xff] }
  0x41   : > { %v956_v8 = vmul.f32 %v2157_v17, %v2394_v3  ;;  %v1840_v11 = vsel %vm740_vm10, 1.0, %v2002_v14  ;;  %v2408_v20 = vmax.f32 %v846_v12, 0.0  ;;  %v945_v33 = vadd.f32 %v933_v5, %v921_v4 }
  0x42   : > { %1899 = vmatmul.mubr.msk.f32.gmra.mrb[2].mxu0 %vm1265_vm8, %v1244_v7  ;;  %v1090_v57 = vrot.slane %v987_v40, 1  ;;  %v1025_v58 = vrot.slane %v987_v40, 7  ;;  %v1173_v44 = vmul.f32 %v2180_v27, %v987_v40  ;;  %v677_v22 = vand.u32 15, %v661_v6 }
  0x43   : > { %1901 = vmatprep.mubr.msk.f32.mxu0 %vm1265_vm8, %v1245_v45  ;;  %v968_v26 = vadd.f32 %v956_v8, %v944_v43  ;;  %v957_v29 = vmul.f32 %v2157_v17, %v2408_v20  ;;  %v847_v7 = vadd.f32 %v2203_v37, %v831_v49  ;;  %v934_v35 = vmul.f32 %v2155_v16, %v2394_v3 }
  0x44   : > { %v1091_v63 = vsel %vm1078_vm5, %v1088_v55, %v1090_v57  ;;  %v1026_v32 = vsel %vm1013_vm4, %v1023_v31, %v1025_v58  ;;  %vm693_vm11 = vcmp.gt.s32.totalorder %v677_v22, 0  ;;  %v662_v34 = vadd.s32 72, %v2117_v2 }
  0x45   : > { %v1132_v25 = vmul.f32 %v2354_v10, %v1091_v63  ;;  %v988_v38 = vadd.f32 %v2268_v36, %v968_v26  ;;  %v1068_v39 = vmul.f32 %v1832_v0, %v1026_v32  ;;  %v969_v54 = vadd.f32 %v957_v29, %v945_v33 }
  0x46   : > { %v1833_v41 = vsel %vm693_vm11, 1.0, %v2002_v14  ;;  %v2426_v42 = vmax.f32 %v847_v7, 0.0  ;;  %v946_v60 = vadd.f32 %v934_v35, %v922_v59  ;;  %v678_v52 = vand.u32 15, %v662_v34  ;;  %v817_v7 = vld [vmem:[%s2166_s23 + $0x68] sm:$0xff] }
  0x47   : > { %v1208_v55 = vmul.f32 %v2182_v28, %v1132_v25  ;;  %v1092_v31 = vrot.slane %v988_v38, 1  ;;  %v1153_v45 = vmul.f32 %v2159_v18, %v1068_v39  ;;  %v989_v50 = vadd.f32 %v2268_v36, %v969_v54 }
  0x48   : > { %v1027_v10 = vrot.slane %v988_v38, 7  ;;  %v1174_v47 = vmul.f32 %v2180_v27, %v988_v38  ;;  %v958_v48 = vmul.f32 %v2157_v17, %v2426_v42  ;;  %v832_v8 = vmul.f32 %v2171_v19, %v816_v53 }
  0x49   : > { %v1224_v24 = vadd.f32 %v1208_v55, %v1188_v30  ;;  %v1093_v23 = vsel %vm1078_vm5, %v1090_v57, %v1092_v31  ;;  %v1189_v21 = vadd.f32 %v1173_v44, %v1153_v45  ;;  %v1094_v51 = vrot.slane %v989_v50, 1  ;;  %v818_v55 = vld [vmem:[%s2166_s23 + $0x70] sm:$0xff] }
  0x4a   : > { %v1209_v56 = vmul.f32 %v2182_v28, %v1093_v23  ;;  %v1028_v61 = vsel %vm1013_vm4, %v1025_v58, %v1027_v10  ;;  %v970_v9 = vadd.f32 %v958_v48, %v946_v60  ;;  %v1029_v62 = vrot.slane %v989_v50, 7 }
  0x4b   : > { %v1246_v0 = vadd.f32 %v2343_v15, %v1224_v24  ;;  %v1095_v43 = vsel %vm1078_vm5, %v1092_v31, %v1094_v51  ;;  %v1154_v1 = vmul.f32 %v2159_v18, %v1028_v61  ;;  %v1175_v49 = vmul.f32 %v2180_v27, %v989_v50 }
  0x4c   : > { %v1225_v12 = vadd.f32 %v1209_v56, %v1189_v21  ;;  %v1134_v4 = vmul.f32 %v1840_v11, %v1095_v43  ;;  %v2443_v30 = vadd.f32 %v2268_v36, %v970_v9  ;;  %v1030_v5 = vsel %vm1013_vm4, %v1027_v10, %v1029_v62 }
  0x4d   : > { %1902 = vmatmul.mubr.msk.f32.gmra.mrb[4].mxu0 %vm1265_vm8, %v1246_v0  ;;  %v1190_v40 = vadd.f32 %v1174_v47, %v1154_v1  ;;  %v1070_v6 = vmul.f32 %v1833_v41, %v1030_v5  ;;  %vm2452_vm12 = vcmp.lt.s32.totalorder %v678_v52, 15  ;;  %v848_v22 = vadd.f32 %v2203_v37, %v832_v8 }
  0x4e   : > { %v1247_v33 = vadd.f32 %v2343_v15, %v1225_v12  ;;  %v1210_v57 = vmul.f32 %v2182_v28, %v1134_v4  ;;  %v1096_v11 = vrot.slane %v2443_v30, 1  ;;  %v923_v26 = vmul.f32 %v2145_v13, %v2373_v46 }
  0x4f   : > { %v1155_v44 = vmul.f32 %v2159_v18, %v1070_v6  ;;  %v935_v29 = vmul.f32 %v2155_v16, %v2408_v20  ;;  %v1031_v32 = vrot.slane %v2443_v30, 7  ;;  %v1176_v35 = vmul.f32 %v2180_v27, %v2443_v30  ;;  %v819_v30 = vld [vmem:[%s2166_s23 + $0x78] sm:$0xff] }
  0x50   : > { %1904 = vmatprep.mubr.msk.f32.mxu0 %vm1265_vm8, %v1247_v33  ;;  %v1226_v59 = vadd.f32 %v1210_v57, %v1190_v40  ;;  %v1097_v63 = vsel %vm1078_vm5, %v1094_v51, %v1096_v11  ;;  %v2469_v39 = vmax.f32 %v848_v22, 0.0  ;;  %v663_v60 = vadd.s32 80, %v2117_v2 }
  0x51   : > { %v1191_v25 = vadd.f32 %v1175_v49, %v1155_v44  ;;  %v1211_v38 = vmul.f32 %v2182_v28, %v1097_v63  ;;  %v947_v46 = vadd.f32 %v935_v29, %v923_v26  ;;  %v1032_v41 = vsel %vm1013_vm4, %v1029_v62, %v1031_v32 }
  0x52   : > { %v1248_v54 = vadd.f32 %v2343_v15, %v1226_v59  ;;  %v833_v34 = vmul.f32 %v2171_v19, %v817_v7  ;;  %v959_v45 = vmul.f32 %v2157_v17, %v2469_v39  ;;  %v1156_v50 = vmul.f32 %v2159_v18, %v1032_v41 }
  0x53   : > { %v1227_v31 = vadd.f32 %v1211_v38, %v1191_v25  ;;  %v924_v10 = vmul.f32 %v2145_v13, %v2394_v3  ;;  %v679_v47 = vand.u32 15, %v663_v60  ;;  %v936_v52 = vmul.f32 %v2155_v16, %v2426_v42 }
  0x54   : > { %1905 = vmatmul.mubr.msk.f32.gmra.mrb[6].mxu0 %vm1265_vm8, %v1248_v54  ;;  %v849_v48 = vadd.f32 %v2203_v37, %v833_v34  ;;  %v664_v24 = vadd.s32 88, %v2117_v2  ;;  %v1841_v21 = vsel %vm2452_vm12, 1.0, %v2002_v14  ;;  %v971_v51 = vadd.f32 %v959_v45, %v947_v46 }
  0x55   : > { %v1249_v23 = vadd.f32 %v2343_v15, %v1227_v31  ;;  %v834_v3 = vmul.f32 %v2171_v19, %v818_v55  ;;  %vm695_vm13 = vcmp.gt.s32.totalorder %v679_v47, 0  ;;  %v948_v61 = vadd.f32 %v936_v52, %v924_v10  ;;  %v868_v10 = vld [vmem:[%s2528_s15] sm:$0xff] }
  0x56   : > { %v2491_v56 = vmax.f32 %v849_v48, 0.0  ;;  %v680_v9 = vand.u32 15, %v664_v24  ;;  %v991_v62 = vadd.f32 %v2268_v36, %v971_v51  ;;  %v1192_v53 = vadd.f32 %v1176_v35, %v1156_v50 }
  0x57   : > { %1907 = vmatprep.mubr.msk.f32.mxu1 %vm1265_vm8, %v1249_v23  ;;  %v2496_v0 = vadd.f32 %v2203_v37, %v834_v3  ;;  %v925_v43 = vmul.f32 %v2145_v13, %v2408_v20  ;;  %v937_v12 = vmul.f32 %v2155_v16, %v2469_v39  ;;  %v665_v4 = vadd.s32 96, %v2117_v2 }
  0x58   : > { %v960_v1 = vmul.f32 %v2157_v17, %v2491_v56  ;;  %vm744_vm14 = vcmp.lt.s32.totalorder %v680_v9, 15  ;;  %v1098_v5 = vrot.slane %v991_v62, 1  ;;  %v1834_v40 = vsel %vm695_vm13, 1.0, %v2002_v14 }
  0x59   : > { %v1033_v6 = vrot.slane %v991_v62, 7  ;;  %v1177_v49 = vmul.f32 %v2180_v27, %v991_v62  ;;  %v866_v33 = vmax.f32 %v2496_v0, 0.0  ;;  %v949_v20 = vadd.f32 %v937_v12, %v925_v43 }
  0x5a   : > { %v972_v8 = vadd.f32 %v960_v1, %v948_v61  ;;  %v681_v57 = vand.u32 15, %v665_v4  ;;  %v1099_v58 = vsel %vm1078_vm5, %v1096_v11, %v1098_v5  ;;  %v1842_v22 = vsel %vm744_vm14, 1.0, %v2002_v14 }
  0x5b   : > { %v1034_v44 = vsel %vm1013_vm4, %v1031_v32, %v1033_v6  ;;  %v835_v26 = vmul.f32 %v2171_v19, %v819_v30  ;;  %v1136_v29 = vmul.f32 %v1841_v21, %v1099_v58  ;;  %v961_v63 = vmul.f32 %v2157_v17, %v866_v33 }
  0x5c   : > { %v992_v7 = vadd.f32 %v2268_v36, %v972_v8  ;;  %v1072_v59 = vmul.f32 %v1834_v40, %v1034_v44  ;;  %vm697_vm15 = vcmp.gt.s32.totalorder %v681_v57, 0  ;;  %v926_v11 = vmul.f32 %v2145_v13, %v2426_v42 }
  0x5d   : > { %v2519_v35 = vadd.f32 %v2203_v37, %v835_v26  ;;  %v938_v32 = vmul.f32 %v2155_v16, %v2491_v56  ;;  %v1212_v25 = vmul.f32 %v2182_v28, %v1136_v29  ;;  %v973_v54 = vadd.f32 %v961_v63, %v949_v20  ;;  %v869_v29 = vld [vmem:[%s2528_s15 + $0x8] sm:$0xff]  ;;  %s638_s15 = scalar_lea.vmem %s2735_s12, %s637_s19 }
  0x5e   : > { %v1100_v38 = vrot.slane %v992_v7, 1  ;;  %v1157_v46 = vmul.f32 %v2159_v18, %v1072_v59  ;;  %v1035_v41 = vrot.slane %v992_v7, 7  ;;  %v1178_v60 = vmul.f32 %v2180_v27, %v992_v7 }
  0x5f   : > { %v1835_v42 = vsel %vm697_vm15, 1.0, %v2002_v14  ;;  %v867_v34 = vmax.f32 %v2519_v35, 0.0  ;;  %v1228_v55 = vadd.f32 %v1212_v25, %v1192_v53  ;;  %v993_v50 = vadd.f32 %v2268_v36, %v973_v54 }
  0x60   : > { %v1101_v31 = vsel %vm1078_vm5, %v1098_v5, %v1100_v38  ;;  %v1193_v45 = vadd.f32 %v1177_v49, %v1157_v46  ;;  %v1036_v48 = vsel %vm1013_vm4, %v1033_v6, %v1035_v41  ;;  %v950_v52 = vadd.f32 %v938_v32, %v926_v11 }
  0x61   : > { %v1213_v47 = vmul.f32 %v2182_v28, %v1101_v31  ;;  %v962_v24 = vmul.f32 %v2157_v17, %v867_v34  ;;  %v1250_v23 = vadd.f32 %v2343_v15, %v1228_v55  ;;  %v1102_v21 = vrot.slane %v993_v50, 1 }
  0x62   : > { %v1158_v51 = vmul.f32 %v2159_v18, %v1036_v48  ;;  %v1037_v3 = vrot.slane %v993_v50, 7  ;;  %v1179_v62 = vmul.f32 %v2180_v27, %v993_v50  ;;  %v666_v53 = vadd.s32 104, %v2117_v2 }
  0x63   : > { %v1229_v61 = vadd.f32 %v1213_v47, %v1193_v45  ;;  %v974_v9 = vadd.f32 %v962_v24, %v950_v52  ;;  %1908 = vmatmul.mubr.msk.f32.vlgmr.msra.gmra.mrb[0].mxu1 %vm1265_vm8, %v1250_v23  ;;  %v1103_v0 = vsel %vm1078_vm5, %v1100_v38, %v1102_v21  ;;  %v870_v12 = vmul.f32 %v2171_v19, %v868_v10 }
  0x64   : > { %v1194_v43 = vadd.f32 %v1178_v60, %v1158_v51  ;;  %v1038_v1 = vsel %vm1013_vm4, %v1035_v41, %v1037_v3  ;;  %v1138_v30 = vmul.f32 %v1842_v22, %v1103_v0  ;;  %v905_v49 = vmul.f32 %v2145_v13, %v2469_v39 }
  0x65   : > { %v1251_v4 = vadd.f32 %v2343_v15, %v1229_v61  ;;  %v994_v5 = vadd.f32 %v2268_v36, %v974_v9  ;;  %v1074_v40 = vmul.f32 %v1835_v42, %v1038_v1  ;;  %v872_v6 = vadd.f32 %v2203_v37, %v870_v12 }
  0x66   : > { %v1214_v8 = vmul.f32 %v2182_v28, %v1138_v30  ;;  %v876_v58 = vstv %s2547_s17  ;;  %v682_v44 = vand.u32 15, %v666_v53  ;;  %v907_v22 = vmul.f32 %v2155_v16, %v866_v33 }
  0x67   : > { %1910 = vmatprep.mubr.msk.f32.mxu1 %vm1265_vm8, %v1251_v4  ;;  %v1104_v20 = vrot.slane %v994_v5, 1  ;;  %v1159_v57 = vmul.f32 %v2159_v18, %v1074_v40  ;;  %v874_v26 = vmax.f32 %v872_v6, 0.0  ;;  %v667_v35 = vadd.s32 112, %v2117_v2 }
  0x68   : > { %v1230_v7 = vadd.f32 %v1214_v8, %v1194_v43  ;;  %v909_v32 = vadd.f32 %v907_v22, %v905_v49  ;;  %v1039_v25 = vrot.slane %v994_v5, 7  ;;  %v871_v54 = vmul.f32 %v2171_v19, %v869_v29 }
  0x69   : > { %v1105_v59 = vsel %vm1078_vm5, %v1102_v21, %v1104_v20  ;;  %v1195_v63 = vadd.f32 %v1179_v62, %v1159_v57  ;;  %v877_v11 = vmul.f32 %v876_v58, %v874_v26  ;;  %v683_v46 = vand.u32 15, %v667_v35 }
  0x6a   : > { %v1215_v39 = vmul.f32 %v2182_v28, %v1105_v59  ;;  %v1252_v38 = vadd.f32 %v2343_v15, %v1230_v7  ;;  %vm746_vm0 = vcmp.lt.s32.totalorder %v682_v44, 15  ;;  %v873_v60 = vadd.f32 %v2203_v37, %v871_v54  ;;  %v2609_v7 = vld [vmem:[%s2733_s10] ss:$0 sm:$0xff] }
  0x6b   : > { %v911_v33 = vmul.f32 %v2157_v17, %v877_v11  ;;  %v906_v42 = vmul.f32 %v2145_v13, %v2491_v56  ;;  %v908_v55 = vmul.f32 %v2155_v16, %v867_v34  ;;  %v1040_v50 = vsel %vm1013_vm4, %v1037_v3, %v1039_v25 }
  0x6c   : > { %v1231_v41 = vadd.f32 %v1215_v39, %v1195_v63  ;;  %1911 = vmatmul.mubr.msk.f32.gmra.mrb[2].mxu1 %vm1265_vm8, %v1252_v38  ;;  %v668_v19 = vadd.s32 120, %v2117_v2  ;;  %vm699_vm1 = vcmp.gt.s32.totalorder %v683_v46, 0  ;;  %v875_v10 = vmax.f32 %v873_v60, 0.0 }
  0x6d   : > { %v913_v45 = vadd.f32 %v911_v33, %v909_v32  ;;  %v1843_v47 = vsel %vm746_vm0, 1.0, %v2002_v14  ;;  %v1160_v48 = vmul.f32 %v2159_v18, %v1040_v50  ;;  %v1180_v13 = vmul.f32 %v2180_v27, %v994_v5 }
  0x6e   : > { %v1253_v31 = vadd.f32 %v2343_v15, %v1231_v41  ;;  %v878_v16 = vmul.f32 %v876_v58, %v875_v10  ;;  %v910_v56 = vadd.f32 %v908_v55, %v906_v42  ;;  %v1836_v52 = vsel %vm699_vm1, 1.0, %v2002_v14 }
  0x6f   : > { %v995_v37 = vadd.f32 %v2268_v36, %v913_v45  ;;  %v684_v23 = vand.u32 15, %v668_v19  ;;  %v1196_v61 = vadd.f32 %v1180_v13, %v1160_v48 }
  0x70   : > { %1913 = vmatprep.mubr.msk.f32.mxu1 %vm1265_vm8, %v1253_v31  ;;  %v912_v2 = vmul.f32 %v2157_v17, %v878_v16 }
  0x71   : > { %v1106_v34 = vrot.slane %v995_v37, 1  ;;  %v1041_v24 = vrot.slane %v995_v37, 7  ;;  %v1181_v53 = vmul.f32 %v2180_v27, %v995_v37  ;;  %vm748_vm2 = vcmp.lt.s32.totalorder %v684_v23, 15 }
  0x72   : > { %v914_v9 = vadd.f32 %v912_v2, %v910_v56  ;;  %v1844_v17 = vsel %vm748_vm2, 1.0, %v2002_v14 }
  0x73   : > { %v1107_v21 = vsel %vm1078_vm5, %v1104_v20, %v1106_v34  ;;  %v1042_v51 = vsel %vm1013_vm4, %v1039_v25, %v1041_v24 }
  0x74   : > { %v1140_v3 = vmul.f32 %v1843_v47, %v1107_v21  ;;  %v1076_v62 = vmul.f32 %v1836_v52, %v1042_v51  ;;  %v996_v43 = vadd.f32 %v2268_v36, %v914_v9 }
  0x76   : > { %v1216_v0 = vmul.f32 %v2182_v28, %v1140_v3  ;;  %v1161_v1 = vmul.f32 %v2159_v18, %v1076_v62  ;;  %v1108_v4 = vrot.slane %v996_v43, 1  ;;  %v1043_v30 = vrot.slane %v996_v43, 7 }
  0x77   : > { %v1182_v40 = vmul.f32 %v2180_v27, %v996_v43 }
  0x78   : > { %v1232_v12 = vadd.f32 %v1216_v0, %v1196_v61  ;;  %v1197_v5 = vadd.f32 %v1181_v53, %v1161_v1  ;;  %v1109_v49 = vsel %vm1078_vm5, %v1106_v34, %v1108_v4  ;;  %v1044_v8 = vsel %vm1013_vm4, %v1041_v24, %v1043_v30 }
  0x79   : > { %v1126_v20 = vsel %vm1078_vm5, %v1108_v4, 0.0  ;;  %v1217_v36 = vmul.f32 %v2182_v28, %v1109_v49  ;;  %v1162_v58 = vmul.f32 %v2159_v18, %v1044_v8 }
  0x7a   : > { %v1254_v6 = vadd.f32 %v2343_v15, %v1232_v12  ;;  %v1142_v57 = vmul.f32 %v1844_v17, %v1126_v20 }
  0x7b   : > { %v1233_v14 = vadd.f32 %v1217_v36, %v1197_v5  ;;  %v1198_v44 = vadd.f32 %v1182_v40, %v1162_v58 }
  0x7c   : > { %1914 = vmatmul.mubr.msk.f32.gmra.mrb[4].mxu1 %vm1265_vm8, %v1254_v6  ;;  %v1218_v27 = vmul.f32 %v2182_v28, %v1142_v57 }
  0x7d   : > { %v1255_v26 = vadd.f32 %v2343_v15, %v1233_v14 }
  0x7e   : > { %v1234_v22 = vadd.f32 %v1218_v27, %v1198_v44 }
  0x7f   : > { %1916 = vmatprep.mubr.msk.f32.mxu1 %vm1265_vm8, %v1255_v26 }
  0x80   : > { %v1256_v29 = vadd.f32 %v2343_v15, %v1234_v22 }
  0x82   : > { %1917 = vmatmul.mubr.msk.f32.gmra.mrb[6].mxu1 %vm1265_vm8, %v1256_v29 }
 0x111   : > { %v1897_v18 = vpop.f32.mrb[0].mxu0 }
 0x112   : > { %v1386_v28 = vadd.f32 %v1897_v18, %v2609_v7  ;;  %v1380_v59 = vpop.f32.mrb[1].mxu0 }
 0x113   : > { %v1381_v15 = vadd.f32 %v2609_v7, %v1380_v59 }
 0x114   : > { %1460 = vst.msk [vmem:[%s2616_s21 + $0x8] sm:$0xff] %vm1265_vm8, %v1386_v28  ;;  %v1476_v63 = vsel %vm1265_vm8, %v1386_v28, 0.0  ;;  %v1515_v35 = vmul.f32 %v1386_v28, %v1386_v28 }
 0x115   : > { %1459 = vst.msk [vmem:[%s2616_s21] sm:$0xff] %vm1265_vm8, %v1381_v15  ;;  %v1475_v39 = vsel %vm1265_vm8, %v1381_v15, 0.0  ;;  %v1514_v11 = vmul.f32 %v1381_v15, %v1381_v15  ;;  %v1900_v32 = vpop.f32.mrb[2].mxu0 }
 0x116   : > { %v1531_v25 = vsel %vm1265_vm8, %v1515_v35, 0.0  ;;  %v1477_v38 = vadd.f32 %v1476_v63, %v1475_v39  ;;  %v1396_v46 = vadd.f32 %v1900_v32, %v2609_v7  ;;  %v1390_v54 = vpop.f32.mrb[3].mxu0 }
 0x117   : > { %v1530_v41 = vsel %vm1265_vm8, %v1514_v11, 0.0  ;;  %v1391_v33 = vadd.f32 %v2609_v7, %v1390_v54 }
 0x118   : > { %v1532_v60 = vadd.f32 %v1531_v25, %v1530_v41  ;;  %1462 = vst.msk [vmem:[%s2616_s21 + $0x18] sm:$0xff] %vm1265_vm8, %v1396_v46  ;;  %v1517_v42 = vmul.f32 %v1396_v46, %v1396_v46  ;;  %v1480_v50 = vsel %vm1265_vm8, %v1396_v46, 0.0 }
 0x119   : > { %1461 = vst.msk [vmem:[%s2616_s21 + $0x10] sm:$0xff] %vm1265_vm8, %v1391_v33  ;;  %v1478_v55 = vsel %vm1265_vm8, %v1391_v33, 0.0  ;;  %v1516_v31 = vmul.f32 %v1391_v33, %v1391_v33 }
 0x11a   : > { %v1479_v45 = vadd.f32 %v1478_v55, %v1477_v38  ;;  %v1535_v37 = vsel %vm1265_vm8, %v1517_v42, 0.0 }
 0x11b   : > { %v1533_v19 = vsel %vm1265_vm8, %v1516_v31, 0.0 }
 0x11c   : > { %v1534_v10 = vadd.f32 %v1533_v19, %v1532_v60  ;;  %v1481_v47 = vadd.f32 %v1480_v50, %v1479_v45 }
 0x11e   : > { %v1536_v48 = vadd.f32 %v1535_v37, %v1534_v10 }
 0x120   : > { %v1903_v13 = vpop.f32.mrb[4].mxu0 }
 0x121   : > { %v1406_v16 = vadd.f32 %v1903_v13, %v2609_v7  ;;  %v1400_v56 = vpop.f32.mrb[5].mxu0 }
 0x122   : > { %v1401_v34 = vadd.f32 %v2609_v7, %v1400_v56 }
 0x123   : > { %1464 = vst.msk [vmem:[%s2616_s21 + $0x28] sm:$0xff] %vm1265_vm8, %v1406_v16  ;;  %v1519_v52 = vmul.f32 %v1406_v16, %v1406_v16  ;;  %v1484_v21 = vsel %vm1265_vm8, %v1406_v16, 0.0 }
 0x124   : > { %1463 = vst.msk [vmem:[%s2616_s21 + $0x20] sm:$0xff] %vm1265_vm8, %v1401_v34  ;;  %v1482_v24 = vsel %vm1265_vm8, %v1401_v34, 0.0  ;;  %v1518_v23 = vmul.f32 %v1401_v34, %v1401_v34 }
 0x125   : > { %v1483_v2 = vadd.f32 %v1482_v24, %v1481_v47  ;;  %v1539_v62 = vsel %vm1265_vm8, %v1519_v52, 0.0 }
 0x126   : > { %v1537_v51 = vsel %vm1265_vm8, %v1518_v23, 0.0 }
 0x127   : > { %v1538_v3 = vadd.f32 %v1537_v51, %v1536_v48  ;;  %v1906_v61 = vpop.f32.mrb[6].mxu0  ;;  %v1485_v9 = vadd.f32 %v1484_v21, %v1483_v2 }
 0x128   : > { %v1416_v53 = vadd.f32 %v1906_v61, %v2609_v7  ;;  %v1410_v0 = vpop.f32.mrb[7].mxu0 }
 0x129   : > { %v1411_v43 = vadd.f32 %v2609_v7, %v1410_v0  ;;  %v1540_v1 = vadd.f32 %v1539_v62, %v1538_v3 }
 0x12a   : > { %1466 = vst.msk [vmem:[%s2616_s21 + $0x38] sm:$0xff] %vm1265_vm8, %v1416_v53  ;;  %v1521_v12 = vmul.f32 %v1416_v53, %v1416_v53  ;;  %v1488_v5 = vsel %vm1265_vm8, %v1416_v53, 0.0 }
 0x12b   : > { %1465 = vst.msk [vmem:[%s2616_s21 + $0x30] sm:$0xff] %vm1265_vm8, %v1411_v43  ;;  %v1486_v4 = vsel %vm1265_vm8, %v1411_v43, 0.0  ;;  %v1520_v17 = vmul.f32 %v1411_v43, %v1411_v43 }
 0x12c   : > { %v1487_v30 = vadd.f32 %v1486_v4, %v1485_v9  ;;  %v1543_v8 = vsel %vm1265_vm8, %v1521_v12, 0.0 }
 0x12d   : > { %v1541_v40 = vsel %vm1265_vm8, %v1520_v17, 0.0 }
 0x12e   : > { %v1542_v6 = vadd.f32 %v1541_v40, %v1540_v1  ;;  %v1489_v49 = vadd.f32 %v1488_v5, %v1487_v30 }
 0x130   : > { %v1544_v20 = vadd.f32 %v1543_v8, %v1542_v6 }
 0x136   : > { %v1909_v36 = vpop.f32.mrb[0].mxu1 }
 0x137   : > { %v1426_v57 = vadd.f32 %v1909_v36, %v2609_v7  ;;  %v1420_v58 = vpop.f32.mrb[1].mxu1 }
 0x138   : > { %v1421_v14 = vadd.f32 %v2609_v7, %v1420_v58 }
 0x139   : > { %1468 = vst.msk [vmem:[%s2616_s21 + $0x48] sm:$0xff] %vm1265_vm8, %v1426_v57  ;;  %v1523_v44 = vmul.f32 %v1426_v57, %v1426_v57  ;;  %v1492_v29 = vsel %vm1265_vm8, %v1426_v57, 0.0 }
 0x13a   : > { %1467 = vst.msk [vmem:[%s2616_s21 + $0x40] sm:$0xff] %vm1265_vm8, %v1421_v14  ;;  %v1490_v27 = vsel %vm1265_vm8, %v1421_v14, 0.0  ;;  %v1522_v26 = vmul.f32 %v1421_v14, %v1421_v14 }
 0x13b   : > { %v1491_v22 = vadd.f32 %v1490_v27, %v1489_v49  ;;  %v1547_v15 = vsel %vm1265_vm8, %v1523_v44, 0.0 }
 0x13c   : > { %v1545_v18 = vsel %vm1265_vm8, %v1522_v26, 0.0 }
 0x13d   : > { %v1546_v28 = vadd.f32 %v1545_v18, %v1544_v20  ;;  %v1493_v59 = vadd.f32 %v1492_v29, %v1491_v22 }
 0x13f   : > { %v1912_v63 = vpop.f32.mrb[2].mxu1  ;;  %v1548_v35 = vadd.f32 %v1547_v15, %v1546_v28 }
 0x140   : > { %v1436_v39 = vadd.f32 %v1912_v63, %v2609_v7  ;;  %v1430_v11 = vpop.f32.mrb[3].mxu1 }
 0x141   : > { %v1431_v32 = vadd.f32 %v2609_v7, %v1430_v11 }
 0x142   : > { %1470 = vst.msk [vmem:[%s2616_s21 + $0x58] sm:$0xff] %vm1265_vm8, %v1436_v39  ;;  %v1525_v25 = vmul.f32 %v1436_v39, %v1436_v39  ;;  %v1496_v41 = vsel %vm1265_vm8, %v1436_v39, 0.0 }
 0x143   : > { %1469 = vst.msk [vmem:[%s2616_s21 + $0x50] sm:$0xff] %vm1265_vm8, %v1431_v32  ;;  %v1494_v38 = vsel %vm1265_vm8, %v1431_v32, 0.0  ;;  %v1524_v46 = vmul.f32 %v1431_v32, %v1431_v32 }
 0x144   : > { %v1495_v54 = vadd.f32 %v1494_v38, %v1493_v59  ;;  %v1551_v55 = vsel %vm1265_vm8, %v1525_v25, 0.0 }
 0x145   : > { %v1549_v33 = vsel %vm1265_vm8, %v1524_v46, 0.0 }
 0x146   : > { %v1550_v60 = vadd.f32 %v1549_v33, %v1548_v35  ;;  %v1497_v42 = vadd.f32 %v1496_v41, %v1495_v54 }
 0x148   : > { %v1552_v31 = vadd.f32 %v1551_v55, %v1550_v60 }
 0x14f   : > { %v1915_v45 = vpop.f32.mrb[4].mxu1 }
 0x150   : > { %v1446_v50 = vadd.f32 %v1915_v45, %v2609_v7  ;;  %v1440_v19 = vpop.f32.mrb[5].mxu1 }
 0x151   : > { %v1441_v10 = vadd.f32 %v2609_v7, %v1440_v19 }
 0x152   : > { %1472 = vst.msk [vmem:[%s2616_s21 + $0x68] sm:$0xff] %vm1265_vm8, %v1446_v50  ;;  %v1527_v47 = vmul.f32 %v1446_v50, %v1446_v50  ;;  %v1500_v16 = vsel %vm1265_vm8, %v1446_v50, 0.0 }
 0x153   : > { %1471 = vst.msk [vmem:[%s2616_s21 + $0x60] sm:$0xff] %vm1265_vm8, %v1441_v10  ;;  %v1498_v37 = vsel %vm1265_vm8, %v1441_v10, 0.0  ;;  %v1526_v48 = vmul.f32 %v1441_v10, %v1441_v10 }
 0x154   : > { %v1499_v13 = vadd.f32 %v1498_v37, %v1497_v42  ;;  %v1555_v23 = vsel %vm1265_vm8, %v1527_v47, 0.0 }
 0x155   : > { %v1553_v56 = vsel %vm1265_vm8, %v1526_v48, 0.0  ;;  %v1918_v52 = vpop.f32.mrb[6].mxu1 }
 0x156   : > { %v1554_v34 = vadd.f32 %v1553_v56, %v1552_v31  ;;  %v1501_v24 = vadd.f32 %v1500_v16, %v1499_v13  ;;  %v1456_v2 = vadd.f32 %v1918_v52, %v2609_v7  ;;  %v1450_v21 = vpop.f32.mrb[7].mxu1 }
 0x157   : > { %v1451_v51 = vadd.f32 %v2609_v7, %v1450_v21 }
 0x158   : > { %v1556_v3 = vadd.f32 %v1555_v23, %v1554_v34  ;;  %1474 = vst.msk [vmem:[%s2616_s21 + $0x78] sm:$0xff] %vm1265_vm8, %v1456_v2  ;;  %v1529_v61 = vmul.f32 %v1456_v2, %v1456_v2  ;;  %v1504_v0 = vsel %vm1265_vm8, %v1456_v2, 0.0 }
 0x159   : > { %1473 = vst.msk [vmem:[%s2616_s21 + $0x70] sm:$0xff] %vm1265_vm8, %v1451_v51  ;;  %v1502_v9 = vsel %vm1265_vm8, %v1451_v51, 0.0  ;;  %v1528_v62 = vmul.f32 %v1451_v51, %v1451_v51 }
 0x15a   : > { %v1503_v53 = vadd.f32 %v1502_v9, %v1501_v24  ;;  %v1559_v4 = vsel %vm1265_vm8, %v1529_v61, 0.0 }
 0x15b   : > { %v1557_v43 = vsel %vm1265_vm8, %v1528_v62, 0.0 }
 0x15c   : > { %v1505_v1 = vadd.f32 %v1504_v0, %v1503_v53  ;;  %v1558_v12 = vadd.f32 %v1557_v43, %v1556_v3 }
 0x15e   : > { %v1506_v7 = vrot.slane %v1505_v1, 4  ;;  %v1560_v17 = vadd.f32 %v1559_v4, %v1558_v12 }
 0x160   : > { %v1507_v30 = vadd.f32 %v1506_v7, %v1505_v1  ;;  %v1561_v5 = vrot.slane %v1560_v17, 4 }
 0x162   : > { %v1508_v40 = vrot.slane %v1507_v30, 2  ;;  %v1562_v6 = vadd.f32 %v1561_v5, %v1560_v17 }
 0x164   : > { %v1509_v49 = vadd.f32 %v1508_v40, %v1507_v30  ;;  %v1563_v8 = vrot.slane %v1562_v6, 2 }
 0x166   : > { %v1510_v20 = vrot.slane %v1509_v49, 1  ;;  %v1564_v36 = vadd.f32 %v1563_v8, %v1562_v6 }
 0x168   : > { %v1511_v57 = vadd.f32 %v1510_v20, %v1509_v49  ;;  %v1565_v58 = vrot.slane %v1564_v36, 1 }
 0x16a   : > { %1513 = vst.msk [vmem:[%s638_s15] sm:$0x1] %vm1512_vm3, %v1511_v57  ;;  %v1566_v14 = vadd.f32 %v1565_v58, %v1564_v36 }
 0x16c   : > { %1567 = vst.msk [vmem:[%s645_s22] sm:$0x1] %vm1512_vm3, %v1566_v14 }
 0x16d PF: > { %s24_s29 = sadd.s32 1, %s2000_s29   ;;  %s2744_s25 = smov %s1992_s27 }
 0x16e   : > { %p21_p12 = scmp.ge.s32.totalorder %s24_s29, 6   ;;  %s2745_s26 = smov %s1996_s28 }
 0x16f   : > { %s2746_s27 = smov %s2749_s30  ;;  %s2747_s28 = smov %s2753_s14 }
 0x170   :  { %23 = sbr.rel (!%p21_p12) target bundleno = 3 (0x3), region = 124 }

// kernel: light_decoder_block.2
= control target key start
LH: loop header
LB: loop body
LE: loop exit
PB: predicated region body
PF: predicated region fallthrough
CT: control target
= control target key end

     0   :  { %s2875_s27 = smov 0   ;;  %s2877_s28 = smov 0   ;;  %s4226_s0 = inlined_call_operand.vmem [shape: f32[2,8,16,4], index: 0, kind: input, shape index: {}, may-alias: {0,1,2}]   ;;  %s4227_s1 = inlined_call_operand.vmem [shape: f32[2,8,16,4], index: 1, kind: input, shape index: {}, may-alias: {0,1,2}]   ;;  %s4228_s2 = inlined_call_operand.vmem [shape: f32[2,8,16,4], index: 2, kind: input, shape index: {}, may-alias: {0,1,2}]   ;;  %s4229_s3 = inlined_call_operand.vmem [shape: f32[2,16,16,4], index: 3, kind: input, shape index: {}, may-alias: {3,4,5}]   ;;  %s4230_s4 = inlined_call_operand.vmem [shape: f32[2,16,16,4], index: 4, kind: input, shape index: {}, may-alias: {3,4,5}]   ;;  %s4231_s5 = inlined_call_operand.vmem [shape: f32[2,16,16,4], index: 5, kind: input, shape index: {}, may-alias: {3,4,5}]   ;;  %s4232_s6 = inlined_call_operand.vmem [shape: f32[3,4], index: 6, kind: input, shape index: {}]   ;;  %s4233_s7 = inlined_call_operand.vmem [shape: f32[1,4], index: 7, kind: input, shape index: {}]   ;;  %s4234_s8 = inlined_call_operand.vmem [shape: f32[3,4], index: 8, kind: input, shape index: {}]   ;;  %s4235_s9 = inlined_call_operand.vmem [shape: f32[1,4], index: 9, kind: input, shape index: {}]   ;;  %s4236_s10 = inlined_call_operand.vmem [shape: f32[3,4], index: 10, kind: input, shape index: {}]   ;;  %s4237_s11 = inlined_call_operand.vmem [shape: f32[1,4], index: 11, kind: input, shape index: {}]   ;;  %s4238_s12 = inlined_call_operand.vmem [shape: f32[3,4], index: 12, kind: input, shape index: {}]   ;;  %s4239_s13 = inlined_call_operand.vmem [shape: f32[1,4], index: 13, kind: input, shape index: {}]   ;;  %s4240_s14 = inlined_call_operand.vmem [shape: f32[8,8], index: 14, kind: input, shape index: {}]   ;;  %s4241_s15 = inlined_call_operand.vmem [shape: f32[1,8], index: 15, kind: input, shape index: {}]   ;;  %s4242_s16 = inlined_call_operand.vmem [shape: f32[2,16,16,8], index: 16, kind: output, shape index: {0}]   ;;  %s4243_s17 = inlined_call_operand.vmem [shape: f32[2,2,1,8], index: 17, kind: output, shape index: {1}]   ;;  %s4244_s18 = inlined_call_operand.vmem [shape: f32[2,2,1,8], index: 18, kind: output, shape index: {2}]  }
   0x1   :  { %4278 = sst [smem:[#allocation14_spill]] %s4226_s0  ;;  %s2879_s29 = smov 0  }
   0x2   :  { %4279 = sst [smem:[#allocation15_spill]] %s4227_s1  ;;  %s2881_s30 = smov 0  }
   0x3   :  { %4280 = sst [smem:[#allocation16_spill]] %s4228_s2  ;;  %s2883_s0 = smov 0  }
   0x4   :  { %4281 = sst [smem:[#allocation17_spill]] %s4229_s3 }
   0x5   :  { %4282 = sst [smem:[#allocation18_spill]] %s4230_s4 }
   0x6   :  { %4283 = sst [smem:[#allocation19_spill]] %s4232_s6 }
   0x7   :  { %4284 = sst [smem:[#allocation20_spill]] %s4236_s10 }
   0x8   :  { %4285 = sst [smem:[#allocation21_spill]] %s4237_s11 }
   0x9   :  { %4286 = sst [smem:[#allocation22_spill]] %s4238_s12 }
   0xa LB: > { %s38_s19 = sadd.s32 1, %s2768_s29  ;;  %s41_s1 = sadd.s32 1, %s2772_s30  ;;  %s2776_s0 = sphi %s2883_s0, %s29_s0   ;;  %s2772_s30 = sphi %s2881_s30, %s4368_s30   ;;  %s2768_s29 = sphi %s2879_s29, %s4367_s29   ;;  %s2764_s28 = sphi %s2877_s28, %s4366_s28   ;;  %s2760_s27 = sphi %s2875_s27, %s4365_s27  }
   0xb   : > { %p39_p0 = scmp.ge.s32.totalorder %s38_s19, 2  ;;  %p2547_p1 = scmp.ge.s32.totalorder %s2776_s0, 1 }
   0xc   : > { %p689_p2 = scmp.lt.s32.totalorder %s2776_s0, 5 }
   0xd   : > { %s4370_s19 = smov (%p39_p0, %s38_s19), 0  ;;  %s4372_s1 = smov (!%p39_p0, %s41_s1), %s2772_s30 }
   0xe   : > { %4287 = sst [smem:[#allocation2_spill]] %s4370_s19  ;;  %p690_p3 = pnand %p2547_p1, %p689_p2 }
   0xf   : > { %p43_p4 = scmp.ge.s32.totalorder %s4372_s1, 2 }
  0x10   : > { %693 = sbr.rel (%p690_p3) target bundleno = 510 (0x1fe), region = 84 }
  0x11   : > { %s4374_s1 = smov (%p43_p4, %s4372_s1), 0 }
  0x12   : > { %4288 = sst [smem:[#allocation3_spill]] %s4374_s1 }
  0x17   : > { %p830_p5 = scmp.lt.s32.totalorder %s2764_s28, 1  ;;  %s2908_s20 = sshll.u32 %s2760_s27, 3  ;;  %v956_v0 = vlaneseq  ;;  %v4248_v16 = vmov 0.0   ;;  %vm1274_vm2 = vcmask 1046528   ;;  %vm1209_vm3 = vcmask 1040384  }
  0x18   : > { %p877_p6 = scmp.lt.s32.totalorder %s2908_s20, 15  ;;  %s2912_s21 = sadd.s32 4294967295, %s2908_s20 }
  0x19   : > { %s4376_s28 = smov (!%p830_p5, %s2764_s28), 1  ;;  %v2916_v1 = vshrl.u32 %v956_v0, 7  ;;  %s4289_s6 = sld [smem:[#allocation19_spill]] }
  0x1a   : > { %s878_s22 = scalar_select %p877_p6, %s2908_s20, 15 }
  0x1b   : > { %s2923_s24 = sshll.u32 %s4376_s28, 5  ;;  %p887_p7 = scmp.gt.s32.totalorder %s2912_s21, 0  ;;  %v973_v3 = vand.u32 15, %v2916_v1  ;;  %v2928_v4 = vsub.s32 1, %v2916_v1  ;;  %v2931_v5 = vsub.s32 2, %v2916_v1  ;;  %v2935_v6 = vsub.s32 0, %v2916_v1 }
  0x1c   : > { %s2570_s25 = sshll.u32 %s878_s22, 1  ;;  %p2575_p8 = scmp.lt.s32.totalorder %s2912_s21, 15  ;;  %v959_v8 = vadd.s32 16, %v2916_v1  ;;  %v2949_v10 = vadd.s32 8, %v2916_v1  ;;  %v960_v47 = vadd.s32 24, %v2916_v1  ;;  %v961_v55 = vadd.s32 32, %v2916_v1 }
  0x1d   : > { %s4290_s10 = sld [smem:[#allocation20_spill]]  ;;  %s2942_s23 = sadd.s32 %s2923_s24, %s2570_s25  ;;  %vm989_vm0 = vcmp.gt.s32.totalorder %v973_v3, 0 }
  0x1e   : > { %s4291_s12 = sld [smem:[#allocation22_spill]]  ;;  %s4245_s19 = sshll.u32 %s2942_s23, 3  ;;  %v2982_v17 = vsel %vm989_vm0, 1.0, %v4248_v16  ;;  %v975_v23 = vand.u32 15, %v959_v8  ;;  %v974_v30 = vand.u32 15, %v2949_v10  ;;  %v976_v54 = vand.u32 15, %v960_v47 }
  0x1f   : > { %v1095_v2 = vld [vmem:[%s4289_s6] sm:$0x7]  ;;  %s2650_s6 = sadd.s32 8, %s2908_s20  ;;  %s4293_s3 = sld [smem:[#allocation17_spill]]  ;;  %v977_v3 = vand.u32 15, %v961_v55 }
  0x20   : > { %p2952_p9 = scmp.lt.s32.totalorder %s2650_s6, 15  ;;  %v2957_v11 = vrot.slane %v1095_v2, %v2935_v6  ;;  %v2967_v12 = vrot.slane %v1095_v2, %v2928_v4  ;;  %v2970_v13 = vrot.slane %v1095_v2, %v2931_v5  ;;  %vm3013_vm1 = vcmp.gt.s32.totalorder %v975_v23, 0  ;;  %p944_p10 = scmp.gt.s32.totalorder %s2760_s27, 0 }
  0x21   : > { %s888_s1 = scalar_select %p887_p7, %s2912_s21, 0  ;;  %v3046_v44 = vsel %vm3013_vm1, 1.0, %v4248_v16  ;;  %vm3068_vm4 = vcmp.lt.s32.totalorder %v974_v30, 15  ;;  %vm1040_vm5 = vcmp.lt.s32.totalorder %v976_v54, 15  ;;  %vm993_vm6 = vcmp.gt.s32.totalorder %v977_v3, 0 }
  0x22   : > { %s4378_s6 = smov (!%p2952_p9, %s2650_s6), 15  ;;  %s4296_s4 = sld [smem:[#allocation18_spill]]  ;;  %v3087_v8 = vsel %vm1040_vm5, 1.0, %v4248_v16 }
  0x23   : > { %v1477_v7 = vld [vmem:[%s4290_s10] sm:$0x7]  ;;  %s4380_s1 = smov (!%p2575_p8, %s888_s1), 15  ;;  %s4382_s6 = smov (!%p2952_p9, %s4378_s6), 15 }
  0x24   : > { %v1479_v9 = vld [vmem:[%s4291_s12] sm:$0x7]  ;;  %v2973_v14 = vrot.slane %v1477_v7, %v2928_v4  ;;  %v2976_v15 = vrot.slane %v1477_v7, %v2931_v5  ;;  %v2988_v21 = vrot.slane %v1477_v7, %v2935_v6  ;;  %s2580_s21 = sshll.u32 %s4380_s1, 1  ;;  %s3041_s26 = sshll.u32 %s4382_s6, 1 }
  0x25   : > { %s2964_s2 = scalar_lea.vmem %s4293_s3, %s4245_s19  ;;  %v2991_v22 = vrot.slane %v1479_v9, %v2935_v6  ;;  %v3000_v26 = vrot.slane %v1479_v9, %v2928_v4  ;;  %v3003_v27 = vrot.slane %v1479_v9, %v2931_v5  ;;  %s895_s22 = sadd.s32 %s2580_s21, %s2923_s24 }
  0x26   : > { %v1457_v18 = vld [vmem:[%s2964_s2] sm:$0xff]  ;;  %v1458_v19 = vld [vmem:[%s2964_s2 + $0x8] sm:$0xff]  ;;  %v1459_v20 = vld [vmem:[%s2964_s2 + $0x10] sm:$0xff]  ;;  %s2582_s25 = sshll.u32 %s895_s22, 3  ;;  %s4297_s11 = sld [smem:[#allocation21_spill]] }
  0x27   : > { %v1460_v24 = vld [vmem:[%s2964_s2 + $0x18] sm:$0xff]  ;;  %v2997_v25 = vmul.f32 %v2973_v14, %v1457_v18  ;;  %v1461_v28 = vld [vmem:[%s2964_s2 + $0x20] sm:$0xff]  ;;  %v3007_v29 = vld [vmem:[%s2964_s2 + $0x28] sm:$0xff]  ;;  %v1515_v31 = vmul.f32 %v2988_v21, %v1459_v20  ;;  %v1513_v33 = vmul.f32 %v2988_v21, %v1457_v18  ;;  %v1514_v34 = vmul.f32 %v2988_v21, %v1458_v19  ;;  %s3082_s19 = sshll.u32 %s2760_s27, 2  ;;  %s3104_s1 = sshll.u32 %s4376_s28, 4 }
  0x28   : > { %v3022_v35 = vmul.f32 %v2973_v14, %v1458_v19  ;;  %v3025_v36 = vmul.f32 %v2976_v15, %v1459_v20  ;;  %v3028_v37 = vld [vmem:[%s2964_s2 + $0x30] sm:$0xff]  ;;  %v1525_v38 = vmul.f32 %v2973_v14, %v1459_v20  ;;  %v1526_v39 = vmul.f32 %v2973_v14, %v1460_v24  ;;  %s897_s21 = scalar_lea.vmem %s4296_s4, %s2582_s25  ;;  %v3061_v56 = vld [vmem:[%s2964_s2 + $0x38] sm:$0xff]  ;;  %p832_p11 = scmp.lt.s32.totalorder %s3082_s19, 7  ;;  %v3152_v54 = vld [vmem:[%s2964_s2 + $0x40] sm:$0xff] }
  0x29   : > { %v3034_v40 = vmul.f32 %v2976_v15, %v1460_v24  ;;  %v1527_v41 = vmul.f32 %v2973_v14, %v1461_v28  ;;  %v1549_v42 = vmul.f32 %v2976_v15, %v1461_v28  ;;  %v1550_v43 = vmul.f32 %v2976_v15, %v3007_v29  ;;  %s945_s25 = scalar_select %p944_p10, 1.0, 0.0  ;;  %v1453_v62 = vld [vmem:[%s897_s21] sm:$0xff]  ;;  %v1454_v63 = vld [vmem:[%s897_s21 + $0x8] sm:$0xff] }
  0x2a   : > { %v1537_v45 = vadd.f32 %v1525_v38, %v1513_v33  ;;  %v1538_v46 = vadd.f32 %v1526_v39, %v1514_v34  ;;  %v1517_v48 = vmul.f32 %v2988_v21, %v1461_v28  ;;  %v1529_v49 = vmul.f32 %v2973_v14, %v3028_v37  ;;  %s3098_s6 = sadd.s32 4294967295, %s3082_s19  ;;  %s4300_s3 = sld [smem:[#allocation14_spill]] }
  0x2b   : > { %v1539_v50 = vadd.f32 %v1527_v41, %v1515_v31  ;;  %v1551_v51 = vmul.f32 %v2976_v15, %v3028_v37  ;;  %v1516_v60 = vmul.f32 %v2988_v21, %v1460_v24  ;;  %v1528_v61 = vmul.f32 %v2973_v14, %v3007_v29  ;;  %p842_p12 = scmp.gt.s32.totalorder %s3098_s6, 0  ;;  %p2554_p13 = scmp.lt.s32.totalorder %s3098_s6, 7 }
  0x2c   : > { %v1561_v52 = vadd.f32 %v1549_v42, %v1537_v45  ;;  %v1562_v53 = vadd.f32 %v1550_v43, %v1538_v46  ;;  %v3066_v57 = vld [vmem:[%s4297_s11] ss:$0 sm:$0xff]  ;;  %v3084_v7 = vadd.f32 %v1529_v49, %v1517_v48  ;;  %v1552_v10 = vmul.f32 %v2976_v15, %v3061_v56  ;;  %s833_s21 = scalar_select %p832_p11, %s3082_s19, 7 }
  0x2d   : > { %v1563_v59 = vadd.f32 %v1551_v51, %v1539_v50  ;;  %v3094_v18 = vstv %s945_s25  ;;  %v1540_v23 = vadd.f32 %v1528_v61, %v1516_v60  ;;  %v3114_v34 = vadd.s32 40, %v2916_v1  ;;  %s843_s22 = scalar_select %p842_p12, %s3098_s6, 0 }
  0x2e   : > { %v3078_v0 = vadd.f32 %v3066_v57, %v1561_v52  ;;  %v1582_v2 = vadd.f32 %v3066_v57, %v1562_v53  ;;  %v1455_v24 = vmul.f32 %v1453_v62, %v3094_v18  ;;  %v1456_v28 = vmul.f32 %v1454_v63, %v3094_v18  ;;  %s2549_s25 = sshll.u32 %s833_s21, 1  ;;  %s4246_s10 = sadd.s32 4, %s3082_s19 }
  0x2f   : > { %v3090_v9 = vadd.f32 %v3066_v57, %v1563_v59  ;;  %v3129_v46 = vsel %vm993_vm6, 1.0, %v4248_v16  ;;  %v1564_v47 = vadd.f32 %v1552_v10, %v1540_v23  ;;  %s836_s20 = sadd.s32 %s3104_s1, %s2549_s25  ;;  %s4384_s22 = smov (!%p2554_p13, %s843_s22), 7  ;;  %v978_v3 = vand.u32 15, %v3114_v34 }
  0x30   : > { %v1678_v19 = vrot.slane %v3078_v0, 1  ;;  %v1680_v20 = vrot.slane %v1582_v2, 1  ;;  %v1614_v30 = vrot.slane %v3078_v0, 7  ;;  %v1616_v31 = vrot.slane %v1582_v2, 7  ;;  %s2551_s21 = sshll.u32 %s836_s20, 3  ;;  %p3201_p0 = scmp.lt.s32.totalorder %s4246_s10, 7 }
  0x31   : > { %v4250_v33 = vrot.slane %v3090_v9, 1  ;;  %v1485_v38 = vmul.f32 %v2988_v21, %v1455_v24  ;;  %v1486_v39 = vmul.f32 %v2988_v21, %v1456_v28  ;;  %v1766_v42 = vmul.f32 %v3000_v26, %v1582_v2  ;;  %s3159_s4 = scalar_lea.vmem %s4300_s3, %s2551_s21  ;;  %s2559_s3 = sshll.u32 %s4384_s22, 1 }
  0x32   : > { %v1681_v32 = vsel %vm1274_vm2, %v1678_v19, %v1680_v20  ;;  %v1617_v41 = vsel %vm1209_vm3, %v1614_v30, %v1616_v31  ;;  %v4247_v51 = vrot.slane %v3090_v9, 7  ;;  %v3138_v52 = vmul.f32 %v3000_v26, %v3078_v0  ;;  %v3172_v61 = vld [vmem:[%s3159_s4 + $0x10] sm:$0xff]  ;;  %s850_s22 = sadd.s32 %s2559_s3, %s3104_s1  ;;  %s4302_s11 = sld [smem:[#allocation15_spill]] }
  0x33   : > { %v1683_v43 = vsel %vm1274_vm2, %v1680_v20, %v4250_v33  ;;  %v1746_v45 = vmul.f32 %v2991_v22, %v1617_v41  ;;  %v1493_v48 = vadd.f32 %v2997_v25, %v1485_v38  ;;  %v1494_v49 = vadd.f32 %v3022_v35, %v1486_v39  ;;  %s2561_s21 = sshll.u32 %s850_s22, 3  ;;  %s4303_s10 = sadd.s32 4, %s3082_s19 }
  0x34   : > { %v1726_v50 = vmul.f32 %v3087_v8, %v1683_v43  ;;  %v3141_v53 = vmul.f32 %v3003_v27, %v1681_v32  ;;  %v3146_v25 = vsel %vm3068_vm4, 1.0, %v4248_v16  ;;  %v3149_v35 = vadd.f32 %v3066_v57, %v1564_v47  ;;  %s4386_s10 = smov (!%p3201_p0, %s4303_s10), 7  ;;  %s2779_s20 = smov 4  }
  0x35   : > { %v1501_v55 = vadd.f32 %v3025_v36, %v1493_v48  ;;  %v1502_v59 = vadd.f32 %v3034_v40, %v1494_v49  ;;  %v3161_v58 = vadd.f32 %v1766_v42, %v1746_v45  ;;  %v1619_v60 = vsel %vm1209_vm3, %v1616_v31, %v4247_v51  ;;  %v948_v36 = vld [vmem:[%s3159_s4] sm:$0xff]  ;;  %v949_v40 = vld [vmem:[%s3159_s4 + $0x8] sm:$0xff]  ;;  %s4388_s10 = smov (!%p3201_p0, %s4386_s10), 7  ;;  %p932_p1 = scmp.lt.s32.totalorder %s2760_s27, 1 }
  0x36   : > { %v1802_v62 = vmul.f32 %v3003_v27, %v1726_v50  ;;  %v3176_v63 = vmul.f32 %v3129_v46, %v1619_v60  ;;  %v3180_v2 = vmul.f32 %v3000_v26, %v3090_v9  ;;  %v3188_v24 = vmul.f32 %v2976_v15, %v3152_v54  ;;  %v1934_v49 = vld [vmem:[%s4240_s14] sm:$0xff]  ;;  %s4330_s19 = sld [smem:[#allocation16_spill]] }
  0x37   : > { %v1579_v10 = vadd.f32 %v3066_v57, %v1501_v55  ;;  %v1580_v20 = vadd.f32 %v3066_v57, %v1502_v59  ;;  %v1109_v28 = vmul.f32 %v2967_v12, %v948_v36  ;;  %v1117_v31 = vmul.f32 %v2970_v13, %v948_v36  ;;  %2668 = vmatprep.subr.mxu0 %v1934_v49  ;;  %s4390_s27 = smov (!%p932_p1, %s2760_s27), 1 }
  0x38   : > { %v3193_v32 = vmul.f32 %v2957_v11, %v948_v36  ;;  %v3197_v34 = vmul.f32 %v2970_v13, %v3172_v61  ;;  %v1110_v42 = vmul.f32 %v2967_v12, %v949_v40  ;;  %s852_s12 = scalar_lea.vmem %s4302_s11, %s2561_s21  ;;  %v3222_v60 = vmul.f32 %v2957_v11, %v949_v40  ;;  %2694 = vmatprep.subr.mxu1 %v1934_v49 }
  0x39   : > { %v1611_v38 = vrot.slane %v1579_v10, 7  ;;  %v1675_v39 = vrot.slane %v1579_v10, 1  ;;  %v1676_v41 = vrot.slane %v1580_v20, 1  ;;  %v1763_v43 = vmul.f32 %v3000_v26, %v1579_v10  ;;  %2669 = vmatpush3.msra.mxu0 %v1934_v49  ;;  %2695 = vmatpush3.msra.mxu1 %v1934_v49 }
  0x3a   : > { %v1612_v45 = vrot.slane %v1580_v20, 7  ;;  %v1141_v47 = vadd.f32 %v3193_v32, %v1109_v28  ;;  %v1764_v48 = vmul.f32 %v3000_v26, %v1580_v20  ;;  %v1085_v20 = vld [vmem:[%s852_s12] sm:$0xff]  ;;  %vm3269_vm7 = vcmp.lt.s32.totalorder %v978_v3, 15 }
  0x3b   : > { %v1658_v50 = vsel %vm1209_vm3, 0.0, %v1611_v38  ;;  %v1677_v55 = vsel %vm1274_vm2, %v1675_v39, %v1676_v41  ;;  %v1679_v59 = vsel %vm1274_vm2, %v1676_v41, %v1678_v19  ;;  %v1086_v39 = vld [vmem:[%s852_s12 + $0x8] sm:$0xff]  ;;  %v3237_v19 = vld [vmem:[%s4233_s7] ss:$0 sm:$0xff]  ;;  %v1088_v41 = vmul.f32 %v3094_v18, %v1085_v20  ;;  %s3260_s12 = sshll.u32 %s4388_s10, 1 }
  0x3c   : > { %v1659_v36 = vmul.f32 %v2982_v17, %v1658_v50  ;;  %v1799_v10 = vmul.f32 %v3003_v27, %v1677_v55  ;;  %v1615_v51 = vsel %vm1209_vm3, %v1612_v45, %v1614_v30  ;;  %v1159_v16 = vadd.f32 %v3197_v34, %v1141_v47  ;;  %s867_s21 = sadd.s32 %s3260_s12, %s3104_s1 }
  0x3d   : > { %v1089_v50 = vmul.f32 %v3094_v18, %v1086_v39  ;;  %v1661_v55 = vmul.f32 %v3046_v44, %v1615_v51  ;;  %v1613_v0 = vsel %vm1209_vm3, %v1611_v38, %v1612_v45  ;;  %v1724_v33 = vmul.f32 %v3146_v25, %v1679_v59  ;;  %v3258_v59 = vld [vmem:[%s3159_s4 + $0x18] sm:$0xff]  ;;  %v3265_v39 = vld [vmem:[%s4239_s13] ss:$0 sm:$0xff]  ;;  %s2568_s22 = sshll.u32 %s867_s21, 3 }
  0x3e   : > { %v1743_v30 = vmul.f32 %v2991_v22, %v1659_v36  ;;  %v3245_v47 = vadd.f32 %v3237_v19, %v1159_v16  ;;  %v1744_v23 = vmul.f32 %v2991_v22, %v1613_v0  ;;  %v1103_v20 = vmul.f32 %v2957_v11, %v1088_v41  ;;  %s3742_s6 = scalar_lea.vmem %s4330_s19, %s2568_s22 }
  0x3f   : > { %v1745_v18 = vmul.f32 %v2991_v22, %v1661_v55  ;;  %v1104_v51 = vmul.f32 %v2957_v11, %v1089_v50  ;;  %v1118_v38 = vmul.f32 %v2970_v13, %v949_v40  ;;  %v1800_v16 = vmul.f32 %v3003_v27, %v1724_v33 }
  0x40   : > { %v1779_v45 = vadd.f32 %v1763_v43, %v1743_v30  ;;  %v1780_v49 = vadd.f32 %v1764_v48, %v1744_v23  ;;  %v1818_v36 = vadd.f32 %v1802_v62, %v3161_v58  ;;  %v1111_v41 = vadd.f32 %v1109_v28, %v1103_v20 }
  0x41   : > { %v1781_v50 = vadd.f32 %v3138_v52, %v1745_v18  ;;  %v1112_v40 = vadd.f32 %v1110_v42, %v1104_v51  ;;  %v4251_v23 = vrot.slane %v3245_v47, 7  ;;  %v1137_v43 = vmul.f32 %v2967_v12, %v3172_v61 }
  0x42   : > { %v1815_v58 = vadd.f32 %v1799_v10, %v1779_v45  ;;  %v1816_v62 = vadd.f32 %v1800_v16, %v1780_v49  ;;  %v1142_v48 = vadd.f32 %v3222_v60, %v1110_v42  ;;  %v1119_v55 = vadd.f32 %v1117_v31, %v1111_v41 }
  0x43   : > { %v1817_v28 = vadd.f32 %v3141_v53, %v1781_v50  ;;  %v1120_v0 = vadd.f32 %v1118_v38, %v1112_v40  ;;  %v3281_v52 = vmul.f32 %v2970_v13, %v3258_v59  ;;  %v4257_v30 = vrot.slane %v3245_v47, 1 }
  0x44   : > { %v1837_v3 = vadd.f32 %v3265_v39, %v1815_v58  ;;  %v1143_v10 = vadd.f32 %v1137_v43, %v3193_v32  ;;  %v4306_v20 = vrot.slane %v3149_v35, 1  ;;  %v4307_v18 = vrot.slane %v3090_v9, 1 }
  0x45   : > { %v3292_v31 = vadd.f32 %v3237_v19, %v1119_v55  ;;  %v1839_v53 = vadd.f32 %v3265_v39, %v1817_v28  ;;  %v3296_v51 = vadd.f32 %v3237_v19, %v1120_v0  ;;  %v1160_v38 = vadd.f32 %v3281_v52, %v1142_v48 }
  0x46   : > { %v1685_v42 = vsel %vm1274_vm2, %v4307_v18, %v4306_v20  ;;  %1869 = vrot.lane.b32.xlu0 %v1837_v3, %s2779_s20  ;;  %v1838_v32 = vadd.f32 %v3265_v39, %v1816_v62  ;;  %v1840_v45 = vadd.f32 %v3265_v39, %v1818_v36  ;;  %v1161_v49 = vadd.f32 %v3197_v34, %v1143_v10 }
  0x47   : > { %v1747_v16 = vmul.f32 %v2991_v22, %v3176_v63  ;;  %v4252_v41 = vrot.slane %v3292_v31, 7  ;;  %1873 = vrot.lane.b32.xlu1 %v1839_v53, %s2779_s20  ;;  %v4253_v50 = vrot.slane %v3296_v51, 7  ;;  %v4261_v40 = vrot.slane %v3296_v51, 1 }
  0x48   : > { %v1803_v58 = vmul.f32 %v3003_v27, %v1685_v42  ;;  %v3311_v48 = vadd.f32 %v3237_v19, %v1160_v38  ;;  %v1565_v34 = vadd.f32 %v3188_v24, %v3084_v7  ;;  %v1620_v63 = vrot.slane %v3149_v35, 7  ;;  %v3358_v42 = vld [vmem:[%s3159_s4 + $0x20] sm:$0xff] }
  0x49   : > { %v1783_v36 = vadd.f32 %v3180_v2, %v1747_v16  ;;  %v1257_v62 = vsel %vm1209_vm3, 0.0, %v4252_v41  ;;  %v1214_v55 = vsel %vm1209_vm3, %v4253_v50, %v4251_v23  ;;  %v1279_v2 = vsel %vm1274_vm2, %v4261_v40, %v4257_v30 }
  0x4a   : > { %v3331_v7 = vadd.f32 %v3237_v19, %v1161_v49  ;;  %v3334_v24 = vmul.f32 %v2982_v17, %v1257_v62  ;;  %v3337_v28 = vmul.f32 %v3046_v44, %v1214_v55  ;;  %1871 = vrot.lane.b32.xlu0 %v1838_v32, %s2779_s20  ;;  %v3341_v0 = vmul.f32 %v3146_v25, %v1279_v2 }
  0x4b   : > { %1875 = vrot.lane.b32.xlu1 %v1840_v45, %s2779_s20  ;;  %v1819_v3 = vadd.f32 %v1803_v58, %v1783_v36  ;;  %v3345_v10 = vadd.f32 %v3066_v57, %v1565_v34  ;;  %v4310_v20 = vmov 0.0   ;;  %v4311_v44 = vrot.slane %v3090_v9, 7 }
  0x4c   : > { %4308 = vst [vmem:[#allocation4_spill] sm:$0xff] %v3331_v7  ;;  %4309 = vst [vmem:[#allocation5_spill] sm:$0xff] %v3341_v0  ;;  %v3350_v17 = vsel %vm3269_vm7, 1.0, %v4310_v20  ;;  %v1768_v25 = vmul.f32 %v3000_v26, %v3149_v35  ;;  %v3362_v53 = vmul.f32 %v2957_v11, %v3172_v61  ;;  %v4258_v38 = vrot.slane %v3311_v48, 1  ;;  %v3376_v61 = vld [vmem:[%s2964_s2 + $0x48] sm:$0xff] }
  0x4d   : > { %v1621_v18 = vsel %vm1209_vm3, %v4311_v44, %v1620_v63  ;;  %v4255_v32 = vrot.slane %v3331_v7, 1  ;;  %v1841_v33 = vadd.f32 %v3265_v39, %v1819_v3  ;;  %v1686_v45 = vrot.slane %v3345_v10, 1 }
  0x4e   : > { %v4256_v9 = vrot.slane %v3311_v48, 7  ;;  %v1748_v49 = vmul.f32 %v2991_v22, %v1621_v18  ;;  %v3372_v16 = vmul.f32 %v2967_v12, %v3258_v59  ;;  %v1145_v58 = vadd.f32 %v1137_v43, %v3362_v53 }
  0x4f   : > { %1877 = vrot.lane.b32.xlu0 %v1841_v33, %s2779_s20  ;;  %v4312_v36 = vrot.slane %v3149_v35, 1  ;;  %v3384_v62 = vmul.f32 %v2970_v13, %v3358_v42  ;;  %v963_v55 = vadd.s32 48, %v2916_v1  ;;  %v1518_v2 = vmul.f32 %v2988_v21, %v3007_v29 }
  0x50   : > { %v1784_v43 = vadd.f32 %v1768_v25, %v1748_v49  ;;  %v1144_v44 = vadd.f32 %v3372_v16, %v3222_v60  ;;  %v1530_v35 = vmul.f32 %v2973_v14, %v3061_v56  ;;  %v1622_v23 = vrot.slane %v3345_v10, 7  ;;  %v1097_v60 = vld [vmem:[%s4234_s8] sm:$0x7] }
  0x51   : > { %v1687_v34 = vsel %vm1274_vm2, %v4312_v36, %v1686_v45  ;;  %v1163_v18 = vadd.f32 %v3384_v62, %v1145_v58  ;;  %v979_v33 = vand.u32 15, %v963_v55  ;;  %v1554_v36 = vmul.f32 %v2976_v15, %v3376_v61 }
  0x52   : > { %v1728_v3 = vmul.f32 %v3350_v17, %v1687_v34  ;;  %v4254_v41 = vrot.slane %v3331_v7, 7  ;;  %v1162_v25 = vadd.f32 %v3281_v52, %v1144_v44  ;;  %v1542_v49 = vadd.f32 %v1530_v35, %v1518_v2 }
  0x53   : > { %vm995_vm8 = vcmp.gt.s32.totalorder %v979_v33, 0  ;;  %v1623_v58 = vsel %vm1209_vm3, %v1620_v63, %v1622_v23  ;;  %v964_v34 = vadd.s32 56, %v2916_v1  ;;  %v1283_v55 = vsel %vm1274_vm2, %v4258_v38, %v4255_v32 }
  0x54   : > { %v1804_v29 = vmul.f32 %v3003_v27, %v1728_v3  ;;  %v3412_v52 = vsel %vm995_vm8, 1.0, %v4310_v20  ;;  %v1566_v2 = vadd.f32 %v1554_v36, %v1542_v49  ;;  %v3415_v44 = vadd.f32 %v3237_v19, %v1162_v25  ;;  %v3435_v49 = vld [vmem:[%s2964_s2 + $0x50] sm:$0xff] }
  0x55   : > { %v3418_v35 = vadd.f32 %v3237_v19, %v1163_v18  ;;  %v1665_v63 = vmul.f32 %v3412_v52, %v1623_v58  ;;  %v1769_v33 = vmul.f32 %v3000_v26, %v3345_v10  ;;  %v3424_v50 = vrot.slane %v1097_v60, %v2935_v6 }
  0x56   : > { %v1820_v3 = vadd.f32 %v1804_v29, %v1784_v43  ;;  %4313 = vst [vmem:[#allocation6_spill] sm:$0xff] %v3415_v44  ;;  %v1218_v43 = vsel %vm1209_vm3, %v4256_v9, %v4254_v41  ;;  %v1586_v29 = vadd.f32 %v3066_v57, %v1566_v2  ;;  %v980_v25 = vand.u32 15, %v964_v34 }
  0x57   : > { %4314 = vst [vmem:[#allocation7_spill] sm:$0xff] %v3418_v35  ;;  %v1749_v18 = vmul.f32 %v2991_v22, %v1665_v63  ;;  %v1519_v10 = vmul.f32 %v2988_v21, %v3028_v37  ;;  %v1531_v6 = vmul.f32 %v2973_v14, %v3152_v54  ;;  %v3442_v58 = vrot.slane %v1097_v60, %v2928_v4 }
  0x58   : > { %v1842_v36 = vadd.f32 %v3265_v39, %v1820_v3  ;;  %v3445_v41 = vrot.slane %v1097_v60, %v2931_v5  ;;  %v3448_v3 = vmul.f32 %v3087_v8, %v1283_v55  ;;  %v1688_v34 = vrot.slane %v1586_v29, 1 }
  0x59   : > { %v4260_v2 = vrot.slane %v3415_v44, 1  ;;  %v4259_v37 = vrot.slane %v3418_v35, 1  ;;  %v1785_v63 = vadd.f32 %v1769_v33, %v1749_v18  ;;  %v1543_v32 = vadd.f32 %v1531_v6, %v1519_v10  ;;  %v3467_v33 = vld [vmem:[%s2964_s2 + $0x58] sm:$0xff] }
  0x5a   : > { %4315 = vst [vmem:[#allocation8_spill] sm:$0xff] %v3448_v3  ;;  %1879 = vrot.lane.b32.xlu1 %v1842_v36, %s2779_s20  ;;  %v3454_v9 = vmul.f32 %v3129_v46, %v1218_v43  ;;  %v1689_v4 = vsel %vm1274_vm2, %v1686_v45, %v1688_v34  ;;  %v1555_v5 = vmul.f32 %v2976_v15, %v3435_v49  ;;  %v1624_v8 = vrot.slane %v1586_v29, 7 }
  0x5b   : > { %v1805_v60 = vmul.f32 %v3003_v27, %v1689_v4  ;;  %vm3462_vm9 = vcmp.lt.s32.totalorder %v980_v25, 15  ;;  %v965_v43 = vadd.s32 64, %v2916_v1  ;;  %v1520_v18 = vmul.f32 %v2988_v21, %v3061_v56  ;;  %v3486_v4 = vld [vmem:[%s3159_s4 + $0x28] sm:$0xff] }
  0x5c   : > { %4316 = vst [vmem:[#allocation9_spill] sm:$0xff] %v3454_v9  ;;  %v1567_v46 = vadd.f32 %v1555_v5, %v1543_v32  ;;  %v1625_v45 = vsel %vm1209_vm3, %v1622_v23, %v1624_v8  ;;  %v3478_v10 = vsel %vm1274_vm2, %v4260_v2, %v4259_v37  ;;  %v1134_v6 = vmul.f32 %v2957_v11, %v3258_v59 }
  0x5d   : > { %v1821_v25 = vadd.f32 %v1805_v60, %v1785_v63  ;;  %v1139_v32 = vmul.f32 %v2967_v12, %v3358_v42  ;;  %v981_v5 = vand.u32 15, %v965_v43  ;;  %v1532_v56 = vmul.f32 %v2973_v14, %v3376_v61 }
  0x5e   : > { %v1587_v23 = vadd.f32 %v3066_v57, %v1567_v46  ;;  %v1556_v38 = vmul.f32 %v2976_v15, %v3467_v33  ;;  %v3496_v59 = vsel %vm3462_vm9, 1.0, %v4310_v20  ;;  %v1750_v63 = vmul.f32 %v2991_v22, %v1625_v45 }
  0x5f   : > { %v1843_v37 = vadd.f32 %v3265_v39, %v1821_v25  ;;  %v1770_v60 = vmul.f32 %v3000_v26, %v1586_v29  ;;  %vm997_vm10 = vcmp.gt.s32.totalorder %v981_v5, 0  ;;  %v1544_v43 = vadd.f32 %v1532_v56, %v1520_v18  ;;  %v3512_v5 = vld [vmem:[%s2964_s2 + $0x60] sm:$0xff] }
  0x60   : > { %v1690_v46 = vrot.slane %v1587_v23, 1  ;;  %v1626_v2 = vrot.slane %v1587_v23, 7  ;;  %v1146_v40 = vadd.f32 %v3372_v16, %v1134_v6  ;;  %v1147_v25 = vadd.f32 %v1139_v32, %v3362_v53 }
  0x61   : > { %1881 = vrot.lane.b32.xlu0 %v1843_v37, %s2779_s20  ;;  %v1156_v30 = vmul.f32 %v2970_v13, %v3486_v4  ;;  %v3506_v55 = vsel %vm997_vm10, 1.0, %v4310_v20  ;;  %v1568_v36 = vadd.f32 %v1556_v38, %v1544_v43  ;;  %v966_v18 = vadd.s32 72, %v2916_v1 }
  0x62   : > { %4319 = vst [vmem:[#allocation10_spill] sm:$0xff] %v3506_v55  ;;  %v1691_v45 = vsel %vm1274_vm2, %v1688_v34, %v1690_v46  ;;  %v1627_v29 = vsel %vm1209_vm3, %v1624_v8, %v1626_v2  ;;  %v1786_v16 = vadd.f32 %v1770_v60, %v1750_v63  ;;  %v1771_v56 = vmul.f32 %v3000_v26, %v1587_v23 }
  0x63   : > { %v1730_v37 = vmul.f32 %v3496_v59, %v1691_v45  ;;  %v1667_v53 = vmul.f32 %v3506_v55, %v1627_v29  ;;  %v1588_v9 = vadd.f32 %v3066_v57, %v1568_v36  ;;  %v982_v7 = vand.u32 15, %v966_v18 }
  0x64   : > { %v1521_v38 = vmul.f32 %v2988_v21, %v3152_v54  ;;  %v1533_v34 = vmul.f32 %v2973_v14, %v3435_v49  ;;  %v4320_v8 = vrot.slane %v3418_v35, 7  ;;  %v4321_v43 = vrot.slane %v3415_v44, 7 }
  0x65   : > { %v1806_v60 = vmul.f32 %v3003_v27, %v1730_v37  ;;  %v1751_v23 = vmul.f32 %v2991_v22, %v1667_v53  ;;  %v1557_v36 = vmul.f32 %v2976_v15, %v3512_v5  ;;  %v1164_v45 = vadd.f32 %v1156_v30, %v1146_v40 }
  0x66   : > { %v3527_v63 = vsel %vm1209_vm3, %v4321_v43, %v4320_v8  ;;  %v1165_v54 = vadd.f32 %v3384_v62, %v1147_v25  ;;  %v1692_v29 = vrot.slane %v1588_v9, 1  ;;  %v1545_v18 = vadd.f32 %v1533_v34, %v1521_v38  ;;  %v3539_v43 = vld [vmem:[%s3159_s4 + $0x30] sm:$0xff] }
  0x67   : > { %v1822_v55 = vadd.f32 %v1806_v60, %v1786_v16  ;;  %v1787_v3 = vadd.f32 %v1771_v56, %v1751_v23  ;;  %vm3534_vm11 = vcmp.lt.s32.totalorder %v982_v7, 15  ;;  %v1628_v8 = vrot.slane %v1588_v9, 7 }
  0x68   : > { %v1693_v37 = vsel %vm1274_vm2, %v1690_v46, %v1692_v29  ;;  %v1569_v53 = vadd.f32 %v1557_v36, %v1545_v18  ;;  %v1772_v44 = vmul.f32 %v3000_v26, %v1588_v9  ;;  %v3545_v40 = vmul.f32 %v2957_v11, %v3358_v42 }
  0x69   : > { %v1844_v62 = vadd.f32 %v3265_v39, %v1822_v55  ;;  %v1807_v25 = vmul.f32 %v3003_v27, %v1693_v37  ;;  %v1629_v7 = vsel %vm1209_vm3, %v1626_v2, %v1628_v8  ;;  %v3552_v16 = vmul.f32 %v2967_v12, %v3486_v4  ;;  %v3564_v55 = vld [vmem:[%s2964_s2 + $0x68] sm:$0xff] }
  0x6a   : > { %v3555_v56 = vadd.f32 %v3066_v57, %v1569_v53  ;;  %v1752_v46 = vmul.f32 %v2991_v22, %v1629_v7  ;;  %v1149_v9 = vadd.f32 %v1139_v32, %v3545_v40  ;;  %v3561_v42 = vmul.f32 %v2970_v13, %v3539_v43 }
  0x6b   : > { %1883 = vrot.lane.b32.xlu1 %v1844_v62, %s2779_s20  ;;  %v1823_v2 = vadd.f32 %v1807_v25, %v1787_v3  ;;  %v1148_v38 = vadd.f32 %v3552_v16, %v1134_v6  ;;  %v967_v34 = vadd.s32 80, %v2916_v1  ;;  %v1522_v60 = vmul.f32 %v2988_v21, %v3376_v61 }
  0x6c   : > { %v3572_v23 = vadd.f32 %v3237_v19, %v1164_v45  ;;  %v3577_v32 = vsel %vm3534_vm11, 1.0, %v4310_v20  ;;  %v1694_v36 = vrot.slane %v3555_v56, 1  ;;  %v1534_v3 = vmul.f32 %v2973_v14, %v3467_v33 }
  0x6d   : > { %v3583_v6 = vadd.f32 %v3237_v19, %v1165_v54  ;;  %v1845_v18 = vadd.f32 %v3265_v39, %v1823_v2  ;;  %v983_v37 = vand.u32 15, %v967_v34  ;;  %v1558_v61 = vmul.f32 %v2976_v15, %v3564_v55 }
  0x6e   : > { %v1695_v45 = vsel %vm1274_vm2, %v1692_v29, %v1694_v36  ;;  %v1167_v35 = vadd.f32 %v3561_v42, %v1149_v9  ;;  %v1546_v53 = vadd.f32 %v1534_v3, %v1522_v60  ;;  %v1630_v62 = vrot.slane %v3555_v56, 7 }
  0x6f   : > { %4324 = vst [vmem:[#allocation11_spill] sm:$0xff] %v3583_v6  ;;  %1885 = vrot.lane.b32.xlu0 %v1845_v18, %s2779_s20  ;;  %v1732_v25 = vmul.f32 %v3577_v32, %v1695_v45  ;;  %v1788_v7 = vadd.f32 %v1772_v44, %v1752_v46  ;;  %v1166_v54 = vadd.f32 %v1156_v30, %v1148_v38  ;;  %vm999_vm12 = vcmp.gt.s32.totalorder %v983_v37, 0  ;;  %v3617_v45 = vld [vmem:[%s2964_s2 + $0x70] sm:$0xff] }
  0x70   : > { %v4270_v2 = vrot.slane %v3572_v23, 1  ;;  %v3595_v34 = vsel %vm999_vm12, 1.0, %v4310_v20  ;;  %v1570_v0 = vadd.f32 %v1558_v61, %v1546_v53  ;;  %v1631_v29 = vsel %vm1209_vm3, %v1628_v8, %v1630_v62 }
  0x71   : > { %v4269_v9 = vrot.slane %v3583_v6, 1  ;;  %v1808_v60 = vmul.f32 %v3003_v27, %v1732_v25  ;;  %v1669_v3 = vmul.f32 %v3595_v34, %v1631_v29  ;;  %v1773_v44 = vmul.f32 %v3000_v26, %v3555_v56 }
  0x72   : > { %v3604_v30 = vadd.f32 %v3237_v19, %v1167_v35  ;;  %v3607_v46 = vadd.f32 %v3066_v57, %v1570_v0  ;;  %v968_v38 = vadd.s32 88, %v2916_v1  ;;  %v1523_v8 = vmul.f32 %v2988_v21, %v3435_v49 }
  0x73   : > { %v1824_v18 = vadd.f32 %v1808_v60, %v1788_v7  ;;  %v3613_v37 = vadd.f32 %v3237_v19, %v1166_v54  ;;  %v1753_v61 = vmul.f32 %v2991_v22, %v1669_v3  ;;  %v1535_v56 = vmul.f32 %v2973_v14, %v3512_v5  ;;  %v3642_v60 = vld [vmem:[%s3159_s4 + $0x38] sm:$0xff]  ;;  %s4328_s4 = sadd.s32 %s3041_s26, %s2923_s24 }
  0x74   : > { %4325 = vst [vmem:[#allocation12_spill] sm:$0xff] %v3604_v30  ;;  %v3623_v0 = vmul.f32 %v3350_v17, %v3478_v10  ;;  %v3627_v35 = vmul.f32 %v3412_v52, %v3527_v63  ;;  %v1696_v49 = vrot.slane %v3607_v46, 1  ;;  %v984_v53 = vand.u32 15, %v968_v38  ;;  %s2589_s10 = sshll.u32 %s4328_s4, 3  ;;  %s4362_s4 = sshll.u32 %s2942_s23, 3 }
  0x75   : > { %v1291_v25 = vsel %vm1274_vm2, %v4270_v2, %v4269_v9  ;;  %v1846_v7 = vadd.f32 %v3265_v39, %v1824_v18  ;;  %v1789_v54 = vadd.f32 %v1773_v44, %v1753_v61  ;;  %v1547_v29 = vadd.f32 %v1535_v56, %v1523_v8  ;;  %v3669_v2 = vld [vmem:[%s2964_s2 + $0x78] sm:$0xff]  ;;  %s947_s24 = scalar_select %p932_p1, 1.0, 0.0 }
  0x76   : > { %v4271_v17 = vrot.slane %v3604_v30, 1  ;;  %v1697_v10 = vsel %vm1274_vm2, %v1694_v36, %v1696_v49  ;;  %v1559_v52 = vmul.f32 %v2976_v15, %v3617_v45  ;;  %v1632_v63 = vrot.slane %v3607_v46, 7  ;;  %s3709_s11 = scalar_lea.vmem %s4231_s5, %s2589_s10  ;;  %s4119_s2 = scalar_lea.vmem %s4242_s16, %s4362_s4 }
  0x77   : > { %1887 = vrot.lane.b32.xlu1 %v1846_v7, %s2779_s20  ;;  %v4272_v3 = vrot.slane %v3613_v37, 1  ;;  %v1809_v44 = vmul.f32 %v3003_v27, %v1697_v10  ;;  %v3650_v36 = vmul.f32 %v2967_v12, %v3539_v43  ;;  %vm3652_vm13 = vcmp.lt.s32.totalorder %v984_v53, 15  ;;  %s2594_s23 = sshll.u32 %s4376_s28, 1 }
  0x78   : > { %v1571_v18 = vadd.f32 %v1559_v52, %v1547_v29  ;;  %v1633_v61 = vsel %vm1209_vm3, %v1630_v62, %v1632_v63  ;;  %v3659_v56 = vmul.f32 %v2957_v11, %v3486_v4  ;;  %v1774_v10 = vmul.f32 %v3000_v26, %v3607_v46  ;;  %s935_s26 = sadd.s32 %s2594_s23, %s4390_s27 }
  0x79   : > { %v1825_v7 = vadd.f32 %v1809_v44, %v1789_v54  ;;  %v3665_v9 = vmul.f32 %v2970_v13, %v3642_v60  ;;  %v969_v53 = vadd.s32 96, %v2916_v1  ;;  %v1754_v62 = vmul.f32 %v2991_v22, %v1633_v61  ;;  %s936_s1 = scalar_lea.vmem %s4243_s17, %s935_s26 }
  0x7a   : > { %v3673_v29 = vadd.f32 %v3066_v57, %v1571_v18  ;;  %v1524_v4 = vmul.f32 %v2988_v21, %v3467_v33  ;;  %v1536_v46 = vmul.f32 %v2973_v14, %v3564_v55  ;;  %v1150_v52 = vadd.f32 %v3552_v16, %v3659_v56 }
  0x7b   : > { %v1847_v54 = vadd.f32 %v3265_v39, %v1825_v7  ;;  %v1151_v44 = vadd.f32 %v3545_v40, %v3650_v36  ;;  %v985_v18 = vand.u32 15, %v969_v53  ;;  %v3691_v33 = vsel %vm3652_vm13, 1.0, %v4310_v20 }
  0x7c   : > { %v1698_v61 = vrot.slane %v3673_v29, 1  ;;  %v1548_v38 = vadd.f32 %v1536_v46, %v1524_v4  ;;  %v1560_v7 = vmul.f32 %v2976_v15, %v3669_v2  ;;  %v1295_v40 = vsel %vm1274_vm2, %v4272_v3, %v4271_v17 }
  0x7d   : > { %1889 = vrot.lane.b32.xlu0 %v1847_v54, %s2779_s20  ;;  %vm1001_vm14 = vcmp.gt.s32.totalorder %v985_v18, 0  ;;  %v1634_v8 = vrot.slane %v3673_v29, 7  ;;  %v1790_v4 = vadd.f32 %v1774_v10, %v1754_v62  ;;  %v1168_v17 = vadd.f32 %v3665_v9, %v1150_v52 }
  0x7e   : > { %v1699_v53 = vsel %vm1274_vm2, %v1696_v49, %v1698_v61  ;;  %v3713_v46 = vsel %vm1001_vm14, 1.0, %v4310_v20  ;;  %v1572_v54 = vadd.f32 %v1560_v7, %v1548_v38  ;;  %v1169_v3 = vadd.f32 %v3561_v42, %v1151_v44 }
  0x7f   : > { %4329 = vst [vmem:[#allocation13_spill] sm:$0xff] %v3713_v46  ;;  %v1734_v18 = vmul.f32 %v3691_v33, %v1699_v53  ;;  %v1635_v16 = vsel %vm1209_vm3, %v1632_v63, %v1634_v8  ;;  %v3723_v6 = vmul.f32 %v3496_v59, %v1291_v25  ;;  %v1775_v38 = vmul.f32 %v3000_v26, %v3673_v29  ;;  %v1473_v63 = vld [vmem:[%s3709_s11] sm:$0xff] }
  0x80   : > { %v3726_v49 = vadd.f32 %v3066_v57, %v1572_v54  ;;  %v1671_v10 = vmul.f32 %v3713_v46, %v1635_v16  ;;  %v3732_v62 = vmul.f32 %v3577_v32, %v1295_v40  ;;  %v970_v42 = vadd.s32 104, %v2916_v1  ;;  %v1090_v46 = vld [vmem:[%s3742_s6] sm:$0xff] }
  0x81   : > { %v1810_v52 = vmul.f32 %v3003_v27, %v1734_v18  ;;  %v3736_v44 = vstv %s947_s24  ;;  %v4331_v59 = vrot.slane %v3604_v30, 7  ;;  %v4332_v25 = vrot.slane %v3613_v37, 7 }
  0x82   : > { %v1700_v29 = vrot.slane %v3726_v49, 1  ;;  %v1755_v7 = vmul.f32 %v2991_v22, %v1671_v10  ;;  %v1503_v40 = vmul.f32 %v2988_v21, %v3512_v5  ;;  %v3756_v53 = vadd.f32 %v3237_v19, %v1168_v17 }
  0x83   : > { %v3749_v32 = vsel %vm1209_vm3, %v4332_v25, %v4331_v59  ;;  %v1826_v16 = vadd.f32 %v1810_v52, %v1790_v4  ;;  %v3759_v54 = vadd.f32 %v3237_v19, %v1169_v3  ;;  %v986_v18 = vand.u32 15, %v970_v42 }
  0x84   : > { %v1701_v30 = vsel %vm1274_vm2, %v1698_v61, %v1700_v29  ;;  %v1791_v59 = vadd.f32 %v1775_v38, %v1755_v7  ;;  %v1475_v25 = vmul.f32 %v1473_v63, %v3736_v44  ;;  %v1505_v10 = vmul.f32 %v2973_v14, %v3617_v45  ;;  %v1474_v38 = vld [vmem:[%s3709_s11 + $0x8] sm:$0xff] }
  0x85   : > { %v1848_v5 = vadd.f32 %v3265_v39, %v1826_v16  ;;  %v1811_v4 = vmul.f32 %v3003_v27, %v1701_v30  ;;  %vm1050_vm15 = vcmp.lt.s32.totalorder %v986_v18, 15  ;;  %v1636_v17 = vrot.slane %v3726_v49, 7 }
  0x86   : > { %v2610_v3 = vsel %vm1050_vm15, 1.0, %v4310_v20  ;;  %v1507_v52 = vadd.f32 %v1505_v10, %v1503_v40  ;;  %v1509_v42 = vmul.f32 %v2976_v15, %v1475_v25  ;;  %v1776_v61 = vmul.f32 %v3000_v26, %v3726_v49 }
  0x87   : > { %1891 = vrot.lane.b32.xlu1 %v1848_v5, %s2779_s20  ;;  %v1827_v45 = vadd.f32 %v1811_v4, %v1791_v59  ;;  %v1637_v63 = vsel %vm1209_vm3, %v1634_v8, %v1636_v17  ;;  %v1093_v7 = vmul.f32 %v3736_v44, %v1090_v46  ;;  %v1121_v30 = vmul.f32 %v2957_v11, %v3539_v43 }
  0x88   : > { %v1511_v16 = vadd.f32 %v1509_v42, %v1507_v52  ;;  %v1756_v18 = vmul.f32 %v2991_v22, %v1637_v63  ;;  %v1124_v40 = vmul.f32 %v2967_v12, %v3642_v60  ;;  %v971_v25 = vadd.s32 112, %v2916_v1 }
  0x89   : > { %v1849_v49 = vadd.f32 %v3265_v39, %v1827_v45  ;;  %v1125_v10 = vadd.f32 %v3650_v36, %v1121_v30  ;;  %v1127_v59 = vmul.f32 %v2970_v13, %v1093_v7  ;;  %v1476_v8 = vmul.f32 %v1474_v38, %v3736_v44 }
  0x8a   : > { %v1593_v46 = vadd.f32 %v3066_v57, %v1511_v16  ;;  %v1792_v5 = vadd.f32 %v1776_v61, %v1756_v18  ;;  %v1152_v43 = vadd.f32 %v3659_v56, %v1124_v40  ;;  %v987_v4 = vand.u32 15, %v971_v25 }
  0x8b   : > { %1893 = vrot.lane.b32.xlu0 %v1849_v49, %s2779_s20  ;;  %v1129_v52 = vadd.f32 %v1127_v59, %v1125_v10  ;;  %v1504_v12 = vmul.f32 %v2988_v21, %v3564_v55  ;;  %v1506_v36 = vmul.f32 %v2973_v14, %v3669_v2  ;;  %v1510_v42 = vmul.f32 %v2976_v15, %v1476_v8  ;;  %v1091_v2 = vld [vmem:[%s3742_s6 + $0x8] sm:$0xff]  ;;  %s943_s6 = scalar_lea.vmem %s4244_s18, %s935_s26 }
  0x8c   : > { %v1702_v45 = vrot.slane %v1593_v46, 1  ;;  %v1170_v38 = vadd.f32 %v3665_v9, %v1152_v43  ;;  %vm1003_vm0 = vcmp.gt.s32.totalorder %v987_v4, 0  ;;  %v1638_v61 = vrot.slane %v1593_v46, 7 }
  0x8d   : > { %v3797_v56 = vadd.f32 %v3237_v19, %v1129_v52  ;;  %v2603_v63 = vsel %vm1003_vm0, 1.0, %v4310_v20  ;;  %v1508_v7 = vadd.f32 %v1506_v36, %v1504_v12  ;;  %v1777_v30 = vmul.f32 %v3000_v26, %v1593_v46 }
  0x8e   : > { %v1703_v21 = vsel %vm1274_vm2, %v1700_v29, %v1702_v45  ;;  %v3803_v55 = vadd.f32 %v3237_v19, %v1170_v38  ;;  %v1639_v14 = vsel %vm1209_vm3, %v1636_v17, %v1638_v61  ;;  %v972_v15 = vadd.s32 120, %v2916_v1 }
  0x8f   : > { %v1736_v9 = vmul.f32 %v2610_v3, %v1703_v21  ;;  %v1302_v16 = vrot.slane %v3797_v56, 1  ;;  %v1512_v18 = vadd.f32 %v1510_v42, %v1508_v7  ;;  %v1673_v25 = vmul.f32 %v2603_v63, %v1639_v14 }
  0x90   : > { %v1300_v49 = vrot.slane %v3803_v55, 1  ;;  %v1235_v10 = vrot.slane %v3803_v55, 7  ;;  %v1237_v59 = vrot.slane %v3797_v56, 7  ;;  %v988_v29 = vand.u32 15, %v972_v15 }
  0x91   : > { %v1812_v8 = vmul.f32 %v3003_v27, %v1736_v9  ;;  %v1594_v46 = vadd.f32 %v3066_v57, %v1512_v18  ;;  %v1757_v17 = vmul.f32 %v2991_v22, %v1673_v25  ;;  %v1094_v1 = vmul.f32 %v3736_v44, %v1091_v2 }
  0x92   : > { %v1303_v43 = vsel %vm1274_vm2, %v1300_v49, %v1302_v16  ;;  %v1238_v4 = vsel %vm1209_vm3, %v1235_v10, %v1237_v59  ;;  %vm1052_vm1 = vcmp.lt.s32.totalorder %v988_v29, 15  ;;  %v1122_v57 = vmul.f32 %v2957_v11, %v3642_v60 }
  0x93   : > { %v1828_v52 = vadd.f32 %v1812_v8, %v1792_v5  ;;  %v3828_v12 = vmul.f32 %v2610_v3, %v1303_v43  ;;  %v1704_v44 = vrot.slane %v1594_v46, 1  ;;  %v1793_v36 = vadd.f32 %v1777_v30, %v1757_v17 }
  0x94   : > { %v3830_v42 = vmul.f32 %v2603_v63, %v1238_v4  ;;  %v2611_v38 = vsel %vm1052_vm1, 1.0, %v4310_v20  ;;  %v1640_v7 = vrot.slane %v1594_v46, 7  ;;  %v1778_v21 = vmul.f32 %v3000_v26, %v1594_v46 }
  0x95   : > { %v1850_v14 = vadd.f32 %v3265_v39, %v1828_v52  ;;  %v1705_v15 = vsel %vm1274_vm2, %v1702_v45, %v1704_v44  ;;  %v1722_v2 = vsel %vm1274_vm2, %v1704_v44, 0.0  ;;  %v1126_v9 = vadd.f32 %v1124_v40, %v1122_v57 }
  0x96   : > { %v1813_v11 = vmul.f32 %v3003_v27, %v1705_v15  ;;  %v1641_v60 = vsel %vm1209_vm3, %v1638_v61, %v1640_v7  ;;  %v1738_v3 = vmul.f32 %v2611_v38, %v1722_v2  ;;  %v1128_v5 = vmul.f32 %v2970_v13, %v1094_v1 }
  0x97   : > { %1895 = vrot.lane.b32.xlu1 %v1850_v14, %s2779_s20  ;;  %v1758_v20 = vmul.f32 %v2991_v22, %v1641_v60  ;;  %v1275_v26 = vrot.slane %v3292_v31, 1  ;;  %v1343_v63 = vmul.f32 %v3424_v50, %v3334_v24  ;;  %v1363_v45 = vmul.f32 %v3442_v58, %v3292_v31 }
  0x98   : > { %v1298_v40 = vrot.slane %v3759_v54, 1  ;;  %v1829_v30 = vadd.f32 %v1813_v11, %v1793_v36  ;;  %v1814_v61 = vmul.f32 %v3003_v27, %v1738_v3  ;;  %v1130_v18 = vadd.f32 %v1128_v5, %v1126_v9  ;;  %v4338_v11 = vld [vmem:[#allocation5_spill] sm:$0xff] }
  0x99   : > { %v1233_v13 = vrot.slane %v3759_v54, 7  ;;  %v1794_v25 = vadd.f32 %v1778_v21, %v1758_v20  ;;  %v4333_v29 = vrot.slane %v3296_v51, 1  ;;  %v1379_v8 = vadd.f32 %v1363_v45, %v1343_v63 }
  0x9a   : > { %v1851_v46 = vadd.f32 %v3265_v39, %v1829_v30  ;;  %v3855_v24 = vadd.f32 %v3237_v19, %v1130_v18  ;;  %v4334_v1 = vrot.slane %v3311_v48, 1  ;;  %v4335_v27 = vrot.slane %v3245_v47, 1 }
  0x9b   : > { %v1277_v22 = vsel %vm1274_vm2, %v1275_v26, %v4333_v29  ;;  %v1830_v4 = vadd.f32 %v1814_v61, %v1794_v25  ;;  %v1345_v57 = vmul.f32 %v3424_v50, %v3337_v28  ;;  %v1365_v52 = vmul.f32 %v3442_v58, %v3245_v47  ;;  %v4341_v61 = vld [vmem:[#allocation8_spill] sm:$0xff]  ;;  %v4342_v25 = vld [vmem:[#allocation6_spill] sm:$0xff] }
  0x9c   : > { %v1399_v17 = vmul.f32 %v3445_v41, %v1277_v22  ;;  %v1281_v43 = vsel %vm1274_vm2, %v4335_v27, %v4334_v1  ;;  %1897 = vrot.lane.b32.xlu0 %v1851_v46, %s2779_s20  ;;  %v1304_v19 = vrot.slane %v3855_v24, 1  ;;  %v4336_v7 = vrot.slane %v3296_v51, 7  ;;  %v4346_v46 = vld [vmem:[#allocation9_spill] sm:$0xff] }
  0x9d   : > { %v1401_v44 = vmul.f32 %v3445_v41, %v1281_v43  ;;  %v4337_v21 = vrot.slane %v3292_v31, 7  ;;  %v1364_v28 = vmul.f32 %v3442_v58, %v3296_v51  ;;  %v1852_v15 = vadd.f32 %v3265_v39, %v1830_v4 }
  0x9e   : > { %v3870_v36 = vadd.f32 %v1399_v17, %v1379_v8  ;;  %v1381_v2 = vadd.f32 %v1365_v52, %v1345_v57  ;;  %v1400_v60 = vmul.f32 %v3445_v41, %v4338_v11  ;;  %v1296_v3 = vrot.slane %v3756_v53, 1 }
  0x9f   : > { %v1212_v14 = vsel %vm1209_vm3, %v4337_v21, %v4336_v7  ;;  %v1322_v5 = vsel %vm1274_vm2, %v1304_v19, 0.0  ;;  %v4339_v31 = vrot.slane %v3311_v48, 7  ;;  %v4340_v20 = vrot.slane %v3245_v47, 7  ;;  %1899 = vrot.lane.b32.xlu1 %v1852_v15, %s2779_s20  ;;  %v4344_v47 = vld [vmem:[#allocation4_spill] sm:$0xff] }
  0xa0   : > { %v1344_v9 = vmul.f32 %v3424_v50, %v1212_v14  ;;  %v1366_v39 = vmul.f32 %v3442_v58, %v3311_v48  ;;  %v3895_v26 = vmul.f32 %v2611_v38, %v1322_v5  ;;  %v3897_v63 = vadd.f32 %v1401_v44, %v1381_v2 }
  0xa1   : > { %v1216_v51 = vsel %vm1209_vm3, %v4340_v20, %v4339_v31  ;;  %v1402_v18 = vmul.f32 %v3445_v41, %v4341_v61  ;;  %v4343_v29 = vrot.slane %v4342_v25, 1  ;;  %v4345_v22 = vrot.slane %v4344_v47, 1  ;;  %v4352_v61 = vld [vmem:[#allocation11_spill] sm:$0xff] }
  0xa2   : > { %v1380_v45 = vadd.f32 %v1364_v28, %v1344_v9  ;;  %v1346_v30 = vmul.f32 %v3424_v50, %v1216_v51  ;;  %v1347_v48 = vmul.f32 %v3424_v50, %v4346_v46  ;;  %v1367_v38 = vmul.f32 %v3442_v58, %v4344_v47  ;;  %v4350_v9 = vld [vmem:[#allocation7_spill] sm:$0xff] }
  0xa3   : > { %v1285_v8 = vsel %vm1274_vm2, %v4345_v22, %v4343_v29  ;;  %v1231_v17 = vrot.slane %v3756_v53, 7  ;;  %v4347_v57 = vrot.slane %v4342_v25, 7  ;;  %v4348_v52 = vrot.slane %v4344_v47, 7 }
  0xa4   : > { %v3912_v1 = vadd.f32 %v1400_v60, %v1380_v45  ;;  %v1382_v27 = vadd.f32 %v1366_v39, %v1346_v30  ;;  %v1403_v43 = vmul.f32 %v3445_v41, %v1285_v8  ;;  %v1383_v4 = vadd.f32 %v1367_v38, %v1347_v48 }
  0xa5   : > { %v1220_v44 = vsel %vm1209_vm3, %v4348_v52, %v4347_v57  ;;  %v1368_v7 = vmul.f32 %v3442_v58, %v4342_v25  ;;  %v1404_v21 = vmul.f32 %v3445_v41, %v3623_v0  ;;  %v1268_v14 = vmul.f32 %v3595_v34, %v3749_v32 }
  0xa6   : > { %v3926_v28 = vadd.f32 %v1402_v18, %v1382_v27  ;;  %v1348_v15 = vmul.f32 %v3424_v50, %v1220_v44  ;;  %v4349_v2 = vrot.slane %v3572_v23, 1  ;;  %v4351_v11 = vrot.slane %v4350_v9, 1 }
  0xa7   : > { %v3934_v5 = vadd.f32 %v1403_v43, %v1383_v4  ;;  %v1349_v31 = vmul.f32 %v3424_v50, %v3627_v35  ;;  %v1369_v0 = vmul.f32 %v3442_v58, %v4350_v9  ;;  %v1299_v32 = vsel %vm1274_vm2, %v1296_v3, %v1298_v40  ;;  %v4355_v4 = vld [vmem:[#allocation10_spill] sm:$0xff] }
  0xa8   : > { %v1289_v60 = vsel %vm1274_vm2, %v4351_v11, %v4349_v2  ;;  %v1234_v20 = vsel %vm1209_vm3, %v1231_v17, %v1233_v13  ;;  %v1384_v51 = vadd.f32 %v1368_v7, %v1348_v15  ;;  %v1223_v39 = vrot.slane %v3572_v23, 7  ;;  %v4358_v7 = vld [vmem:[#allocation13_spill] sm:$0xff] }
  0xa9   : > { %v1405_v34 = vmul.f32 %v3445_v41, %v1289_v60  ;;  %v1385_v45 = vadd.f32 %v1369_v0, %v1349_v31  ;;  %v1370_v35 = vmul.f32 %v3442_v58, %v3572_v23  ;;  %v1406_v30 = vmul.f32 %v3445_v41, %v3723_v6  ;;  %v4359_v60 = vld [vmem:[#allocation12_spill] sm:$0xff] }
  0xaa   : > { %v1225_v18 = vrot.slane %v4352_v61, 7  ;;  %v3953_v25 = vadd.f32 %v1404_v21, %v1384_v51  ;;  %v4353_v29 = vrot.slane %v4350_v9, 7  ;;  %v1372_v22 = vmul.f32 %v3442_v58, %v3613_v37 }
  0xab   : > { %v1408_v8 = vmul.f32 %v3445_v41, %v3732_v62  ;;  %v3962_v46 = vadd.f32 %v1405_v34, %v1385_v45  ;;  %v4354_v6 = vrot.slane %v3613_v37, 7  ;;  %v1334_v27 = vmul.f32 %v3691_v33, %v1299_v32 }
  0xac   : > { %v1224_v47 = vsel %vm1209_vm3, %v4353_v29, %v1223_v39  ;;  %v1226_v38 = vsel %vm1209_vm3, %v1223_v39, %v1225_v18  ;;  %v4356_v52 = vrot.slane %v3613_v37, 1  ;;  %v4357_v62 = vrot.slane %v4352_v61, 1 }
  0xad   : > { %v1350_v23 = vmul.f32 %v3424_v50, %v1224_v47  ;;  %v1228_v48 = vsel %vm1209_vm3, %v1225_v18, %v4354_v6  ;;  %v1266_v57 = vmul.f32 %v4355_v4, %v1226_v38  ;;  %v1270_v21 = vmul.f32 %v4358_v7, %v1234_v20 }
  0xae   : > { %v1352_v43 = vmul.f32 %v3424_v50, %v1228_v48  ;;  %v1293_v44 = vsel %vm1274_vm2, %v4357_v62, %v4356_v52  ;;  %v1371_v2 = vmul.f32 %v3442_v58, %v4352_v61  ;;  %v4360_v31 = vrot.slane %v4359_v60, 1  ;;  %v4024_v48 = vld [vmem:[%s4235_s9] ss:$0 sm:$0xff] }
  0xaf   : > { %v1386_v15 = vadd.f32 %v1370_v35, %v1350_v23  ;;  %v1407_v9 = vmul.f32 %v3445_v41, %v1293_v44  ;;  %v1351_v33 = vmul.f32 %v3424_v50, %v1266_v57  ;;  %v1353_v37 = vmul.f32 %v3424_v50, %v1268_v14 }
  0xb0   : > { %v1388_v11 = vadd.f32 %v1372_v22, %v1352_v43  ;;  %v1297_v0 = vsel %vm1274_vm2, %v4360_v31, %v1296_v3  ;;  %v1373_v32 = vmul.f32 %v3442_v58, %v4359_v60  ;;  %v4361_v51 = vrot.slane %v4359_v60, 7 }
  0xb1   : > { %v3986_v34 = vadd.f32 %v1406_v30, %v1386_v15  ;;  %v1409_v20 = vmul.f32 %v3445_v41, %v1297_v0  ;;  %v1387_v35 = vadd.f32 %v1371_v2, %v1351_v33  ;;  %v1374_v3 = vmul.f32 %v3442_v58, %v3756_v53 }
  0xb2   : > { %v1232_v39 = vsel %vm1209_vm3, %v4361_v51, %v1231_v17  ;;  %v3994_v45 = vadd.f32 %v1408_v8, %v1388_v11  ;;  %v1389_v14 = vadd.f32 %v1373_v32, %v1353_v37  ;;  %v1410_v30 = vmul.f32 %v3445_v41, %v1334_v27 }
  0xb3   : > { %v1354_v61 = vmul.f32 %v3424_v50, %v1232_v39  ;;  %v1301_v18 = vsel %vm1274_vm2, %v1298_v40, %v1300_v49  ;;  %v4005_v29 = vadd.f32 %v1407_v9, %v1387_v35  ;;  %v1355_v47 = vmul.f32 %v3424_v50, %v1270_v21 }
  0xb4   : > { %v4008_v22 = vadd.f32 %v1409_v20, %v1389_v14  ;;  %v1375_v8 = vmul.f32 %v3442_v58, %v3759_v54  ;;  %v1411_v53 = vmul.f32 %v3445_v41, %v1301_v18  ;;  %v1236_v23 = vsel %vm1209_vm3, %v1233_v13, %v1235_v10 }
  0xb5   : > { %v1390_v17 = vadd.f32 %v1374_v3, %v1354_v61  ;;  %v1356_v49 = vmul.f32 %v3424_v50, %v1236_v23  ;;  %v1376_v40 = vmul.f32 %v3442_v58, %v3803_v55  ;;  %v1412_v27 = vmul.f32 %v3445_v41, %v3828_v12 }
  0xb6   : > { %v1391_v38 = vadd.f32 %v1375_v8, %v1355_v47  ;;  %v1305_v54 = vsel %vm1274_vm2, %v1302_v16, %v1304_v19  ;;  %v1357_v55 = vmul.f32 %v3424_v50, %v3830_v42  ;;  %v1377_v43 = vmul.f32 %v3442_v58, %v3797_v56 }
  0xb7   : > { %v1426_v6 = vadd.f32 %v1410_v30, %v1390_v17  ;;  %v1392_v13 = vadd.f32 %v1376_v40, %v1356_v49  ;;  %v1413_v57 = vmul.f32 %v3445_v41, %v1305_v54  ;;  %v1239_v12 = vrot.slane %v3855_v24, 7  ;;  %v4112_v54 = vld [vmem:[%s4241_s15] ss:$0 sm:$0xff] }
  0xb8   : > { %v1427_v4 = vadd.f32 %v1411_v53, %v1391_v38  ;;  %v1378_v52 = vmul.f32 %v3442_v58, %v3855_v24  ;;  %v1437_v16 = vadd.f32 %v4024_v48, %v3870_v36  ;;  %v1393_v62 = vadd.f32 %v1377_v43, %v1357_v55  ;;  %v1870_v24 = vpop.permute.xlu0 %1869 }
  0xb9   : > { %v4034_v10 = vadd.f32 %v4024_v48, %v1426_v6  ;;  %v1428_v19 = vadd.f32 %v1412_v27, %v1392_v13  ;;  %v1414_v44 = vmul.f32 %v3445_v41, %v3895_v26  ;;  %vm1917_vm2 = vcmask 31744   ;;  %v1874_v41 = vpop.permute.xlu1 %1873 }
  0xba   : > { %v1449_v42 = vadd.f32 %v4024_v48, %v1427_v4  ;;  %v1240_v7 = vsel %vm1209_vm3, %v1237_v59, %v1239_v12  ;;  %vm1942_vm4 = vcmask 64512   ;;  %v1429_v15 = vadd.f32 %v1413_v57, %v1393_v62 }
  0xbb   : > { %v1450_v21 = vadd.f32 %v4024_v48, %v1428_v19  ;;  %v1358_v58 = vmul.f32 %v3424_v50, %v1240_v7  ;;  %v1439_v36 = vadd.f32 %v4024_v48, %v3897_v63  ;;  %v1918_v2 = vsel %vm1917_vm2, %v1437_v16, %v1870_v24 }
  0xbc   : > { %v1438_v26 = vadd.f32 %v4024_v48, %v3912_v1  ;;  %v1451_v56 = vadd.f32 %v4024_v48, %v1429_v15  ;;  %2670 = vmatprep.mubr.msk.f32.mxu0 %vm1942_vm4, %v1918_v2  ;;  %v1440_v59 = vadd.f32 %v4024_v48, %v3926_v28  ;;  %v1872_v33 = vpop.permute.xlu0 %1871  ;;  %v1441_v1 = vadd.f32 %v4024_v48, %v3934_v5 }
  0xbd   : > { %v1394_v9 = vadd.f32 %v1378_v52, %v1358_v58  ;;  %v1920_v50 = vsel %vm1917_vm2, %v1439_v36, %v1874_v41  ;;  %v1876_v60 = vpop.permute.xlu1 %1875  ;;  %v1442_v32 = vadd.f32 %v4024_v48, %v3953_v25  ;;  %v1443_v5 = vadd.f32 %v4024_v48, %v3962_v46 }
  0xbe   : > { %v1919_v63 = vsel %vm1917_vm2, %v1438_v26, %v1872_v33  ;;  %v1921_v0 = vsel %vm1917_vm2, %v1440_v59, %v1876_v60  ;;  %v1444_v61 = vadd.f32 %v4024_v48, %v3986_v34  ;;  %v1445_v25 = vadd.f32 %v4024_v48, %v4005_v29 }
  0xbf   : > { %v1430_v11 = vadd.f32 %v1414_v44, %v1394_v9  ;;  %2671 = vmatmul.mubr.msk.f32.vlgmr.msra.gmra.mrb[0].mxu0 %vm1942_vm4, %v1919_v63  ;;  %v1446_v46 = vadd.f32 %v4024_v48, %v3994_v45  ;;  %v1447_v34 = vadd.f32 %v4024_v48, %v4008_v22  ;;  %vm2189_vm3 = vcmask 57344  }
  0xc0   : > { %2673 = vmatprep.mubr.msk.f32.mxu0 %vm1942_vm4, %v1920_v50 }
  0xc1   : > { %v1452_v31 = vadd.f32 %v4024_v48, %v1430_v11  ;;  %v1878_v37 = vpop.permute.xlu0 %1877 }
  0xc2   : > { %v1922_v28 = vsel %vm1917_vm2, %v1441_v1, %v1878_v37 }
  0xc3   : > { %2674 = vmatmul.mubr.msk.f32.gmra.mrb[2].mxu0 %vm1942_vm4, %v1921_v0 }
  0xc4   : > { %2676 = vmatprep.mubr.msk.f32.mxu0 %vm1942_vm4, %v1922_v28 }
  0xcc   : > { %v1880_v20 = vpop.permute.xlu1 %1879 }
  0xcd   : > { %v1923_v51 = vsel %vm1917_vm2, %v1442_v32, %v1880_v20 }
  0xce   : > { %2677 = vmatmul.mubr.msk.f32.gmra.mrb[4].mxu0 %vm1942_vm4, %v1923_v51 }
  0xd3   : > { %v1882_v39 = vpop.permute.xlu0 %1881 }
  0xd4   : > { %v1924_v35 = vsel %vm1917_vm2, %v1443_v5, %v1882_v39 }
  0xd5   : > { %2679 = vmatprep.mubr.msk.f32.mxu0 %vm1942_vm4, %v1924_v35 }
  0xdd   : > { %v1884_v3 = vpop.permute.xlu1 %1883 }
  0xde   : > { %v1925_v14 = vsel %vm1917_vm2, %v1444_v61, %v1884_v3 }
  0xdf   : > { %2680 = vmatmul.mubr.msk.f32.gmra.mrb[6].mxu0 %vm1942_vm4, %v1925_v14 }
  0xe1   : > { %v1886_v30 = vpop.permute.xlu0 %1885 }
  0xe2   : > { %v1926_v18 = vsel %vm1917_vm2, %v1445_v25, %v1886_v30 }
  0xe3   : > { %2682 = vmatprep.mubr.msk.f32.mxu1 %vm1942_vm4, %v1926_v18 }
  0xe9   : > { %v1888_v17 = vpop.permute.xlu1 %1887 }
  0xea   : > { %v1927_v47 = vsel %vm1917_vm2, %v1446_v46, %v1888_v17 }
  0xeb   : > { %2683 = vmatmul.mubr.msk.f32.vlgmr.msra.gmra.mrb[0].mxu1 %vm1942_vm4, %v1927_v47 }
  0xef   : > { %v1890_v8 = vpop.permute.xlu0 %1889 }
  0xf0   : > { %v1928_v29 = vsel %vm1917_vm2, %v1447_v34, %v1890_v8 }
  0xf1   : > { %2685 = vmatprep.mubr.msk.f32.mxu1 %vm1942_vm4, %v1928_v29 }
  0xf9   : > { %v1892_v53 = vpop.permute.xlu1 %1891 }
  0xfa   : > { %v1929_v23 = vsel %vm1917_vm2, %v4034_v10, %v1892_v53 }
  0xfb   : > { %2686 = vmatmul.mubr.msk.f32.gmra.mrb[2].mxu1 %vm1942_vm4, %v1929_v23 }
  0xfd   : > { %v1894_v45 = vpop.permute.xlu0 %1893 }
  0xfe   : > { %v1930_v6 = vsel %vm1917_vm2, %v1449_v42, %v1894_v45 }
  0xff   : > { %2688 = vmatprep.mubr.msk.f32.mxu1 %vm1942_vm4, %v1930_v6 }
 0x109   : > { %v1896_v49 = vpop.permute.xlu1 %1895 }
 0x10a   : > { %v1931_v22 = vsel %vm1917_vm2, %v1450_v21, %v1896_v49 }
 0x10b   : > { %2689 = vmatmul.mubr.msk.f32.gmra.mrb[4].mxu1 %vm1942_vm4, %v1931_v22 }
 0x10e   : > { %v1898_v40 = vpop.permute.xlu0 %1897 }
 0x10f   : > { %v1932_v48 = vsel %vm1917_vm2, %v1451_v56, %v1898_v40 }
 0x110   : > { %2691 = vmatprep.mubr.msk.f32.mxu1 %vm1942_vm4, %v1932_v48 }
 0x111   : > { %v1900_v38 = vpop.permute.xlu1 %1899 }
 0x112   : > { %v1933_v27 = vsel %vm1917_vm2, %v1452_v31, %v1900_v38 }
 0x113   : > { %2692 = vmatmul.mubr.msk.f32.gmra.mrb[6].mxu1 %vm1942_vm4, %v1933_v27 }
 0x192   : > { %v2672_v10 = vpop.f32.mrb[0].mxu0 }
 0x193   : > { %v2063_v13 = vadd.f32 %v2672_v10, %v4112_v54  ;;  %v2057_v55 = vpop.f32.mrb[1].mxu0 }
 0x194   : > { %v2058_v43 = vadd.f32 %v4112_v54, %v2057_v55 }
 0x195   : > { %2137 = vst.msk [vmem:[%s4119_s2 + $0x8] sm:$0xff] %vm1942_vm4, %v2063_v13  ;;  %v2153_v4 = vsel %vm1942_vm4, %v2063_v13, 0.0  ;;  %v2192_v57 = vmul.f32 %v2063_v13, %v2063_v13 }
 0x196   : > { %2136 = vst.msk [vmem:[%s4119_s2] sm:$0xff] %vm1942_vm4, %v2058_v43  ;;  %v2152_v12 = vsel %vm1942_vm4, %v2058_v43, 0.0  ;;  %v2191_v52 = vmul.f32 %v2058_v43, %v2058_v43  ;;  %v2675_v16 = vpop.f32.mrb[2].mxu0 }
 0x197   : > { %v2208_v19 = vsel %vm1942_vm4, %v2192_v57, 0.0  ;;  %v2154_v62 = vadd.f32 %v2153_v4, %v2152_v12  ;;  %v2073_v44 = vadd.f32 %v2675_v16, %v4112_v54  ;;  %v2067_v42 = vpop.f32.mrb[3].mxu0 }
 0x198   : > { %v2207_v7 = vsel %vm1942_vm4, %v2191_v52, 0.0  ;;  %v2068_v21 = vadd.f32 %v4112_v54, %v2067_v42 }
 0x199   : > { %v2209_v15 = vadd.f32 %v2208_v19, %v2207_v7  ;;  %2139 = vst.msk [vmem:[%s4119_s2 + $0x18] sm:$0xff] %vm1942_vm4, %v2073_v44  ;;  %v2194_v58 = vmul.f32 %v2073_v44, %v2073_v44  ;;  %v2157_v41 = vsel %vm1942_vm4, %v2073_v44, 0.0 }
 0x19a   : > { %2138 = vst.msk [vmem:[%s4119_s2 + $0x10] sm:$0xff] %vm1942_vm4, %v2068_v21  ;;  %v2155_v24 = vsel %vm1942_vm4, %v2068_v21, 0.0  ;;  %v2193_v36 = vmul.f32 %v2068_v21, %v2068_v21 }
 0x19b   : > { %v2156_v2 = vadd.f32 %v2155_v24, %v2154_v62  ;;  %v2212_v59 = vsel %vm1942_vm4, %v2194_v58, 0.0 }
 0x19c   : > { %v2210_v26 = vsel %vm1942_vm4, %v2193_v36, 0.0 }
 0x19d   : > { %v2211_v56 = vadd.f32 %v2210_v26, %v2209_v15  ;;  %v2158_v9 = vadd.f32 %v2157_v41, %v2156_v2 }
 0x19f   : > { %v2213_v11 = vadd.f32 %v2212_v59, %v2211_v56 }
 0x1a1   : > { %v2678_v50 = vpop.f32.mrb[4].mxu0 }
 0x1a2   : > { %v2083_v33 = vadd.f32 %v2678_v50, %v4112_v54  ;;  %v2077_v63 = vpop.f32.mrb[5].mxu0 }
 0x1a3   : > { %v2078_v60 = vadd.f32 %v4112_v54, %v2077_v63 }
 0x1a4   : > { %2141 = vst.msk [vmem:[%s4119_s2 + $0x28] sm:$0xff] %vm1942_vm4, %v2083_v33  ;;  %v2196_v31 = vmul.f32 %v2083_v33, %v2083_v33  ;;  %v2161_v28 = vsel %vm1942_vm4, %v2083_v33, 0.0 }
 0x1a5   : > { %2140 = vst.msk [vmem:[%s4119_s2 + $0x20] sm:$0xff] %vm1942_vm4, %v2078_v60  ;;  %v2159_v1 = vsel %vm1942_vm4, %v2078_v60, 0.0  ;;  %v2195_v0 = vmul.f32 %v2078_v60, %v2078_v60 }
 0x1a6   : > { %v2160_v37 = vadd.f32 %v2159_v1, %v2158_v9  ;;  %v2216_v5 = vsel %vm1942_vm4, %v2196_v31, 0.0 }
 0x1a7   : > { %v2214_v32 = vsel %vm1942_vm4, %v2195_v0, 0.0 }
 0x1a8   : > { %v2215_v20 = vadd.f32 %v2214_v32, %v2213_v11  ;;  %v2162_v51 = vadd.f32 %v2161_v28, %v2160_v37 }
 0x1aa   : > { %v2217_v39 = vadd.f32 %v2216_v5, %v2215_v20 }
 0x1b2   : > { %v2681_v35 = vpop.f32.mrb[6].mxu0 }
 0x1b3   : > { %v2093_v61 = vadd.f32 %v2681_v35, %v4112_v54  ;;  %v2087_v3 = vpop.f32.mrb[7].mxu0 }
 0x1b4   : > { %v2088_v14 = vadd.f32 %v4112_v54, %v2087_v3 }
 0x1b5   : > { %2143 = vst.msk [vmem:[%s4119_s2 + $0x38] sm:$0xff] %vm1942_vm4, %v2093_v61  ;;  %v2198_v25 = vmul.f32 %v2093_v61, %v2093_v61  ;;  %v2165_v17 = vsel %vm1942_vm4, %v2093_v61, 0.0 }
 0x1b6   : > { %2142 = vst.msk [vmem:[%s4119_s2 + $0x30] sm:$0xff] %vm1942_vm4, %v2088_v14  ;;  %v2163_v30 = vsel %vm1942_vm4, %v2088_v14, 0.0  ;;  %v2197_v18 = vmul.f32 %v2088_v14, %v2088_v14 }
 0x1b7   : > { %v2164_v46 = vadd.f32 %v2163_v30, %v2162_v51  ;;  %v2220_v29 = vsel %vm1942_vm4, %v2198_v25, 0.0 }
 0x1b8   : > { %v2218_v47 = vsel %vm1942_vm4, %v2197_v18, 0.0 }
 0x1b9   : > { %v2219_v34 = vadd.f32 %v2218_v47, %v2217_v39  ;;  %v2166_v8 = vadd.f32 %v2165_v17, %v2164_v46 }
 0x1bb   : > { %v2221_v53 = vadd.f32 %v2220_v29, %v2219_v34 }
 0x1be   : > { %v2684_v23 = vpop.f32.mrb[0].mxu1 }
 0x1bf   : > { %v2103_v45 = vadd.f32 %v2684_v23, %v4112_v54  ;;  %v2097_v6 = vpop.f32.mrb[1].mxu1 }
 0x1c0   : > { %v2098_v49 = vadd.f32 %v4112_v54, %v2097_v6 }
 0x1c1   : > { %2145 = vst.msk [vmem:[%s4119_s2 + $0x48] sm:$0xff] %vm1942_vm4, %v2103_v45  ;;  %v2200_v22 = vmul.f32 %v2103_v45, %v2103_v45  ;;  %v2169_v27 = vsel %vm1942_vm4, %v2103_v45, 0.0 }
 0x1c2   : > { %2144 = vst.msk [vmem:[%s4119_s2 + $0x40] sm:$0xff] %vm1942_vm4, %v2098_v49  ;;  %v2167_v40 = vsel %vm1942_vm4, %v2098_v49, 0.0  ;;  %v2199_v48 = vmul.f32 %v2098_v49, %v2098_v49 }
 0x1c3   : > { %v2168_v38 = vadd.f32 %v2167_v40, %v2166_v8  ;;  %v2224_v43 = vsel %vm1942_vm4, %v2200_v22, 0.0 }
 0x1c4   : > { %v2222_v10 = vsel %vm1942_vm4, %v2199_v48, 0.0 }
 0x1c5   : > { %v2223_v13 = vadd.f32 %v2222_v10, %v2221_v53  ;;  %v2170_v55 = vadd.f32 %v2169_v27, %v2168_v38 }
 0x1c7   : > { %v2225_v4 = vadd.f32 %v2224_v43, %v2223_v13 }
 0x1ce   : > { %v2687_v57 = vpop.f32.mrb[2].mxu1 }
 0x1cf   : > { %v2113_v12 = vadd.f32 %v2687_v57, %v4112_v54  ;;  %v2107_v52 = vpop.f32.mrb[3].mxu1 }
 0x1d0   : > { %v2108_v16 = vadd.f32 %v4112_v54, %v2107_v52 }
 0x1d1   : > { %2147 = vst.msk [vmem:[%s4119_s2 + $0x58] sm:$0xff] %vm1942_vm4, %v2113_v12  ;;  %v2202_v19 = vmul.f32 %v2113_v12, %v2113_v12  ;;  %v2173_v7 = vsel %vm1942_vm4, %v2113_v12, 0.0 }
 0x1d2   : > { %2146 = vst.msk [vmem:[%s4119_s2 + $0x50] sm:$0xff] %vm1942_vm4, %v2108_v16  ;;  %v2171_v62 = vsel %vm1942_vm4, %v2108_v16, 0.0  ;;  %v2201_v44 = vmul.f32 %v2108_v16, %v2108_v16 }
 0x1d3   : > { %v2172_v42 = vadd.f32 %v2171_v62, %v2170_v55  ;;  %v2228_v24 = vsel %vm1942_vm4, %v2202_v19, 0.0 }
 0x1d4   : > { %v2226_v21 = vsel %vm1942_vm4, %v2201_v44, 0.0 }
 0x1d5   : > { %v2227_v15 = vadd.f32 %v2226_v21, %v2225_v4  ;;  %v2174_v58 = vadd.f32 %v2173_v7, %v2172_v42 }
 0x1d7   : > { %v2229_v36 = vadd.f32 %v2228_v24, %v2227_v15 }
 0x1de   : > { %v2690_v2 = vpop.f32.mrb[4].mxu1 }
 0x1df   : > { %v2123_v41 = vadd.f32 %v2690_v2, %v4112_v54  ;;  %v2117_v26 = vpop.f32.mrb[5].mxu1 }
 0x1e0   : > { %v2118_v56 = vadd.f32 %v4112_v54, %v2117_v26 }
 0x1e1   : > { %2149 = vst.msk [vmem:[%s4119_s2 + $0x68] sm:$0xff] %vm1942_vm4, %v2123_v41  ;;  %v2204_v9 = vmul.f32 %v2123_v41, %v2123_v41  ;;  %v2177_v33 = vsel %vm1942_vm4, %v2123_v41, 0.0 }
 0x1e2   : > { %2148 = vst.msk [vmem:[%s4119_s2 + $0x60] sm:$0xff] %vm1942_vm4, %v2118_v56  ;;  %v2175_v59 = vsel %vm1942_vm4, %v2118_v56, 0.0  ;;  %v2203_v11 = vmul.f32 %v2118_v56, %v2118_v56 }
 0x1e3   : > { %v2176_v50 = vadd.f32 %v2175_v59, %v2174_v58  ;;  %v2232_v1 = vsel %vm1942_vm4, %v2204_v9, 0.0 }
 0x1e4   : > { %v2230_v63 = vsel %vm1942_vm4, %v2203_v11, 0.0 }
 0x1e5   : > { %v2231_v60 = vadd.f32 %v2230_v63, %v2229_v36  ;;  %v2178_v31 = vadd.f32 %v2177_v33, %v2176_v50 }
 0x1e6   : > { %v2693_v0 = vpop.f32.mrb[6].mxu1 }
 0x1e7   : > { %v2133_v37 = vadd.f32 %v2693_v0, %v4112_v54  ;;  %v2127_v28 = vpop.f32.mrb[7].mxu1  ;;  %v2233_v32 = vadd.f32 %v2232_v1, %v2231_v60 }
 0x1e8   : > { %v2128_v20 = vadd.f32 %v4112_v54, %v2127_v28 }
 0x1e9   : > { %2151 = vst.msk [vmem:[%s4119_s2 + $0x78] sm:$0xff] %vm1942_vm4, %v2133_v37  ;;  %v2206_v51 = vmul.f32 %v2133_v37, %v2133_v37  ;;  %v2181_v61 = vsel %vm1942_vm4, %v2133_v37, 0.0 }
 0x1ea   : > { %2150 = vst.msk [vmem:[%s4119_s2 + $0x70] sm:$0xff] %vm1942_vm4, %v2128_v20  ;;  %v2179_v5 = vsel %vm1942_vm4, %v2128_v20, 0.0  ;;  %v2205_v39 = vmul.f32 %v2128_v20, %v2128_v20 }
 0x1eb   : > { %v2180_v35 = vadd.f32 %v2179_v5, %v2178_v31  ;;  %v2236_v30 = vsel %vm1942_vm4, %v2206_v51, 0.0 }
 0x1ec   : > { %v2234_v3 = vsel %vm1942_vm4, %v2205_v39, 0.0 }
 0x1ed   : > { %v2182_v14 = vadd.f32 %v2181_v61, %v2180_v35  ;;  %v2235_v25 = vadd.f32 %v2234_v3, %v2233_v32 }
 0x1ef   : > { %v2183_v18 = vrot.slane %v2182_v14, 4  ;;  %v2237_v54 = vadd.f32 %v2236_v30, %v2235_v25 }
 0x1f1   : > { %v2184_v46 = vadd.f32 %v2183_v18, %v2182_v14  ;;  %v2238_v17 = vrot.slane %v2237_v54, 4 }
 0x1f3   : > { %v2185_v47 = vrot.slane %v2184_v46, 2  ;;  %v2239_v34 = vadd.f32 %v2238_v17, %v2237_v54 }
 0x1f5   : > { %v2186_v8 = vadd.f32 %v2185_v47, %v2184_v46  ;;  %v2240_v29 = vrot.slane %v2239_v34, 2 }
 0x1f7   : > { %v2187_v53 = vrot.slane %v2186_v8, 1  ;;  %v2241_v23 = vadd.f32 %v2240_v29, %v2239_v34 }
 0x1f9   : > { %v2188_v45 = vadd.f32 %v2187_v53, %v2186_v8  ;;  %v2242_v6 = vrot.slane %v2241_v23, 1 }
 0x1fb   : > { %2190 = vst.msk [vmem:[%s936_s1] sm:$0x1] %vm2189_vm3, %v2188_v45  ;;  %v2243_v49 = vadd.f32 %v2242_v6, %v2241_v23 }
 0x1fd   : > { %2244 = vst.msk [vmem:[%s943_s6] sm:$0x1] %vm2189_vm3, %v2243_v49 }
 0x1fe PF: > { %s29_s0 = sadd.s32 1, %s2776_s0   ;;  %s4363_s21 = sld [smem:[#allocation2_spill]] }
 0x1ff   : > { %p26_p2 = scmp.ge.s32.totalorder %s29_s0, 6   ;;  %s4364_s20 = sld [smem:[#allocation3_spill]] }
 0x200   : > { %s4365_s27 = smov %s2768_s29  ;;  %s4366_s28 = smov %s2772_s30 }
 0x201   :  { %28 = sbr.rel (!%p26_p2) target bundleno = 10 (0xa), region = 153 }
 0x204   : > { %s4367_s29 = smov %s4363_s21 }
 0x205   : > { %s4368_s30 = smov %s4364_s20 }

</bundles_post_ra>
